<compile_context>
chip_gen: v5e
topology: v5e:2x2
jax: 0.10.0
libtpu: 0.0.40
codegen_flags: <defaults>
</compile_context>

<pallas_src>
import functools

import jax
import jax.numpy as jnp
from jax import lax
from jax.experimental import pallas as pl
from jax.experimental.pallas import tpu as pltpu

EPS = 1e-5


def _group_reduce_spread(stats, group_size):
    """stats: (C, k) f32, channels grouped in contiguous runs of `group_size`.

    Returns (C, k) where every row holds its group's sum over rows.  Uses only
    sublane rolls (XLU) on a tiny array -- no reshapes, no one-hot matmuls.
    """
    c = stats.shape[0]
    if group_size == 1:
        return stats
    # Trailing windowed sum: row (g*gs + gs-1) ends up holding the group sum.
    t = stats
    for k in range(1, group_size):
        t = t + pltpu.roll(stats, k, 0)
    # Keep only the last row of each group, then spread it back upward.
    row = lax.broadcasted_iota(jnp.int32, (c, 1), 0)
    m = jnp.where((row % group_size) == (group_size - 1), t, 0.0)
    out = m
    for k in range(1, group_size):
        out = out + pltpu.roll(m, (-k) % c, 0)
    return out


def _group_norm_cf(y, gamma, beta, group_size):
    """GroupNorm on a channels-first (C, HW) tile; contiguous channel groups."""
    _, hw = y.shape
    cnt = float(group_size * hw)
    s = jnp.sum(y, axis=1, keepdims=True)        # (C, 1) per-channel sum
    ss = jnp.sum(y * y, axis=1, keepdims=True)   # (C, 1) per-channel sum of sq
    gs = _group_reduce_spread(s, group_size)
    gss = _group_reduce_spread(ss, group_size)
    mean = gs / cnt
    var = gss / cnt - mean * mean
    return (y - mean) * lax.rsqrt(var + EPS) * gamma + beta


def _bottleneck_kernel(x_ref, w1_ref, w2_ref, w3_ref,
                       g1_ref, b1_ref, g2_ref, b2_ref, g3_ref, b3_ref,
                       o_ref, *, H, W, gs_mid, gs_exp):
    HW = H * W
    x = x_ref[0]                                              # (Cin, HW) f32

    # ------------- stage 1: conv1 (1x1) + GN + ReLU -----------------------
    y1 = jnp.dot(w1_ref[...], x.astype(jnp.bfloat16),
                 preferred_element_type=jnp.float32)          # (Cmid, HW)
    y1 = jnp.maximum(_group_norm_cf(y1, g1_ref[...], b1_ref[...], gs_mid), 0.0)

    # ------------- stage 2: conv2 (3x3, pad=1, stride=1) + GN + ReLU ------
    # tap(dy,dx)[c, p] = y1[c, p + (dy-1)*W + (dx-1)] (zero outside the image)
    # obtained with lane rolls; boundary positions are zeroed with masks.
    pos = lax.broadcasted_iota(jnp.int32, (1, HW), 1)
    col = pos % W
    row_masks = (pos >= W, None, pos < HW - W)                # dy = 0, 1, 2
    col_masks = (col >= 1, None, col <= W - 2)                # dx = 0, 1, 2

    taps = []
    for dy in range(3):
        for dx in range(3):
            off = (dy - 1) * W + (dx - 1)
            tap = y1 if off == 0 else pltpu.roll(y1, (-off) % HW, 1)
            mask = None
            for m in (row_masks[dy], col_masks[dx]):
                if m is not None:
                    mask = m if mask is None else jnp.logical_and(mask, m)
            if mask is not None:
                tap = jnp.where(mask, tap, 0.0)
            taps.append(tap.astype(jnp.bfloat16))
    taps_big = jnp.concatenate(taps, axis=0)                  # (9*Cmid, HW)
    acc2 = jnp.dot(w2_ref[...], taps_big,
                   preferred_element_type=jnp.float32)        # (Cmid, HW)
    y2 = jnp.maximum(_group_norm_cf(acc2, g2_ref[...], b2_ref[...], gs_mid), 0.0)

    # ------------- stage 3: conv3 (1x1) + GN + residual + ReLU ------------
    y3 = jnp.dot(w3_ref[...], y2.astype(jnp.bfloat16),
                 preferred_element_type=jnp.float32)          # (Cexp, HW)
    y3 = _group_norm_cf(y3, g3_ref[...], b3_ref[...], gs_exp)
    o_ref[0] = jnp.maximum(y3 + x, 0.0).astype(o_ref.dtype)


def bottleneck_forward(x_nchw, params, out_channel, stride=1, expansion=4,
                       num_groups=32):
    """Fused Bottleneck forward. x_nchw: (N, Cin, H, W) float32."""
    cexp = out_channel * expansion
    n, cin, h, w = x_nchw.shape
    hw = h * w
    assert stride == 1 and cin == cexp, "only the downsample=None path is supported"
    assert out_channel % num_groups == 0 and cexp % num_groups == 0

    # NCHW is already (N, C, H*W)-contiguous: these reshapes are free (no HBM
    # relayout), the kernel consumes/produces the channels-first layout directly.
    x = x_nchw.reshape(n, cin, hw)

    kern = functools.partial(
        _bottleneck_kernel, H=h, W=w,
        gs_mid=out_channel // num_groups, gs_exp=cexp // num_groups)

    flops = 2 * n * hw * (cin * out_channel
                          + 9 * out_channel * out_channel
                          + out_channel * cexp)
    bytes_accessed = 4 * n * hw * (cin + cexp) + 2 * (
        cin * out_channel + 9 * out_channel * out_channel + out_channel * cexp)

    out = pl.pallas_call(
        kern,
        out_shape=jax.ShapeDtypeStruct((n, cexp, hw), jnp.float32),
        grid=(n,),
        in_specs=[
            pl.BlockSpec((1, cin, hw), lambda i: (i, 0, 0)),
            pl.BlockSpec((out_channel, cin), lambda i: (0, 0)),
            pl.BlockSpec((out_channel, 9 * out_channel), lambda i: (0, 0)),
            pl.BlockSpec((cexp, out_channel), lambda i: (0, 0)),
            pl.BlockSpec((out_channel, 1), lambda i: (0, 0)),
            pl.BlockSpec((out_channel, 1), lambda i: (0, 0)),
            pl.BlockSpec((out_channel, 1), lambda i: (0, 0)),
            pl.BlockSpec((out_channel, 1), lambda i: (0, 0)),
            pl.BlockSpec((cexp, 1), lambda i: (0, 0)),
            pl.BlockSpec((cexp, 1), lambda i: (0, 0)),
        ],
        out_specs=pl.BlockSpec((1, cexp, hw), lambda i: (i, 0, 0)),
        compiler_params=pltpu.CompilerParams(
            dimension_semantics=("parallel",)),   # shard samples across TCs
        cost_estimate=pl.CostEstimate(
            flops=flops,
            transcendentals=n * (2 * out_channel + cexp),
            bytes_accessed=bytes_accessed),
    )(x, params["w1"], params["w2"], params["w3"],
      params["g1"], params["b1"], params["g2"], params["b2"],
      params["g3"], params["b3"])

    return out.reshape(n, cexp, h, w)


def init_params(key, in_channel, out_channel, expansion=4):
    cexp = out_channel * expansion
    ks = jax.random.split(key, 9)
    # Conv weights stored matmul-ready for the channels-first kernel (bf16):
    #   w1: (Cmid, Cin)                       1x1 conv
    #   w2: (Cmid, 9*Cmid); K-block k=3*dy+dx holds that tap's (Cout, Cin)
    #   w3: (Cexp, Cmid)                      1x1 conv
    w1 = (0.05 * jax.random.normal(ks[0], (out_channel, in_channel))).astype(jnp.bfloat16)
    w2 = (0.05 * jax.random.normal(ks[1], (out_channel, 9 * out_channel))).astype(jnp.bfloat16)
    w3 = (0.05 * jax.random.normal(ks[2], (cexp, out_channel))).astype(jnp.bfloat16)

    # GroupNorm affine params, shaped (C, 1) so they broadcast over the lane
    # (HW) dim in-kernel.  (PyTorch default init is weight=1, bias=0; we
    # randomize to exercise the affine path -- semantics are identical.)
    def affine(kw, kb, c):
        return (1.0 + 0.1 * jax.random.normal(kw, (c, 1), jnp.float32),
                0.1 * jax.random.normal(kb, (c, 1), jnp.float32))

    g1, b1 = affine(ks[3], ks[4], out_channel)
    g2, b2 = affine(ks[5], ks[6], out_channel)
    g3, b3 = affine(ks[7], ks[8], cexp)
    return dict(w1=w1, w2=w2, w3=w3, g1=g1, b1=b1, g2=g2, b2=b2, g3=g3, b3=b3)


def reference_forward(x_nchw, params, out_channel, expansion=4, num_groups=32):
    """Pure-JAX f32 reference (same bf16-rounded weights, upcast to f32)."""
    def gn(y, gamma, beta):
        n, c, hh, ww = y.shape
        yg = y.reshape(n, num_groups, -1)
        mean = jnp.mean(yg, axis=2, keepdims=True)
        var = jnp.mean((yg - mean) ** 2, axis=2, keepdims=True)
        yn = ((yg - mean) / jnp.sqrt(var + EPS)).reshape(n, c, hh, ww)
        return yn * gamma.reshape(1, c, 1, 1) + beta.reshape(1, c, 1, 1)

    hi = lax.Precision.HIGHEST
    cmid = out_channel
    w1 = params["w1"].astype(jnp.float32)                               # (Cmid, Cin)
    w2 = params["w2"].astype(jnp.float32).reshape(cmid, 3, 3, cmid)     # (co,dy,dx,ci)
    w2 = jnp.transpose(w2, (1, 2, 3, 0))                                # HWIO
    w3 = params["w3"].astype(jnp.float32)                               # (Cexp, Cmid)

    y = jnp.einsum("nchw,dc->ndhw", x_nchw, w1, precision=hi)
    y = jnp.maximum(gn(y, params["g1"], params["b1"]), 0.0)
    y = lax.conv_general_dilated(y, w2, window_strides=(1, 1),
                                 padding=((1, 1), (1, 1)),
                                 dimension_numbers=("NCHW", "HWIO", "NCHW"),
                                 precision=hi)
    y = jnp.maximum(gn(y, params["g2"], params["b2"]), 0.0)
    y = jnp.einsum("nchw,dc->ndhw", y, w3, precision=hi)
    y = gn(y, params["g3"], params["b3"])
    return jnp.maximum(y + x_nchw, 0.0)


if __name__ == "__main__":
    # GroupNorm(32, C) needs C % 32 == 0; the identity residual needs IN_C == 4*OUT_C.
    N, IN_C, H, W = 2, 128, 16, 16
    OUT_C, STRIDE = 32, 1

    key = jax.random.PRNGKey(0)
    kx, kp = jax.random.split(key)
    x = jax.random.normal(kx, (N, IN_C, H, W), jnp.float32)
    params = init_params(kp, IN_C, OUT_C)

    fwd = jax.jit(functools.partial(bottleneck_forward, out_channel=OUT_C, stride=STRIDE))
    out = jax.block_until_ready(fwd(x, params))
    assert out.shape == (N, OUT_C * 4, H, W), out.shape
    assert bool(jnp.all(jnp.isfinite(out)))

    # Correctness vs pure-JAX reference (bf16 MXU operands => ~1e-2 scale noise).
    ref = reference_forward(x, params, OUT_C)
    rel = float(jnp.linalg.norm(out - ref) / (jnp.linalg.norm(ref) + 1e-12))
    assert rel < 2e-2, f"relative L2 error vs reference too large: {rel}"
    print("KERNEL_OK")
</pallas_src>

<mosaic_0001>
module attributes {stable_mosaic.version = 11 : i64} {
  func.func @_bottleneck_kernel(%arg0: i32, %arg1: memref<1x128x256xf32, #tpu.memory_space<vmem>>, %arg2: memref<32x128xbf16, #tpu.memory_space<vmem>>, %arg3: memref<32x288xbf16, #tpu.memory_space<vmem>>, %arg4: memref<128x32xbf16, #tpu.memory_space<vmem>>, %arg5: memref<32x1xf32, #tpu.memory_space<vmem>>, %arg6: memref<32x1xf32, #tpu.memory_space<vmem>>, %arg7: memref<32x1xf32, #tpu.memory_space<vmem>>, %arg8: memref<32x1xf32, #tpu.memory_space<vmem>>, %arg9: memref<128x1xf32, #tpu.memory_space<vmem>>, %arg10: memref<128x1xf32, #tpu.memory_space<vmem>>, %arg11: memref<1x128x256xf32, #tpu.memory_space<vmem>>) attributes {dimension_semantics = [#tpu.dimension_semantics<parallel>], iteration_bounds = array<i64: 2>, scalar_prefetch = 0 : i64, scratch_operands = 0 : i64, tpu.core_type = #tpu.core_type<tc>, window_params = [{transform_indices = @transform_0, window_bounds = array<i64: 1, 128, 256>}, {pipeline_mode = #tpu.pipeline_mode<synchronous>, transform_indices = @transform_1, window_bounds = array<i64: 32, 128>}, {pipeline_mode = #tpu.pipeline_mode<synchronous>, transform_indices = @transform_2, window_bounds = array<i64: 32, 288>}, {pipeline_mode = #tpu.pipeline_mode<synchronous>, transform_indices = @transform_3, window_bounds = array<i64: 128, 32>}, {pipeline_mode = #tpu.pipeline_mode<synchronous>, transform_indices = @transform_4, window_bounds = array<i64: 32, 1>}, {pipeline_mode = #tpu.pipeline_mode<synchronous>, transform_indices = @transform_5, window_bounds = array<i64: 32, 1>}, {pipeline_mode = #tpu.pipeline_mode<synchronous>, transform_indices = @transform_6, window_bounds = array<i64: 32, 1>}, {pipeline_mode = #tpu.pipeline_mode<synchronous>, transform_indices = @transform_7, window_bounds = array<i64: 32, 1>}, {pipeline_mode = #tpu.pipeline_mode<synchronous>, transform_indices = @transform_8, window_bounds = array<i64: 128, 1>}, {pipeline_mode = #tpu.pipeline_mode<synchronous>, transform_indices = @transform_9, window_bounds = array<i64: 128, 1>}, {transform_indices = @transform_10, window_bounds = array<i64: 1, 128, 256>}]} {
    %c0 = arith.constant 0 : index
    %c0_0 = arith.constant 0 : index
    %c0_1 = arith.constant 0 : index
    %0 = vector.load %arg1[%c0, %c0_0, %c0_1] : memref<1x128x256xf32, #tpu.memory_space<vmem>>, vector<1x128x256xf32>
    %1 = vector.shape_cast %0 : vector<1x128x256xf32> to vector<128x256xf32>
    %c0_2 = arith.constant 0 : index
    %c0_3 = arith.constant 0 : index
    %2 = vector.load %arg2[%c0_2, %c0_3] : memref<32x128xbf16, #tpu.memory_space<vmem>>, vector<32x128xbf16>
    %3 = arith.truncf %1 : vector<128x256xf32> to vector<128x256xbf16>
    %cst = arith.constant dense<0.000000e+00> : vector<32x256xf32>
    %4 = tpu.matmul %2, %3, %cst {dimension_numbers = #tpu.dot_dimension_numbers<[1], [0], [0], [1], [0, 0, 1, 1], [], []>} : vector<32x128xbf16>, vector<128x256xbf16>, vector<32x256xf32> -> vector<32x256xf32>
    %c0_4 = arith.constant 0 : index
    %c0_5 = arith.constant 0 : index
    %5 = vector.load %arg5[%c0_4, %c0_5] : memref<32x1xf32, #tpu.memory_space<vmem>>, vector<32x1xf32>
    %c0_6 = arith.constant 0 : index
    %c0_7 = arith.constant 0 : index
    %6 = vector.load %arg6[%c0_6, %c0_7] : memref<32x1xf32, #tpu.memory_space<vmem>>, vector<32x1xf32>
    %cst_8 = arith.constant dense<0.000000e+00> : vector<32xf32>
    %7 = vector.multi_reduction <add>, %4, %cst_8 [1] : vector<32x256xf32> to vector<32xf32>
    %8 = vector.shape_cast %7 : vector<32xf32> to vector<32x1xf32>
    %9 = arith.mulf %4, %4 : vector<32x256xf32>
    %cst_9 = arith.constant dense<0.000000e+00> : vector<32xf32>
    %10 = vector.multi_reduction <add>, %9, %cst_9 [1] : vector<32x256xf32> to vector<32xf32>
    %11 = vector.shape_cast %10 : vector<32xf32> to vector<32x1xf32>
    %cst_10 = arith.constant 2.560000e+02 : f32
    %12 = vector.broadcast %cst_10 : f32 to vector<32x1xf32>
    %13 = arith.divf %8, %12 : vector<32x1xf32>
    %cst_11 = arith.constant 2.560000e+02 : f32
    %14 = vector.broadcast %cst_11 : f32 to vector<32x1xf32>
    %15 = arith.divf %11, %14 : vector<32x1xf32>
    %16 = arith.mulf %13, %13 : vector<32x1xf32>
    %17 = arith.subf %15, %16 : vector<32x1xf32>
    %18 = vector.broadcast %13 : vector<32x1xf32> to vector<32x256xf32>
    %19 = arith.subf %4, %18 : vector<32x256xf32>
    %cst_12 = arith.constant 9.99999974E-6 : f32
    %20 = vector.broadcast %cst_12 : f32 to vector<32x1xf32>
    %21 = arith.addf %17, %20 : vector<32x1xf32>
    %22 = math.rsqrt %21 : vector<32x1xf32>
    %23 = vector.broadcast %22 : vector<32x1xf32> to vector<32x256xf32>
    %24 = arith.mulf %19, %23 : vector<32x256xf32>
    %25 = vector.broadcast %5 : vector<32x1xf32> to vector<32x256xf32>
    %26 = arith.mulf %24, %25 : vector<32x256xf32>
    %27 = vector.broadcast %6 : vector<32x1xf32> to vector<32x256xf32>
    %28 = arith.addf %26, %27 : vector<32x256xf32>
    %cst_13 = arith.constant 0.000000e+00 : f32
    %29 = vector.broadcast %cst_13 : f32 to vector<32x256xf32>
    %30 = arith.maximumf %28, %29 : vector<32x256xf32>
    %31 = tpu.iota {dimensions = array<i32: 1>} : vector<1x256xi32>
    %c16_i32 = arith.constant 16 : i32
    %c0_i32 = arith.constant 0 : i32
    %32 = arith.cmpi eq, %c16_i32, %c0_i32 : i32
    %c1_i32 = arith.constant 1 : i32
    %33 = arith.select %32, %c1_i32, %c16_i32 : i32
    %34 = vector.broadcast %33 : i32 to vector<1x256xi32>
    %35 = arith.remsi %31, %34 : vector<1x256xi32>
    %c0_i32_14 = arith.constant 0 : i32
    %36 = vector.broadcast %c0_i32_14 : i32 to vector<1x256xi32>
    %37 = arith.cmpi ne, %35, %36 : vector<1x256xi32>
    %c0_i32_15 = arith.constant 0 : i32
    %38 = vector.broadcast %c0_i32_15 : i32 to vector<1x256xi32>
    %39 = arith.cmpi slt, %35, %38 : vector<1x256xi32>
    %c0_i32_16 = arith.constant 0 : i32
    %40 = arith.cmpi slt, %33, %c0_i32_16 : i32
    %41 = vector.broadcast %40 : i1 to vector<1x256xi1>
    %42 = vector.broadcast %41 : vector<1x256xi1> to vector<1x256xi1>
    %43 = arith.xori %39, %42 : vector<1x256xi1>
    %44 = arith.andi %43, %37 : vector<1x256xi1>
    %45 = vector.broadcast %33 : i32 to vector<1x256xi32>
    %46 = arith.addi %35, %45 : vector<1x256xi32>
    %47 = arith.select %44, %46, %35 : vector<1x256xi1>, vector<1x256xi32>
    %c16_i32_17 = arith.constant 16 : i32
    %48 = vector.broadcast %c16_i32_17 : i32 to vector<1x256xi32>
    %49 = arith.cmpi sge, %31, %48 : vector<1x256xi32>
    %c240_i32 = arith.constant 240 : i32
    %50 = vector.broadcast %c240_i32 : i32 to vector<1x256xi32>
    %51 = arith.cmpi slt, %31, %50 : vector<1x256xi32>
    %c1_i32_18 = arith.constant 1 : i32
    %52 = vector.broadcast %c1_i32_18 : i32 to vector<1x256xi32>
    %53 = arith.cmpi sge, %47, %52 : vector<1x256xi32>
    %c14_i32 = arith.constant 14 : i32
    %54 = vector.broadcast %c14_i32 : i32 to vector<1x256xi32>
    %55 = arith.cmpi sle, %47, %54 : vector<1x256xi32>
    %c17_i32 = arith.constant 17 : i32
    %56 = tpu.dynamic_rotate %30 by %c17_i32 dim 1 : vector<32x256xf32>, i32 -> vector<32x256xf32>
    %57 = arith.andi %49, %53 : vector<1x256xi1>
    %cst_19 = arith.constant 0.000000e+00 : f32
    %58 = vector.shape_cast %57 : vector<1x256xi1> to vector<1x256xi1>
    %59 = vector.broadcast %58 : vector<1x256xi1> to vector<32x256xi1>
    %60 = vector.broadcast %cst_19 : f32 to vector<32x256xf32>
    %61 = arith.select %59, %56, %60 : vector<32x256xi1>, vector<32x256xf32>
    %62 = arith.truncf %61 : vector<32x256xf32> to vector<32x256xbf16>
    %c16_i32_20 = arith.constant 16 : i32
    %63 = tpu.dynamic_rotate %30 by %c16_i32_20 dim 1 : vector<32x256xf32>, i32 -> vector<32x256xf32>
    %cst_21 = arith.constant 0.000000e+00 : f32
    %64 = vector.shape_cast %49 : vector<1x256xi1> to vector<1x256xi1>
    %65 = vector.broadcast %64 : vector<1x256xi1> to vector<32x256xi1>
    %66 = vector.broadcast %cst_21 : f32 to vector<32x256xf32>
    %67 = arith.select %65, %63, %66 : vector<32x256xi1>, vector<32x256xf32>
    %68 = arith.truncf %67 : vector<32x256xf32> to vector<32x256xbf16>
    %c15_i32 = arith.constant 15 : i32
    %69 = tpu.dynamic_rotate %30 by %c15_i32 dim 1 : vector<32x256xf32>, i32 -> vector<32x256xf32>
    %70 = arith.andi %49, %55 : vector<1x256xi1>
    %cst_22 = arith.constant 0.000000e+00 : f32
    %71 = vector.shape_cast %70 : vector<1x256xi1> to vector<1x256xi1>
    %72 = vector.broadcast %71 : vector<1x256xi1> to vector<32x256xi1>
    %73 = vector.broadcast %cst_22 : f32 to vector<32x256xf32>
    %74 = arith.select %72, %69, %73 : vector<32x256xi1>, vector<32x256xf32>
    %75 = arith.truncf %74 : vector<32x256xf32> to vector<32x256xbf16>
    %c1_i32_23 = arith.constant 1 : i32
    %76 = tpu.dynamic_rotate %30 by %c1_i32_23 dim 1 : vector<32x256xf32>, i32 -> vector<32x256xf32>
    %cst_24 = arith.constant 0.000000e+00 : f32
    %77 = vector.shape_cast %53 : vector<1x256xi1> to vector<1x256xi1>
    %78 = vector.broadcast %77 : vector<1x256xi1> to vector<32x256xi1>
    %79 = vector.broadcast %cst_24 : f32 to vector<32x256xf32>
    %80 = arith.select %78, %76, %79 : vector<32x256xi1>, vector<32x256xf32>
    %81 = arith.truncf %80 : vector<32x256xf32> to vector<32x256xbf16>
    %82 = arith.truncf %30 : vector<32x256xf32> to vector<32x256xbf16>
    %c255_i32 = arith.constant 255 : i32
    %83 = tpu.dynamic_rotate %30 by %c255_i32 dim 1 : vector<32x256xf32>, i32 -> vector<32x256xf32>
    %cst_25 = arith.constant 0.000000e+00 : f32
    %84 = vector.shape_cast %55 : vector<1x256xi1> to vector<1x256xi1>
    %85 = vector.broadcast %84 : vector<1x256xi1> to vector<32x256xi1>
    %86 = vector.broadcast %cst_25 : f32 to vector<32x256xf32>
    %87 = arith.select %85, %83, %86 : vector<32x256xi1>, vector<32x256xf32>
    %88 = arith.truncf %87 : vector<32x256xf32> to vector<32x256xbf16>
    %c241_i32 = arith.constant 241 : i32
    %89 = tpu.dynamic_rotate %30 by %c241_i32 dim 1 : vector<32x256xf32>, i32 -> vector<32x256xf32>
    %90 = arith.andi %51, %53 : vector<1x256xi1>
    %cst_26 = arith.constant 0.000000e+00 : f32
    %91 = vector.shape_cast %90 : vector<1x256xi1> to vector<1x256xi1>
    %92 = vector.broadcast %91 : vector<1x256xi1> to vector<32x256xi1>
    %93 = vector.broadcast %cst_26 : f32 to vector<32x256xf32>
    %94 = arith.select %92, %89, %93 : vector<32x256xi1>, vector<32x256xf32>
    %95 = arith.truncf %94 : vector<32x256xf32> to vector<32x256xbf16>
    %c240_i32_27 = arith.constant 240 : i32
    %96 = tpu.dynamic_rotate %30 by %c240_i32_27 dim 1 : vector<32x256xf32>, i32 -> vector<32x256xf32>
    %cst_28 = arith.constant 0.000000e+00 : f32
    %97 = vector.shape_cast %51 : vector<1x256xi1> to vector<1x256xi1>
    %98 = vector.broadcast %97 : vector<1x256xi1> to vector<32x256xi1>
    %99 = vector.broadcast %cst_28 : f32 to vector<32x256xf32>
    %100 = arith.select %98, %96, %99 : vector<32x256xi1>, vector<32x256xf32>
    %101 = arith.truncf %100 : vector<32x256xf32> to vector<32x256xbf16>
    %c239_i32 = arith.constant 239 : i32
    %102 = tpu.dynamic_rotate %30 by %c239_i32 dim 1 : vector<32x256xf32>, i32 -> vector<32x256xf32>
    %103 = arith.andi %51, %55 : vector<1x256xi1>
    %cst_29 = arith.constant 0.000000e+00 : f32
    %104 = vector.shape_cast %103 : vector<1x256xi1> to vector<1x256xi1>
    %105 = vector.broadcast %104 : vector<1x256xi1> to vector<32x256xi1>
    %106 = vector.broadcast %cst_29 : f32 to vector<32x256xf32>
    %107 = arith.select %105, %102, %106 : vector<32x256xi1>, vector<32x256xf32>
    %108 = arith.truncf %107 : vector<32x256xf32> to vector<32x256xbf16>
    %109 = tpu.concatenate %62, %68, %75, %81, %82, %88, %95, %101, %108 in 0 : vector<32x256xbf16>, vector<32x256xbf16>, vector<32x256xbf16>, vector<32x256xbf16>, vector<32x256xbf16>, vector<32x256xbf16>, vector<32x256xbf16>, vector<32x256xbf16>, vector<32x256xbf16> -> vector<288x256xbf16>
    %c0_30 = arith.constant 0 : index
    %c0_31 = arith.constant 0 : index
    %110 = vector.load %arg3[%c0_30, %c0_31] : memref<32x288xbf16, #tpu.memory_space<vmem>>, vector<32x288xbf16>
    %cst_32 = arith.constant dense<0.000000e+00> : vector<32x256xf32>
    %111 = tpu.matmul %110, %109, %cst_32 {dimension_numbers = #tpu.dot_dimension_numbers<[1], [0], [0], [1], [0, 0, 1, 1], [], []>} : vector<32x288xbf16>, vector<288x256xbf16>, vector<32x256xf32> -> vector<32x256xf32>
    %c0_33 = arith.constant 0 : index
    %c0_34 = arith.constant 0 : index
    %112 = vector.load %arg7[%c0_33, %c0_34] : memref<32x1xf32, #tpu.memory_space<vmem>>, vector<32x1xf32>
    %c0_35 = arith.constant 0 : index
    %c0_36 = arith.constant 0 : index
    %113 = vector.load %arg8[%c0_35, %c0_36] : memref<32x1xf32, #tpu.memory_space<vmem>>, vector<32x1xf32>
    %cst_37 = arith.constant dense<0.000000e+00> : vector<32xf32>
    %114 = vector.multi_reduction <add>, %111, %cst_37 [1] : vector<32x256xf32> to vector<32xf32>
    %115 = vector.shape_cast %114 : vector<32xf32> to vector<32x1xf32>
    %116 = arith.mulf %111, %111 : vector<32x256xf32>
    %cst_38 = arith.constant dense<0.000000e+00> : vector<32xf32>
    %117 = vector.multi_reduction <add>, %116, %cst_38 [1] : vector<32x256xf32> to vector<32xf32>
    %118 = vector.shape_cast %117 : vector<32xf32> to vector<32x1xf32>
    %cst_39 = arith.constant 2.560000e+02 : f32
    %119 = vector.broadcast %cst_39 : f32 to vector<32x1xf32>
    %120 = arith.divf %115, %119 : vector<32x1xf32>
    %cst_40 = arith.constant 2.560000e+02 : f32
    %121 = vector.broadcast %cst_40 : f32 to vector<32x1xf32>
    %122 = arith.divf %118, %121 : vector<32x1xf32>
    %123 = arith.mulf %120, %120 : vector<32x1xf32>
    %124 = arith.subf %122, %123 : vector<32x1xf32>
    %125 = vector.broadcast %120 : vector<32x1xf32> to vector<32x256xf32>
    %126 = arith.subf %111, %125 : vector<32x256xf32>
    %cst_41 = arith.constant 9.99999974E-6 : f32
    %127 = vector.broadcast %cst_41 : f32 to vector<32x1xf32>
    %128 = arith.addf %124, %127 : vector<32x1xf32>
    %129 = math.rsqrt %128 : vector<32x1xf32>
    %130 = vector.broadcast %129 : vector<32x1xf32> to vector<32x256xf32>
    %131 = arith.mulf %126, %130 : vector<32x256xf32>
    %132 = vector.broadcast %112 : vector<32x1xf32> to vector<32x256xf32>
    %133 = arith.mulf %131, %132 : vector<32x256xf32>
    %134 = vector.broadcast %113 : vector<32x1xf32> to vector<32x256xf32>
    %135 = arith.addf %133, %134 : vector<32x256xf32>
    %cst_42 = arith.constant 0.000000e+00 : f32
    %136 = vector.broadcast %cst_42 : f32 to vector<32x256xf32>
    %137 = arith.maximumf %135, %136 : vector<32x256xf32>
    %c0_43 = arith.constant 0 : index
    %c0_44 = arith.constant 0 : index
    %138 = vector.load %arg4[%c0_43, %c0_44] : memref<128x32xbf16, #tpu.memory_space<vmem>>, vector<128x32xbf16>
    %139 = arith.truncf %137 : vector<32x256xf32> to vector<32x256xbf16>
    %cst_45 = arith.constant dense<0.000000e+00> : vector<128x256xf32>
    %140 = tpu.matmul %138, %139, %cst_45 {dimension_numbers = #tpu.dot_dimension_numbers<[1], [0], [0], [1], [0, 0, 1, 1], [], []>} : vector<128x32xbf16>, vector<32x256xbf16>, vector<128x256xf32> -> vector<128x256xf32>
    %c0_46 = arith.constant 0 : index
    %c0_47 = arith.constant 0 : index
    %141 = vector.load %arg9[%c0_46, %c0_47] : memref<128x1xf32, #tpu.memory_space<vmem>>, vector<128x1xf32>
    %c0_48 = arith.constant 0 : index
    %c0_49 = arith.constant 0 : index
    %142 = vector.load %arg10[%c0_48, %c0_49] : memref<128x1xf32, #tpu.memory_space<vmem>>, vector<128x1xf32>
    %cst_50 = arith.constant dense<0.000000e+00> : vector<128xf32>
    %143 = vector.multi_reduction <add>, %140, %cst_50 [1] : vector<128x256xf32> to vector<128xf32>
    %144 = vector.shape_cast %143 : vector<128xf32> to vector<128x1xf32>
    %145 = arith.mulf %140, %140 : vector<128x256xf32>
    %cst_51 = arith.constant dense<0.000000e+00> : vector<128xf32>
    %146 = vector.multi_reduction <add>, %145, %cst_51 [1] : vector<128x256xf32> to vector<128xf32>
    %147 = vector.shape_cast %146 : vector<128xf32> to vector<128x1xf32>
    %c1_i32_52 = arith.constant 1 : i32
    %148 = tpu.dynamic_rotate %144 by %c1_i32_52 dim 0 : vector<128x1xf32>, i32 -> vector<128x1xf32>
    %149 = arith.addf %144, %148 : vector<128x1xf32>
    %c2_i32 = arith.constant 2 : i32
    %150 = tpu.dynamic_rotate %144 by %c2_i32 dim 0 : vector<128x1xf32>, i32 -> vector<128x1xf32>
    %151 = arith.addf %149, %150 : vector<128x1xf32>
    %c3_i32 = arith.constant 3 : i32
    %152 = tpu.dynamic_rotate %144 by %c3_i32 dim 0 : vector<128x1xf32>, i32 -> vector<128x1xf32>
    %153 = arith.addf %151, %152 : vector<128x1xf32>
    %154 = tpu.iota {dimensions = array<i32: 0>} : vector<128x1xi32>
    %c4_i32 = arith.constant 4 : i32
    %c0_i32_53 = arith.constant 0 : i32
    %155 = arith.cmpi eq, %c4_i32, %c0_i32_53 : i32
    %c1_i32_54 = arith.constant 1 : i32
    %156 = arith.select %155, %c1_i32_54, %c4_i32 : i32
    %157 = vector.broadcast %156 : i32 to vector<128x1xi32>
    %158 = arith.remsi %154, %157 : vector<128x1xi32>
    %c0_i32_55 = arith.constant 0 : i32
    %159 = vector.broadcast %c0_i32_55 : i32 to vector<128x1xi32>
    %160 = arith.cmpi ne, %158, %159 : vector<128x1xi32>
    %c0_i32_56 = arith.constant 0 : i32
    %161 = vector.broadcast %c0_i32_56 : i32 to vector<128x1xi32>
    %162 = arith.cmpi slt, %158, %161 : vector<128x1xi32>
    %c0_i32_57 = arith.constant 0 : i32
    %163 = arith.cmpi slt, %156, %c0_i32_57 : i32
    %164 = vector.broadcast %163 : i1 to vector<128x1xi1>
    %165 = vector.broadcast %164 : vector<128x1xi1> to vector<128x1xi1>
    %166 = arith.xori %162, %165 : vector<128x1xi1>
    %167 = arith.andi %166, %160 : vector<128x1xi1>
    %168 = vector.broadcast %156 : i32 to vector<128x1xi32>
    %169 = arith.addi %158, %168 : vector<128x1xi32>
    %170 = arith.select %167, %169, %158 : vector<128x1xi1>, vector<128x1xi32>
    %c3_i32_58 = arith.constant 3 : i32
    %171 = vector.broadcast %c3_i32_58 : i32 to vector<128x1xi32>
    %172 = arith.cmpi eq, %170, %171 : vector<128x1xi32>
    %cst_59 = arith.constant 0.000000e+00 : f32
    %173 = vector.broadcast %cst_59 : f32 to vector<128x1xf32>
    %174 = arith.select %172, %153, %173 : vector<128x1xi1>, vector<128x1xf32>
    %c127_i32 = arith.constant 127 : i32
    %175 = tpu.dynamic_rotate %174 by %c127_i32 dim 0 : vector<128x1xf32>, i32 -> vector<128x1xf32>
    %176 = arith.addf %174, %175 : vector<128x1xf32>
    %c126_i32 = arith.constant 126 : i32
    %177 = tpu.dynamic_rotate %174 by %c126_i32 dim 0 : vector<128x1xf32>, i32 -> vector<128x1xf32>
    %178 = arith.addf %176, %177 : vector<128x1xf32>
    %c125_i32 = arith.constant 125 : i32
    %179 = tpu.dynamic_rotate %174 by %c125_i32 dim 0 : vector<128x1xf32>, i32 -> vector<128x1xf32>
    %180 = arith.addf %178, %179 : vector<128x1xf32>
    %c1_i32_60 = arith.constant 1 : i32
    %181 = tpu.dynamic_rotate %147 by %c1_i32_60 dim 0 : vector<128x1xf32>, i32 -> vector<128x1xf32>
    %182 = arith.addf %147, %181 : vector<128x1xf32>
    %c2_i32_61 = arith.constant 2 : i32
    %183 = tpu.dynamic_rotate %147 by %c2_i32_61 dim 0 : vector<128x1xf32>, i32 -> vector<128x1xf32>
    %184 = arith.addf %182, %183 : vector<128x1xf32>
    %c3_i32_62 = arith.constant 3 : i32
    %185 = tpu.dynamic_rotate %147 by %c3_i32_62 dim 0 : vector<128x1xf32>, i32 -> vector<128x1xf32>
    %186 = arith.addf %184, %185 : vector<128x1xf32>
    %187 = tpu.iota {dimensions = array<i32: 0>} : vector<128x1xi32>
    %c4_i32_63 = arith.constant 4 : i32
    %c0_i32_64 = arith.constant 0 : i32
    %188 = arith.cmpi eq, %c4_i32_63, %c0_i32_64 : i32
    %c1_i32_65 = arith.constant 1 : i32
    %189 = arith.select %188, %c1_i32_65, %c4_i32_63 : i32
    %190 = vector.broadcast %189 : i32 to vector<128x1xi32>
    %191 = arith.remsi %187, %190 : vector<128x1xi32>
    %c0_i32_66 = arith.constant 0 : i32
    %192 = vector.broadcast %c0_i32_66 : i32 to vector<128x1xi32>
    %193 = arith.cmpi ne, %191, %192 : vector<128x1xi32>
    %c0_i32_67 = arith.constant 0 : i32
    %194 = vector.broadcast %c0_i32_67 : i32 to vector<128x1xi32>
    %195 = arith.cmpi slt, %191, %194 : vector<128x1xi32>
    %c0_i32_68 = arith.constant 0 : i32
    %196 = arith.cmpi slt, %189, %c0_i32_68 : i32
    %197 = vector.broadcast %196 : i1 to vector<128x1xi1>
    %198 = vector.broadcast %197 : vector<128x1xi1> to vector<128x1xi1>
    %199 = arith.xori %195, %198 : vector<128x1xi1>
    %200 = arith.andi %199, %193 : vector<128x1xi1>
    %201 = vector.broadcast %189 : i32 to vector<128x1xi32>
    %202 = arith.addi %191, %201 : vector<128x1xi32>
    %203 = arith.select %200, %202, %191 : vector<128x1xi1>, vector<128x1xi32>
    %c3_i32_69 = arith.constant 3 : i32
    %204 = vector.broadcast %c3_i32_69 : i32 to vector<128x1xi32>
    %205 = arith.cmpi eq, %203, %204 : vector<128x1xi32>
    %cst_70 = arith.constant 0.000000e+00 : f32
    %206 = vector.broadcast %cst_70 : f32 to vector<128x1xf32>
    %207 = arith.select %205, %186, %206 : vector<128x1xi1>, vector<128x1xf32>
    %c127_i32_71 = arith.constant 127 : i32
    %208 = tpu.dynamic_rotate %207 by %c127_i32_71 dim 0 : vector<128x1xf32>, i32 -> vector<128x1xf32>
    %209 = arith.addf %207, %208 : vector<128x1xf32>
    %c126_i32_72 = arith.constant 126 : i32
    %210 = tpu.dynamic_rotate %207 by %c126_i32_72 dim 0 : vector<128x1xf32>, i32 -> vector<128x1xf32>
    %211 = arith.addf %209, %210 : vector<128x1xf32>
    %c125_i32_73 = arith.constant 125 : i32
    %212 = tpu.dynamic_rotate %207 by %c125_i32_73 dim 0 : vector<128x1xf32>, i32 -> vector<128x1xf32>
    %213 = arith.addf %211, %212 : vector<128x1xf32>
    %cst_74 = arith.constant 1.024000e+03 : f32
    %214 = vector.broadcast %cst_74 : f32 to vector<128x1xf32>
    %215 = arith.divf %180, %214 : vector<128x1xf32>
    %cst_75 = arith.constant 1.024000e+03 : f32
    %216 = vector.broadcast %cst_75 : f32 to vector<128x1xf32>
    %217 = arith.divf %213, %216 : vector<128x1xf32>
    %218 = arith.mulf %215, %215 : vector<128x1xf32>
    %219 = arith.subf %217, %218 : vector<128x1xf32>
    %220 = vector.broadcast %215 : vector<128x1xf32> to vector<128x256xf32>
    %221 = arith.subf %140, %220 : vector<128x256xf32>
    %cst_76 = arith.constant 9.99999974E-6 : f32
    %222 = vector.broadcast %cst_76 : f32 to vector<128x1xf32>
    %223 = arith.addf %219, %222 : vector<128x1xf32>
    %224 = math.rsqrt %223 : vector<128x1xf32>
    %225 = vector.broadcast %224 : vector<128x1xf32> to vector<128x256xf32>
    %226 = arith.mulf %221, %225 : vector<128x256xf32>
    %227 = vector.broadcast %141 : vector<128x1xf32> to vector<128x256xf32>
    %228 = arith.mulf %226, %227 : vector<128x256xf32>
    %229 = vector.broadcast %142 : vector<128x1xf32> to vector<128x256xf32>
    %230 = arith.addf %228, %229 : vector<128x256xf32>
    %231 = arith.addf %230, %1 : vector<128x256xf32>
    %cst_77 = arith.constant 0.000000e+00 : f32
    %232 = vector.broadcast %cst_77 : f32 to vector<128x256xf32>
    %233 = arith.maximumf %231, %232 : vector<128x256xf32>
    %c0_78 = arith.constant 0 : index
    %c0_79 = arith.constant 0 : index
    %c0_80 = arith.constant 0 : index
    %234 = vector.load %arg11[%c0_78, %c0_79, %c0_80] : memref<1x128x256xf32, #tpu.memory_space<vmem>>, vector<1x128x256xf32>
    %235 = vector.shape_cast %234 : vector<1x128x256xf32> to vector<128x256xf32>
    %236 = vector.shape_cast %233 : vector<128x256xf32> to vector<1x128x256xf32>
    tpu.vector_store %arg11[%c0_78, %c0_79, %c0_80], %236 {strides = array<i32>} : memref<1x128x256xf32, #tpu.memory_space<vmem>>, vector<1x128x256xf32>,
    return
  }
  func.func @transform_0(%arg0: i32) -> (i32, i32, i32) {
    %c0_i32 = arith.constant 0 : i32
    %c0_i32_0 = arith.constant 0 : i32
    %c0_i32_1 = arith.constant 0 : i32
    return %arg0, %c0_i32, %c0_i32_0 : i32, i32, i32
  }
  func.func @transform_1(%arg0: i32) -> (i32, i32) {
    %c0_i32 = arith.constant 0 : i32
    %c0_i32_0 = arith.constant 0 : i32
    %c0_i32_1 = arith.constant 0 : i32
    return %c0_i32, %c0_i32_0 : i32, i32
  }
  func.func @transform_2(%arg0: i32) -> (i32, i32) {
    %c0_i32 = arith.constant 0 : i32
    %c0_i32_0 = arith.constant 0 : i32
    %c0_i32_1 = arith.constant 0 : i32
    return %c0_i32, %c0_i32_0 : i32, i32
  }
  func.func @transform_3(%arg0: i32) -> (i32, i32) {
    %c0_i32 = arith.constant 0 : i32
    %c0_i32_0 = arith.constant 0 : i32
    %c0_i32_1 = arith.constant 0 : i32
    return %c0_i32, %c0_i32_0 : i32, i32
  }
  func.func @transform_4(%arg0: i32) -> (i32, i32) {
    %c0_i32 = arith.constant 0 : i32
    %c0_i32_0 = arith.constant 0 : i32
    %c0_i32_1 = arith.constant 0 : i32
    return %c0_i32, %c0_i32_0 : i32, i32
  }
  func.func @transform_5(%arg0: i32) -> (i32, i32) {
    %c0_i32 = arith.constant 0 : i32
    %c0_i32_0 = arith.constant 0 : i32
    %c0_i32_1 = arith.constant 0 : i32
    return %c0_i32, %c0_i32_0 : i32, i32
  }
  func.func @transform_6(%arg0: i32) -> (i32, i32) {
    %c0_i32 = arith.constant 0 : i32
    %c0_i32_0 = arith.constant 0 : i32
    %c0_i32_1 = arith.constant 0 : i32
    return %c0_i32, %c0_i32_0 : i32, i32
  }
  func.func @transform_7(%arg0: i32) -> (i32, i32) {
    %c0_i32 = arith.constant 0 : i32
    %c0_i32_0 = arith.constant 0 : i32
    %c0_i32_1 = arith.constant 0 : i32
    return %c0_i32, %c0_i32_0 : i32, i32
  }
  func.func @transform_8(%arg0: i32) -> (i32, i32) {
    %c0_i32 = arith.constant 0 : i32
    %c0_i32_0 = arith.constant 0 : i32
    %c0_i32_1 = arith.constant 0 : i32
    return %c0_i32, %c0_i32_0 : i32, i32
  }
  func.func @transform_9(%arg0: i32) -> (i32, i32) {
    %c0_i32 = arith.constant 0 : i32
    %c0_i32_0 = arith.constant 0 : i32
    %c0_i32_1 = arith.constant 0 : i32
    return %c0_i32, %c0_i32_0 : i32, i32
  }
  func.func @transform_10(%arg0: i32) -> (i32, i32, i32) {
    %c0_i32 = arith.constant 0 : i32
    %c0_i32_0 = arith.constant 0 : i32
    %c0_i32_1 = arith.constant 0 : i32
    return %arg0, %c0_i32, %c0_i32_0 : i32, i32, i32
  }
}

</mosaic_0001>

<bundles_post_ra>
// kernel: bottleneck_forward.1
= control target key start
LH: loop header
LB: loop body
LE: loop exit
PB: predicated region body
PF: predicated region fallthrough
CT: control target
= control target key end

     0   :  { %s4028_s13 = smov 0   ;;  %s7302_s0 = inlined_call_operand.vmem [shape: f32[2,128,256], index: 0, kind: input, shape index: {}]   ;;  %s7303_s1 = inlined_call_operand.vmem [shape: bf16[32,128], index: 1, kind: input, shape index: {}]   ;;  %s7304_s2 = inlined_call_operand.vmem [shape: bf16[32,288], index: 2, kind: input, shape index: {}]   ;;  %s7305_s3 = inlined_call_operand.vmem [shape: bf16[128,32], index: 3, kind: input, shape index: {}]   ;;  %s7306_s4 = inlined_call_operand.vmem [shape: f32[32,1], index: 4, kind: input, shape index: {}]   ;;  %s7307_s5 = inlined_call_operand.vmem [shape: f32[32,1], index: 5, kind: input, shape index: {}]   ;;  %s7308_s6 = inlined_call_operand.vmem [shape: f32[32,1], index: 6, kind: input, shape index: {}]   ;;  %s7309_s7 = inlined_call_operand.vmem [shape: f32[32,1], index: 7, kind: input, shape index: {}]   ;;  %s7310_s8 = inlined_call_operand.vmem [shape: f32[128,1], index: 8, kind: input, shape index: {}]   ;;  %s7311_s9 = inlined_call_operand.vmem [shape: f32[128,1], index: 9, kind: input, shape index: {}]   ;;  %s7312_s10 = inlined_call_operand.vmem [shape: f32[2,128,256], index: 10, kind: output, shape index: {}]  }
   0x1 LB: > { %s3571_s14 = sadd.s32 4294967295, %s3960_s13   ;;  %p3575_p0 = scmp.ge.s32.totalorder %s3960_s13, 1  ;;  %s3960_s13 = sphi %s4028_s13, %s20_s13  }
   0x2   : > { %p312_p1 = scmp.lt.s32.totalorder %s3960_s13, 3 }
   0x4   : > { %p313_p2 = pnand %p3575_p0, %p312_p1 }
   0x6   : > { %316 = sbr.rel (%p313_p2) target bundleno = 1562 (0x61a), region = 60 }
   0xb   : > { %p350_p3 = scmp.lt.s32.totalorder %s3571_s14, 1  ;;  %v463_v35 = vld [vmem:[%s7306_s4] sm:$0xff]  ;;  %v3962_v39 = vmov 0   ;;  %v465_v40 = vld [vmem:[%s7306_s4 + $0x10] sm:$0xff]  ;;  %v464_v43 = vld [vmem:[%s7306_s4 + $0x8] sm:$0xff]  ;;  %s3964_s23 = smov 16  }
   0xc   : > { %3707 = vset.pattern.permute.xlu2 %v3962_v39  ;;  %3709 = vset.pattern.permute.xlu1 %v3962_v39  ;;  %v466_v50 = vld [vmem:[%s7306_s4 + $0x18] sm:$0xff]  ;;  %v468_v52 = vld [vmem:[%s7307_s5 + $0x8] sm:$0xff]  ;;  %v3668_v54 = vld [vmem:[%s7303_s1] sm:$0xff]  ;;  %s3965_s24 = smov 17   ;;  %s3966_s25 = smov 15  }
   0xd   : > { %s7837_s14 = smov (!%p350_p3, %s3571_s14), 1  ;;  %588 = vperm.xlu2 %3707, %v463_v35   ;;  %598 = vperm.xlu1 %3709, %v465_v40   ;;  %v467_v55 = vld [vmem:[%s7307_s5] sm:$0xff]  ;;  %v470_v56 = vld [vmem:[%s7307_s5 + $0x18] sm:$0xff]  ;;  %v469_v57 = vld [vmem:[%s7307_s5 + $0x10] sm:$0xff]  ;;  %s3967_s26 = smov 127  }
   0xe   : > { %s3666_s15 = sshll.u32 %s7837_s14, 8  ;;  %3708 = vset.pattern.permute.xlu0 %v3962_v39  ;;  %v3669_v58 = vld [vmem:[%s7303_s1 + $0x8] sm:$0xff]  ;;  %s3968_s27 = smov 1  }
   0xf   : > { %s4044_s18 = scalar_lea.vmem %s7302_s0, %s3666_s15  ;;  %593 = vperm.xlu0 %3708, %v464_v43   ;;  %s3969_s28 = smov 112  }
  0x10   : > { %v389_v0 = vld [vmem:[%s4044_s18 + $0xe0] sm:$0xff]  ;;  %v391_v1 = vld [vmem:[%s4044_s18 + $0xf0] sm:$0xff]  ;;  %v390_v2 = vld [vmem:[%s4044_s18 + $0xe8] sm:$0xff]  ;;  %s3970_s29 = smov 113   ;;  %s3971_s30 = smov 111  }
  0x11   : > { %v411_v3 = vpack.c.bf16 %v391_v1, %v389_v0  ;;  %v392_v4 = vld [vmem:[%s4044_s18 + $0xf8] sm:$0xff]  ;;  %v385_v5 = vld [vmem:[%s4044_s18 + $0xc0] sm:$0xff]  ;;  %v387_v6 = vld [vmem:[%s4044_s18 + $0xd0] sm:$0xff]  ;;  %s7095_s21 = scalar_lea.vmem %s7312_s10, %s3666_s15 }
  0x12   : > { %v412_v7 = vpack.c.bf16 %v392_v4, %v390_v2  ;;  %v386_v8 = vld [vmem:[%s4044_s18 + $0xc8] sm:$0xff]  ;;  %v388_v9 = vld [vmem:[%s4044_s18 + $0xd8] sm:$0xff]  ;;  %v409_v10 = vpack.c.bf16 %v387_v6, %v385_v5  ;;  %v381_v12 = vld [vmem:[%s4044_s18 + $0xa0] sm:$0xff] }
  0x13   : > { %425 = vmatpush.bf16.msra.mxu0 %v411_v3  ;;  %v410_v11 = vpack.c.bf16 %v388_v9, %v386_v8  ;;  %v383_v13 = vld [vmem:[%s4044_s18 + $0xb0] sm:$0xff]  ;;  %v382_v14 = vld [vmem:[%s4044_s18 + $0xa8] sm:$0xff]  ;;  %v384_v15 = vld [vmem:[%s4044_s18 + $0xb8] sm:$0xff] }
  0x14   : > { %444 = vmatpush.bf16.msra.mxu1 %v412_v7  ;;  %v407_v16 = vpack.c.bf16 %v383_v13, %v381_v12  ;;  %v408_v17 = vpack.c.bf16 %v384_v15, %v382_v14  ;;  %v377_v18 = vld [vmem:[%s4044_s18 + $0x80] sm:$0xff]  ;;  %v379_v19 = vld [vmem:[%s4044_s18 + $0x90] sm:$0xff]  ;;  %v378_v20 = vld [vmem:[%s4044_s18 + $0x88] sm:$0xff] }
  0x15   : > { %v380_v21 = vld [vmem:[%s4044_s18 + $0x98] sm:$0xff]  ;;  %v405_v22 = vpack.c.bf16 %v379_v19, %v377_v18  ;;  %v373_v24 = vld [vmem:[%s4044_s18 + $0x60] sm:$0xff]  ;;  %v375_v25 = vld [vmem:[%s4044_s18 + $0x70] sm:$0xff]  ;;  %603 = vperm.xlu2 %3707, %v466_v50   ;;  %621 = vperm.xlu1 %3709, %v468_v52  }
  0x16   : > { %v406_v23 = vpack.c.bf16 %v380_v21, %v378_v20  ;;  %v374_v26 = vld [vmem:[%s4044_s18 + $0x68] sm:$0xff]  ;;  %v376_v27 = vld [vmem:[%s4044_s18 + $0x78] sm:$0xff]  ;;  %v403_v28 = vpack.c.bf16 %v375_v25, %v373_v24  ;;  %v369_v30 = vld [vmem:[%s4044_s18 + $0x40] sm:$0xff]  ;;  %v3963_v20 = vmov 256.0  }
  0x17   : > { %426 = vmatpush.bf16.msra.mxu0 %v409_v10  ;;  %v404_v29 = vpack.c.bf16 %v376_v27, %v374_v26  ;;  %v371_v31 = vld [vmem:[%s4044_s18 + $0x50] sm:$0xff]  ;;  %v370_v32 = vld [vmem:[%s4044_s18 + $0x48] sm:$0xff]  ;;  %v372_v33 = vld [vmem:[%s4044_s18 + $0x58] sm:$0xff]  ;;  %3870 = vrcp.f32 %v3963_v20 }
  0x18   : > { %445 = vmatpush.bf16.msra.mxu1 %v410_v11  ;;  %v401_v34 = vpack.c.bf16 %v371_v31, %v369_v30  ;;  %v402_v36 = vpack.c.bf16 %v372_v33, %v370_v32  ;;  %v365_v37 = vld [vmem:[%s4044_s18 + $0x20] sm:$0xff]  ;;  %v367_v38 = vld [vmem:[%s4044_s18 + $0x30] sm:$0xff]  ;;  %v366_v41 = vld [vmem:[%s4044_s18 + $0x28] sm:$0xff] }
  0x19   : > { %v368_v42 = vld [vmem:[%s4044_s18 + $0x38] sm:$0xff]  ;;  %v399_v44 = vpack.c.bf16 %v367_v38, %v365_v37  ;;  %v361_v46 = vld [vmem:[%s4044_s18] sm:$0xff]  ;;  %v363_v47 = vld [vmem:[%s4044_s18 + $0x10] sm:$0xff] }
  0x1a   : > { %v400_v45 = vpack.c.bf16 %v368_v42, %v366_v41  ;;  %v362_v48 = vld [vmem:[%s4044_s18 + $0x8] sm:$0xff]  ;;  %v364_v49 = vld [vmem:[%s4044_s18 + $0x18] sm:$0xff]  ;;  %v397_v51 = vpack.c.bf16 %v363_v47, %v361_v46 }
  0x1b   : > { %427 = vmatpush.bf16.msra.mxu0 %v407_v16  ;;  %v398_v53 = vpack.c.bf16 %v364_v49, %v362_v48 }
  0x1c   : > { %446 = vmatpush.bf16.msra.mxu1 %v408_v17 }
  0x1d   : > { %616 = vperm.xlu2 %3707, %v467_v55   ;;  %631 = vperm.xlu1 %3709, %v470_v56  }
  0x1f   : > { %428 = vmatpush.bf16.msra.mxu0 %v405_v22  ;;  %v3871_v22 = vpop.eup %3870 }
  0x20   : > { %447 = vmatpush.bf16.msra.mxu1 %v406_v23  ;;  %v504_v23 = vmul.f32 256.0, %v3871_v22  ;;  %vm508_vm0 = vweird.f32 %v3871_v22 }
  0x22   : > { %v505_v25 = vsub.f32 1.0, %v504_v23 }
  0x23   : > { %429 = vmatpush.bf16.msra.mxu0 %v403_v28 }
  0x24   : > { %448 = vmatpush.bf16.msra.mxu1 %v404_v29  ;;  %v506_v27 = vmul.f32 %v3871_v22, %v505_v25 }
  0x25   : > { %626 = vperm.xlu2 %3707, %v469_v57  }
  0x26   : > { %v507_v30 = vadd.f32 %v3871_v22, %v506_v27 }
  0x27   : > { %430 = vmatpush.bf16.msra.mxu0 %v401_v34 }
  0x28   : > { %449 = vmatpush.bf16.msra.mxu1 %v402_v36  ;;  %v4158_v32 = vsel %vm508_vm0, %v3871_v22, %v507_v30 }
  0x2b   : > { %431 = vmatpush.bf16.msra.mxu0 %v399_v44 }
  0x2c   : > { %450 = vmatpush.bf16.msra.mxu1 %v400_v45 }
  0x2f   : > { %432 = vmatpush.bf16.msra.mxu0 %v397_v51 }
  0x30   : > { %451 = vmatpush.bf16.msra.mxu1 %v398_v53 }
  0x32   : > { %433 = vmatmul.bf16.vlgmr.msra.gmra.mxu0 %v3668_v54 }
  0x33   : > { %452 = vmatmul.bf16.vlgmr.msra.gmra.mxu1 %v3668_v54 }
  0x42   : > { %438 = vmatmul.bf16.gmra.mxu0 %v3669_v58 }
  0x43   : > { %457 = vmatmul.bf16.gmra.mxu1 %v3669_v58 }
  0x67   : > { %v589_v19 = vpop.permute.xlu2 %588 }
  0x6f   : > { %v4148_v21 = vpop.permute.xlu2 %603 }
  0x77   : > { %v617_v24 = vpop.permute.xlu2 %616 }
  0x7f   : > { %v4150_v26 = vpop.permute.xlu1 %598  ;;  %v4154_v29 = vpop.permute.xlu2 %626 }
  0x81   : > { %v4152_v28 = vpop.permute.xlu0 %593 }
  0x87   : > { %v4156_v31 = vpop.permute.xlu1 %621 }
  0x8f   : > { %v4162_v40 = vpop.permute.xlu1 %631 }
  0xaf   : > { %v4108_v59 = vpop.f32.mrf.mxu0 }
  0xb0   : > { %v4110_v60 = vpop.f32.mrf.mxu1  ;;  %v483_v61 = vmul.f32 %v4108_v59, %v4108_v59 }
  0xb1   : > { %v471_v62 = vadd.f32 %v4110_v60, %v4108_v59  ;;  %v484_v63 = vmul.f32 %v4110_v60, %v4110_v60 }
  0xb3   : > { %472 = vadd.xlane.f32.xlu0 %v471_v62  ;;  %v491_v0 = vadd.f32 %v484_v63, %v483_v61 }
  0xb5   : > { %492 = vadd.xlane.f32.xlu2 %v491_v0 }
  0xb7   : > { %v4118_v1 = vpop.f32.mrf.mxu0 }
  0xb8   : > { %v4120_v2 = vpop.f32.mrf.mxu1  ;;  %v485_v3 = vmul.f32 %v4118_v1, %v4118_v1 }
  0xb9   : > { %v474_v4 = vadd.f32 %v4120_v2, %v4118_v1  ;;  %v486_v5 = vmul.f32 %v4120_v2, %v4120_v2 }
  0xbb   : > { %475 = vadd.xlane.f32.xlu0 %v474_v4  ;;  %v494_v6 = vadd.f32 %v486_v5, %v485_v3 }
  0xbd   : > { %495 = vadd.xlane.f32.xlu2 %v494_v6 }
  0xbf   : > { %v4128_v7 = vpop.f32.mrf.mxu0 }
  0xc0   : > { %v4130_v8 = vpop.f32.mrf.mxu1  ;;  %v487_v9 = vmul.f32 %v4128_v7, %v4128_v7 }
  0xc1   : > { %v477_v10 = vadd.f32 %v4130_v8, %v4128_v7  ;;  %v488_v11 = vmul.f32 %v4130_v8, %v4130_v8 }
  0xc3   : > { %478 = vadd.xlane.f32.xlu1 %v477_v10  ;;  %v497_v12 = vadd.f32 %v488_v11, %v487_v9 }
  0xc5   : > { %498 = vadd.xlane.f32.xlu0 %v497_v12 }
  0xc7   : > { %v4138_v13 = vpop.f32.mrf.mxu0 }
  0xc8   : > { %v4140_v14 = vpop.f32.mrf.mxu1  ;;  %v489_v16 = vmul.f32 %v4138_v13, %v4138_v13 }
  0xc9   : > { %v480_v15 = vadd.f32 %v4140_v14, %v4138_v13  ;;  %v490_v17 = vmul.f32 %v4140_v14, %v4140_v14 }
  0xcb   : > { %481 = vadd.xlane.f32.xlu1 %v480_v15  ;;  %v500_v18 = vadd.f32 %v490_v17, %v489_v16 }
  0xd3   : > { %501 = vadd.xlane.f32.xlu1 %v500_v18 }
 0x126   : > { %v473_v33 = vpop.xlane.xlu0 %472 }
 0x127   : > { %v510_v34 = vmul.f32 %v4158_v32, %v473_v33 }
 0x128   : > { %v493_v35 = vpop.xlane.xlu2 %492 }
 0x129   : > { %v514_v36 = vmul.f32 %v4158_v32, %v493_v35  ;;  %v518_v37 = vmul.f32 %v510_v34, %v510_v34  ;;  %v526_v4 = vsub.f32 %v4108_v59, %v510_v34  ;;  %v527_v5 = vsub.f32 %v4110_v60, %v510_v34 }
 0x12b   : > { %v522_v38 = vsub.f32 %v514_v36, %v518_v37 }
 0x12d   : > { %v534_v39 = vadd.f32 1e-05, %v522_v38 }
 0x12e   : > { %v476_v41 = vpop.xlane.xlu0 %475 }
 0x12f   : > { %3872 = vrsqrt.f32 %v534_v39  ;;  %v511_v42 = vmul.f32 %v4158_v32, %v476_v41  ;;  %vm544_vm2 = vweird.f32 %v534_v39 }
 0x130   : > { %v496_v43 = vpop.xlane.xlu2 %495 }
 0x131   : > { %v515_v44 = vmul.f32 %v4158_v32, %v496_v43  ;;  %v519_v45 = vmul.f32 %v511_v42, %v511_v42  ;;  %v528_v59 = vsub.f32 %v4118_v1, %v511_v42  ;;  %v529_v60 = vsub.f32 %v4120_v2, %v511_v42 }
 0x133   : > { %v523_v46 = vsub.f32 %v515_v44, %v519_v45 }
 0x135   : > { %v3873_v47 = vpop.eup %3872  ;;  %v535_v48 = vadd.f32 1e-05, %v523_v46 }
 0x136   : > { %v539_v49 = vmul.f32 %v3873_v47, %v534_v39  ;;  %v479_v50 = vpop.xlane.xlu1 %478  ;;  %vm545_vm1 = vweird.f32 %v3873_v47 }
 0x137   : > { %3874 = vrsqrt.f32 %v535_v48  ;;  %v4167_v51 = vmul.f32 %v4158_v32, %v479_v50  ;;  %vm546_vm3 = vmor %vm544_vm2, %vm545_vm1  ;;  %vm554_vm5 = vweird.f32 %v535_v48 }
 0x138   : > { %v540_v52 = vmul.f32 %v3873_v47, %v539_v49  ;;  %v499_v53 = vpop.xlane.xlu0 %498 }
 0x139   : > { %v516_v54 = vmul.f32 %v4158_v32, %v499_v53  ;;  %v520_v55 = vmul.f32 %v4167_v51, %v4167_v51  ;;  %v530_v50 = vsub.f32 %v4128_v7, %v4167_v51 }
 0x13a   : > { %v541_v56 = vmul.f32 0.5, %v540_v52  ;;  %v531_v52 = vsub.f32 %v4130_v8, %v4167_v51 }
 0x13b   : > { %v524_v57 = vsub.f32 %v516_v54, %v520_v55 }
 0x13c   : > { %v542_v58 = vsub.f32 1.5, %v541_v56 }
 0x13d   : > { %v3875_v61 = vpop.eup %3874  ;;  %v536_v62 = vadd.f32 1e-05, %v524_v57 }
 0x13e   : > { %v543_v63 = vmul.f32 %v3873_v47, %v542_v58  ;;  %v549_v0 = vmul.f32 %v3875_v61, %v535_v48  ;;  %v482_v3 = vpop.xlane.xlu1 %481  ;;  %vm555_vm4 = vweird.f32 %v3875_v61 }
 0x13f   : > { %3876 = vrsqrt.f32 %v536_v62  ;;  %v4175_v17 = vmul.f32 %v4158_v32, %v482_v3  ;;  %vm556_vm6 = vmor %vm554_vm5, %vm555_vm4  ;;  %vm564_vm8 = vweird.f32 %v536_v62 }
 0x140   : > { %v547_v6 = vsel %vm546_vm3, %v3873_v47, %v543_v63  ;;  %v550_v9 = vmul.f32 %v3875_v61, %v549_v0 }
 0x141   : > { %v578_v10 = vmul.f32 %v547_v6, %v526_v4  ;;  %v579_v11 = vmul.f32 %v547_v6, %v527_v5 }
 0x142   : > { %v551_v12 = vmul.f32 0.5, %v550_v9 }
 0x143   : > { %v606_v15 = vmul.f32 %v589_v19, %v578_v10  ;;  %v607_v16 = vmul.f32 %v589_v19, %v579_v11  ;;  %v521_v19 = vmul.f32 %v4175_v17, %v4175_v17 }
 0x144   : > { %v552_v18 = vsub.f32 1.5, %v551_v12 }
 0x145   : > { %v3877_v20 = vpop.eup %3876  ;;  %v634_v22 = vadd.f32 %v617_v24, %v606_v15  ;;  %v635_v23 = vadd.f32 %v617_v24, %v607_v16  ;;  %v532_v15 = vsub.f32 %v4138_v13, %v4175_v17  ;;  %v533_v16 = vsub.f32 %v4140_v14, %v4175_v17 }
 0x146   : > { %v553_v25 = vmul.f32 %v3875_v61, %v552_v18  ;;  %v559_v27 = vmul.f32 %v3877_v20, %v536_v62  ;;  %v502_v30 = vpop.xlane.xlu1 %501  ;;  %vm565_vm7 = vweird.f32 %v3877_v20 }
 0x147   : > { %v642_v33 = vmax.f32 %v634_v22, 0.0  ;;  %v643_v34 = vmax.f32 %v635_v23, 0.0  ;;  %v517_v35 = vmul.f32 %v4158_v32, %v502_v30  ;;  %vm566_vm9 = vmor %vm564_vm8, %vm565_vm7 }
 0x148   : > { %v557_v36 = vsel %vm556_vm6, %v3875_v61, %v553_v25  ;;  %v560_v37 = vmul.f32 %v3877_v20, %v559_v27 }
 0x149   : > { %v580_v38 = vmul.f32 %v557_v36, %v528_v59  ;;  %v581_v24 = vmul.f32 %v557_v36, %v529_v60  ;;  %v525_v39 = vsub.f32 %v517_v35, %v521_v19  ;;  %v853_v1 = vpack.c.bf16 %v643_v34, %v642_v33  ;;  %v1365_v36 = vld [vmem:[%s7308_s6 + $0x8] sm:$0xff] }
 0x14a   : > { %v561_v41 = vmul.f32 0.5, %v560_v37  ;;  %v1364_v37 = vld [vmem:[%s7308_s6] sm:$0xff] }
 0x14b   : > { %v608_v2 = vmul.f32 %v4152_v28, %v580_v38  ;;  %v609_v42 = vmul.f32 %v4152_v28, %v581_v24  ;;  %v537_v43 = vadd.f32 1e-05, %v525_v39  ;;  %v1109_v3 = vunpack.c.l.b16 %v853_v1  ;;  %v1366_v38 = vld [vmem:[%s7308_s6 + $0x10] sm:$0xff]  ;;  %v1368_v24 = vld [vmem:[%s7309_s7] sm:$0xff] }
 0x14c   : > { %v562_v44 = vsub.f32 1.5, %v561_v41  ;;  %v1110_v4 = vunpack.c.h.b16 %v853_v1  ;;  %v1367_v1 = vld [vmem:[%s7308_s6 + $0x18] sm:$0xff] }
 0x14d   : > { %v636_v45 = vadd.f32 %v4156_v31, %v608_v2  ;;  %v637_v46 = vadd.f32 %v4156_v31, %v609_v42  ;;  %3878 = vrsqrt.f32 %v537_v43  ;;  %vm574_vm11 = vweird.f32 %v537_v43 }
 0x14e   : > { %v563_v47 = vmul.f32 %v3877_v20, %v562_v44  ;;  %v7313_v2 = vlaneseq }
 0x14f   : > { %v644_v48 = vmax.f32 %v636_v45, 0.0  ;;  %v645_v49 = vmax.f32 %v637_v46, 0.0 }
 0x150   : > { %v567_v28 = vsel %vm566_vm9, %v3877_v20, %v563_v47  ;;  %v4264_v42 = vand.u32 127, %v7313_v2 }
 0x151   : > { %v582_v53 = vmul.f32 %v567_v28, %v530_v50  ;;  %v583_v54 = vmul.f32 %v567_v28, %v531_v52  ;;  %v4190_v55 = vpack.i.bf16 %v644_v48, %v642_v33  ;;  %v4192_v56 = vpack.i.bf16 %v645_v49, %v643_v34 }
 0x152   : > { %v854_v0 = vpack.c.bf16 %v645_v49, %v644_v48  ;;  %v4269_v44 = vadd.s32 128, %v4264_v42  ;;  %v657_v45 = vand.u32 15, %v4264_v42  ;;  %vm677_vm14 = vcmp.ge.s32.totalorder %v4264_v42, 16 }
 0x153   : > { %v3879_v31 = vpop.eup %3878  ;;  %v610_v57 = vmul.f32 %v4150_v26, %v582_v53  ;;  %v611_v58 = vmul.f32 %v4150_v26, %v583_v54  ;;  %3721 = vrot.lane.b32.xlu2 %v4190_v55, %s3964_s23  ;;  %3711 = vrot.lane.b32.xlu0 %v4190_v55, %s3965_s24  ;;  %vm701_vm15 = vcmp.lt.s32.totalorder %v4264_v42, 17  ;;  %vm744_vm2 = vcmp.lt.s32.totalorder %v4264_v42, 16 }
 0x154   : > { %v569_v7 = vmul.f32 %v3879_v31, %v537_v43  ;;  %3716 = vrot.lane.b32.xlu1 %v4192_v56, %s3965_s24  ;;  %vm575_vm10 = vweird.f32 %v3879_v31  ;;  %v1111_v9 = vunpack.c.l.b16 %v854_v0  ;;  %v1112_v10 = vunpack.c.h.b16 %v854_v0 }
 0x155   : > { %v638_v8 = vadd.f32 %v4154_v29, %v610_v57  ;;  %v639_v51 = vadd.f32 %v4154_v29, %v611_v58  ;;  %vm576_vm12 = vmor %vm574_vm11, %vm575_vm10  ;;  %v664_v46 = vand.u32 15, %v4269_v44  ;;  %vm4273_vm13 = vcmp.ge.s32.totalorder %v657_v45, 1 }
 0x156   : > { %v570_v61 = vmul.f32 %v3879_v31, %v569_v7  ;;  %v4210_v11 = vpack.c.b16 %v1111_v9, %v1109_v3  ;;  %v4212_v12 = vpack.c.b16 %v1112_v10, %v1110_v4  ;;  %vm4289_vm1 = vmand %vm677_vm14, %vm4273_vm13  ;;  %vm785_vm3 = vcmp.lt.s32.totalorder %v4264_v42, 15 }
 0x157   : > { %v646_v62 = vmax.f32 %v638_v8, 0.0  ;;  %v647_v63 = vmax.f32 %v639_v51, 0.0  ;;  %vm4281_vm0 = vcmp.ge.s32.totalorder %v664_v46, 1  ;;  %vm4318_vm4 = vcmp.le.s32.totalorder %v657_v45, 14 }
 0x158   : > { %v571_v26 = vmul.f32 0.5, %v570_v61  ;;  %vm4325_vm5 = vcmp.le.s32.totalorder %v664_v46, 14  ;;  %vm4341_vm6 = vmand %vm677_vm14, %vm4318_vm4  ;;  %vm828_vm7 = vcmp.lt.s32.totalorder %v4264_v42, 1  ;;  %vm957_vm8 = vcmp.lt.s32.totalorder %v4264_v42, 112 }
 0x159   : > { %v855_v5 = vpack.c.bf16 %v647_v63, %v646_v62  ;;  %vm680_vm9 = vcmp.lt.s32.totalorder %v4269_v44, 240  ;;  %vm914_vm10 = vcmp.lt.s32.totalorder %v4264_v42, 113  ;;  %vm873_vm11 = vcmp.lt.s32.totalorder %v4264_v42, 127 }
 0x15a   : > { %v572_v6 = vsub.f32 1.5, %v571_v26 }
 0x15b   : > { %3736 = vrot.lane.b32.xlu2 %v4192_v56, %s3966_s25  ;;  %3726 = vrot.lane.b32.xlu0 %v4192_v56, %s3964_s23  ;;  %v1114_v33 = vunpack.c.h.b16 %v855_v5 }
 0x15c   : > { %v573_v29 = vmul.f32 %v3879_v31, %v572_v6  ;;  %3731 = vrot.lane.b32.xlu1 %v4190_v55, %s3966_s25 }
 0x15e   : > { %v577_v18 = vsel %vm576_vm12, %v3879_v31, %v573_v29  ;;  %vm4537_vm12 = vmand %vm680_vm9, %vm4281_vm0 }
 0x15f   : > { %v584_v20 = vmul.f32 %v577_v18, %v532_v15  ;;  %v585_v22 = vmul.f32 %v577_v18, %v533_v16 }
 0x161   : > { %v612_v23 = vmul.f32 %v4148_v21, %v584_v20  ;;  %v613_v59 = vmul.f32 %v4148_v21, %v585_v22 }
 0x163   : > { %v640_v60 = vadd.f32 %v4162_v40, %v612_v23  ;;  %v641_v25 = vadd.f32 %v4162_v40, %v613_v59  ;;  %3751 = vrot.lane.b32.xlu2 %v4190_v55, %s3967_s26  ;;  %3741 = vrot.lane.b32.xlu0 %v4190_v55, %s3968_s27  ;;  %v1113_v40 = vunpack.c.l.b16 %v855_v5  ;;  %v3672_v59 = vld [vmem:[%s7304_s2 + $0x10] sm:$0xf0] }
 0x164   : > { %3746 = vrot.lane.b32.xlu1 %v4192_v56, %s3968_s27 }
 0x165   : > { %v648_v13 = vmax.f32 %v640_v60, 0.0  ;;  %v649_v14 = vmax.f32 %v641_v25, 0.0 }
 0x167   : > { %v3765_v17 = vpack.i.bf16 %v649_v14, %v647_v63  ;;  %v3760_v27 = vpack.i.bf16 %v648_v13, %v646_v62  ;;  %v856_v21 = vpack.c.bf16 %v649_v14, %v648_v13 }
 0x169   : > { %v1115_v30 = vunpack.c.l.b16 %v856_v21  ;;  %v1116_v34 = vunpack.c.h.b16 %v856_v21 }
 0x16b   : > { %3766 = vrot.lane.b32.xlu0 %v3765_v17, %s3965_s24  ;;  %3761 = vrot.lane.b32.xlu2 %v3760_v27, %s3965_s24  ;;  %v4229_v19 = vpack.c.b16 %v1115_v30, %v1113_v40  ;;  %v4231_v35 = vpack.c.b16 %v1116_v34, %v1114_v33 }
 0x16c   : > { %3756 = vrot.lane.b32.xlu1 %v4190_v55, %s3969_s28 }
 0x173   : > { %3781 = vrot.lane.b32.xlu0 %v3760_v27, %s3966_s25  ;;  %3776 = vrot.lane.b32.xlu2 %v3765_v17, %s3964_s23 }
 0x174   : > { %3771 = vrot.lane.b32.xlu1 %v3760_v27, %s3964_s23 }
 0x17b   : > { %3796 = vrot.lane.b32.xlu0 %v3765_v17, %s3968_s27  ;;  %3791 = vrot.lane.b32.xlu2 %v3760_v27, %s3968_s27 }
 0x17c   : > { %3786 = vrot.lane.b32.xlu1 %v3765_v17, %s3966_s25 }
 0x183   : > { %3806 = vrot.lane.b32.xlu0 %v3760_v27, %s3969_s28  ;;  %3821 = vrot.lane.b32.xlu2 %v3765_v17, %s3969_s28 }
 0x184   : > { %3801 = vrot.lane.b32.xlu1 %v3760_v27, %s3967_s26 }
 0x18b   : > { %3811 = vrot.lane.b32.xlu0 %v4192_v56, %s3969_s28  ;;  %3826 = vrot.lane.b32.xlu2 %v3760_v27, %s3970_s29 }
 0x18c   : > { %3836 = vrot.lane.b32.xlu1 %v3765_v17, %s3970_s29 }
 0x193   : > { %3816 = vrot.lane.b32.xlu0 %v4190_v55, %s3970_s29  ;;  %3831 = vrot.lane.b32.xlu2 %v4192_v56, %s3970_s29 }
 0x194   : > { %3841 = vrot.lane.b32.xlu1 %v3765_v17, %s3967_s26 }
 0x19b   : > { %3846 = vrot.lane.b32.xlu0 %v4192_v56, %s3967_s26  ;;  %3851 = vrot.lane.b32.xlu2 %v3760_v27, %s3971_s30 }
 0x19c   : > { %3856 = vrot.lane.b32.xlu1 %v3765_v17, %s3971_s30 }
 0x1a3   : > { %3861 = vrot.lane.b32.xlu0 %v4190_v55, %s3971_s30  ;;  %3866 = vrot.lane.b32.xlu2 %v4192_v56, %s3971_s30 }
 0x1a4   : > { %1487 = vperm.xlu1 %3709, %v1365_v36  }
 0x1ab   : > { %1482 = vperm.xlu0 %3708, %v1364_v37   ;;  %1492 = vperm.xlu2 %3707, %v1366_v38  }
 0x1ac   : > { %1510 = vperm.xlu1 %3709, %v1368_v24  }
 0x1ad   : > { %v4258_v39 = vpop.permute.xlu2 %3721 }
 0x1ae   : > { %v3724_v20 = vunpack.i.h.bf16 %v4258_v39  ;;  %v3723_v60 = vunpack.i.l.bf16 %v4258_v39 }
 0x1b3   : > { %1497 = vperm.xlu0 %3708, %v1367_v1  }
 0x1b5   : > { %v3737_v41 = vpop.permute.xlu2 %3736 }
 0x1b6   : > { %v3739_v22 = vunpack.i.h.bf16 %v3737_v41  ;;  %v3738_v23 = vunpack.i.l.bf16 %v3737_v41 }
 0x1bd   : > { %v4266_v43 = vpop.permute.xlu2 %3751 }
 0x1c5   : > { %v3712_v48 = vpop.permute.xlu0 %3711  ;;  %v4278_v49 = vpop.permute.xlu2 %3761 }
 0x1c6   : > { %v3714_v50 = vunpack.i.h.bf16 %v3712_v48  ;;  %v3713_v52 = vunpack.i.l.bf16 %v3712_v48  ;;  %v3717_v28 = vpop.permute.xlu1 %3716 }
 0x1c7   : > { %v3719_v53 = vunpack.i.h.bf16 %v3717_v28  ;;  %v3718_v54 = vunpack.i.l.bf16 %v3717_v28 }
 0x1c9   : > { %v703_v31 = vsel %vm701_vm15, %v3714_v50, %v3719_v53  ;;  %v707_v57 = vsel %vm701_vm15, %v3719_v53, %v3714_v50  ;;  %v702_v58 = vsel %vm701_vm15, %v3713_v52, %v3718_v54  ;;  %v706_v7 = vsel %vm701_vm15, %v3718_v54, %v3713_v52 }
 0x1ca   : > { %v716_v8 = vsel %vm4289_vm1, %v706_v7, 0.0  ;;  %v717_v51 = vsel %vm4281_vm0, %v702_v58, 0.0  ;;  %v718_v61 = vsel %vm4289_vm1, %v707_v57, 0.0  ;;  %v719_v62 = vsel %vm4281_vm0, %v703_v31, 0.0 }
 0x1cb   : > { %v724_v63 = vpack.c.bf16 %v717_v51, %v716_v8  ;;  %v725_v26 = vpack.c.bf16 %v719_v62, %v718_v61 }
 0x1cd   : > { %v3727_v0 = vpop.permute.xlu0 %3726  ;;  %v4309_v3 = vpop.permute.xlu2 %3776  ;;  %v1029_v4 = vunpack.c.l.b16 %v724_v63  ;;  %v1031_v5 = vunpack.c.l.b16 %v725_v26  ;;  %v1030_v6 = vunpack.c.h.b16 %v724_v63  ;;  %v1032_v9 = vunpack.c.h.b16 %v725_v26 }
 0x1ce   : > { %v3732_v10 = vpop.permute.xlu1 %3731  ;;  %v3729_v25 = vunpack.i.h.bf16 %v3727_v0  ;;  %v3728_v13 = vunpack.i.l.bf16 %v3727_v0 }
 0x1cf   : > { %v4311_v29 = vpack.c.b16 %v1031_v5, %v1029_v4  ;;  %v4313_v15 = vpack.c.b16 %v1032_v9, %v1030_v6  ;;  %v3734_v16 = vunpack.i.h.bf16 %v3732_v10  ;;  %v3733_v18 = vunpack.i.l.bf16 %v3732_v10 }
 0x1d0   : > { %v750_v1 = vsel %vm744_vm2, %v3729_v25, %v3724_v20  ;;  %v749_v41 = vsel %vm744_vm2, %v3728_v13, %v3723_v60  ;;  %v746_v31 = vsel %vm744_vm2, %v3724_v20, %v3729_v25  ;;  %v745_v57 = vsel %vm744_vm2, %v3723_v60, %v3728_v13 }
 0x1d1   : > { %v787_v21 = vsel %vm785_vm3, %v3734_v16, %v3739_v22  ;;  %v791_v40 = vsel %vm785_vm3, %v3739_v22, %v3734_v16  ;;  %v786_v30 = vsel %vm785_vm3, %v3733_v18, %v3738_v23  ;;  %v790_v33 = vsel %vm785_vm3, %v3738_v23, %v3733_v18 }
 0x1d2   : > { %v800_v45 = vsel %vm4341_vm6, %v790_v33, 0.0  ;;  %v801_v46 = vsel %vm4325_vm5, %v786_v30, 0.0  ;;  %v802_v48 = vsel %vm4341_vm6, %v791_v40, 0.0  ;;  %v803_v50 = vsel %vm4325_vm5, %v787_v21, 0.0 }
 0x1d3   : > { %v808_v8 = vpack.c.bf16 %v801_v46, %v800_v45  ;;  %v809_v51 = vpack.c.bf16 %v803_v50, %v802_v48  ;;  %v757_v61 = vsel %vm677_vm14, %v749_v41, 0.0  ;;  %v759_v62 = vsel %vm677_vm14, %v750_v1, 0.0 }
 0x1d4   : > { %v3754_v10 = vunpack.i.h.bf16 %v4266_v43  ;;  %v3753_v16 = vunpack.i.l.bf16 %v4266_v43  ;;  %v765_v18 = vpack.c.bf16 %v745_v57, %v757_v61  ;;  %v766_v20 = vpack.c.bf16 %v746_v31, %v759_v62 }
 0x1d5   : > { %v3742_v14 = vpop.permute.xlu0 %3741  ;;  %v4323_v17 = vpop.permute.xlu2 %3791  ;;  %v3764_v22 = vunpack.i.h.bf16 %v4278_v49  ;;  %v3763_v23 = vunpack.i.l.bf16 %v4278_v49  ;;  %v3779_v13 = vunpack.i.h.bf16 %v4309_v3  ;;  %v1069_v21 = vunpack.c.l.b16 %v808_v8 }
 0x1d6   : > { %v3747_v34 = vpop.permute.xlu1 %3746  ;;  %v3744_v36 = vunpack.i.h.bf16 %v3742_v14  ;;  %v3743_v37 = vunpack.i.l.bf16 %v3742_v14  ;;  %v3778_v14 = vunpack.i.l.bf16 %v4309_v3  ;;  %v1071_v40 = vunpack.c.l.b16 %v809_v51 }
 0x1d7   : > { %v3749_v38 = vunpack.i.h.bf16 %v3747_v34  ;;  %v3748_v24 = vunpack.i.l.bf16 %v3747_v34  ;;  %v1050_v46 = vunpack.c.h.b16 %v765_v18  ;;  %v1052_v48 = vunpack.c.h.b16 %v766_v20 }
 0x1d8   : > { %v3793_v61 = vunpack.i.l.bf16 %v4323_v17  ;;  %v4412_v62 = vpack.c.b16 %v1071_v40, %v1069_v21 }
 0x1d9   : > { %v830_v52 = vsel %vm828_vm7, %v3744_v36, %v3749_v38  ;;  %v834_v28 = vsel %vm828_vm7, %v3749_v38, %v3744_v36  ;;  %v829_v53 = vsel %vm828_vm7, %v3743_v37, %v3748_v24  ;;  %v833_v54 = vsel %vm828_vm7, %v3748_v24, %v3743_v37 }
 0x1da   : > { %v841_v26 = vsel %vm4273_vm13, %v833_v54, 0.0  ;;  %v842_v0 = vsel %vm4281_vm0, %v829_v53, 0.0  ;;  %v843_v4 = vsel %vm4273_vm13, %v834_v28, 0.0  ;;  %v844_v5 = vsel %vm4281_vm0, %v830_v52, 0.0 }
 0x1db   : > { %v849_v60 = vpack.c.bf16 %v842_v0, %v841_v26  ;;  %v850_v25 = vpack.c.bf16 %v844_v5, %v843_v4  ;;  %v1070_v36 = vunpack.c.h.b16 %v808_v8  ;;  %v1072_v37 = vunpack.c.h.b16 %v809_v51 }
 0x1dc   : > { %v1049_v38 = vunpack.c.l.b16 %v765_v18  ;;  %v1051_v24 = vunpack.c.l.b16 %v766_v20  ;;  %v3794_v51 = vunpack.i.h.bf16 %v4323_v17  ;;  %v4428_v17 = vpack.c.b16 %v1052_v48, %v1050_v46 }
 0x1dd   : > { %v3767_v58 = vpop.permute.xlu0 %3766  ;;  %v4370_v7 = vpop.permute.xlu2 %3821  ;;  %v1089_v41 = vunpack.c.l.b16 %v849_v60  ;;  %v1091_v45 = vunpack.c.l.b16 %v850_v25  ;;  %v1092_v8 = vunpack.c.h.b16 %v850_v25  ;;  %v4414_v26 = vpack.c.b16 %v1072_v37, %v1070_v36 }
 0x1de   : > { %v4376_v63 = vpop.permute.xlu1 %3756  ;;  %v3769_v6 = vunpack.i.h.bf16 %v3767_v58  ;;  %v3768_v9 = vunpack.i.l.bf16 %v3767_v58  ;;  %v1090_v58 = vunpack.c.h.b16 %v849_v60  ;;  %v4426_v18 = vpack.c.b16 %v1051_v24, %v1049_v38 }
 0x1df   : > { %v3759_v20 = vunpack.i.h.bf16 %v4376_v63 }
 0x1e0   : > { %v704_v30 = vsel %vm701_vm15, %v3763_v23, %v3768_v9  ;;  %v705_v33 = vsel %vm701_vm15, %v3764_v22, %v3769_v6  ;;  %v708_v34 = vsel %vm701_vm15, %v3768_v9, %v3763_v23  ;;  %v709_v49 = vsel %vm701_vm15, %v3769_v6, %v3764_v22 }
 0x1e1   : > { %v720_v52 = vsel %vm4289_vm1, %v708_v34, 0.0  ;;  %v721_v28 = vsel %vm4281_vm0, %v704_v30, 0.0  ;;  %v722_v53 = vsel %vm4289_vm1, %v709_v49, 0.0  ;;  %v723_v54 = vsel %vm4281_vm0, %v705_v33, 0.0 }
 0x1e2   : > { %v4420_v4 = vpack.c.bf16 %v721_v28, %v720_v52  ;;  %v4422_v5 = vpack.c.bf16 %v723_v54, %v722_v53  ;;  %v3824_v6 = vunpack.i.h.bf16 %v4370_v7  ;;  %v3823_v9 = vunpack.i.l.bf16 %v4370_v7 }
 0x1e3   : > { %v3758_v22 = vunpack.i.l.bf16 %v4376_v63  ;;  %v4432_v23 = vpack.c.b16 %v1091_v45, %v1089_v41  ;;  %v4434_v60 = vpack.c.b16 %v1092_v8, %v1090_v58  ;;  %vm1243_vm15 = vcmask 261120  }
 0x1e4   : > { %v1033_v34 = vunpack.c.l.b16 %v4420_v4  ;;  %v1035_v49 = vunpack.c.l.b16 %v4422_v5  ;;  %v1034_v36 = vunpack.c.h.b16 %v4420_v4 }
 0x1e5   : > { %v3782_v1 = vpop.permute.xlu0 %3781  ;;  %v4400_v3 = vpop.permute.xlu2 %3826 }
 0x1e6   : > { %v3772_v50 = vpop.permute.xlu1 %3771  ;;  %v3784_v37 = vunpack.i.h.bf16 %v3782_v1  ;;  %v3783_v38 = vunpack.i.l.bf16 %v3782_v1 }
 0x1e7   : > { %v3774_v31 = vunpack.i.h.bf16 %v3772_v50  ;;  %v3773_v57 = vunpack.i.l.bf16 %v3772_v50 }
 0x1e9   : > { %v752_v0 = vsel %vm744_vm2, %v3779_v13, %v3774_v31  ;;  %v751_v56 = vsel %vm744_vm2, %v3778_v14, %v3773_v57  ;;  %v748_v25 = vsel %vm744_vm2, %v3774_v31, %v3779_v13  ;;  %v747_v21 = vsel %vm744_vm2, %v3773_v57, %v3778_v14 }
 0x1ea   : > { %v761_v40 = vsel %vm677_vm14, %v751_v56, 0.0  ;;  %v763_v30 = vsel %vm677_vm14, %v752_v0, 0.0  ;;  %v1036_v13 = vunpack.c.h.b16 %v4422_v5  ;;  %vm998_vm14 = vcmp.lt.s32.totalorder %v4264_v42, 111 }
 0x1eb   : > { %v767_v50 = vpack.c.bf16 %v747_v21, %v761_v40  ;;  %v768_v52 = vpack.c.bf16 %v748_v25, %v763_v30  ;;  %v3829_v40 = vunpack.i.h.bf16 %v4400_v3 }
 0x1ed   : > { %v3797_v33 = vpop.permute.xlu0 %3796  ;;  %v4449_v41 = vpop.permute.xlu2 %3831 }
 0x1ee   : > { %v3799_v14 = vunpack.i.h.bf16 %v3797_v33  ;;  %v3798_v24 = vunpack.i.l.bf16 %v3797_v33  ;;  %v3787_v45 = vpop.permute.xlu1 %3786  ;;  %v3834_v7 = vunpack.i.h.bf16 %v4449_v41 }
 0x1ef   : > { %v3789_v46 = vunpack.i.h.bf16 %v3787_v45  ;;  %v3788_v48 = vunpack.i.l.bf16 %v3787_v45 }
 0x1f0   : > { %v831_v28 = vsel %vm828_vm7, %v3793_v61, %v3798_v24  ;;  %v832_v53 = vsel %vm828_vm7, %v3794_v51, %v3799_v14  ;;  %v835_v1 = vsel %vm828_vm7, %v3798_v24, %v3793_v61  ;;  %v836_v54 = vsel %vm828_vm7, %v3799_v14, %v3794_v51 }
 0x1f1   : > { %v789_v31 = vsel %vm785_vm3, %v3784_v37, %v3789_v46  ;;  %v793_v57 = vsel %vm785_vm3, %v3789_v46, %v3784_v37  ;;  %v788_v58 = vsel %vm785_vm3, %v3783_v38, %v3788_v48  ;;  %v792_v8 = vsel %vm785_vm3, %v3788_v48, %v3783_v38 }
 0x1f2   : > { %v845_v0 = vsel %vm4273_vm13, %v835_v1, 0.0  ;;  %v846_v61 = vsel %vm4281_vm0, %v831_v28, 0.0  ;;  %v847_v51 = vsel %vm4273_vm13, %v836_v54, 0.0  ;;  %v848_v56 = vsel %vm4281_vm0, %v832_v53, 0.0 }
 0x1f3   : > { %v851_v4 = vpack.c.bf16 %v846_v61, %v845_v0  ;;  %v852_v5 = vpack.c.bf16 %v848_v56, %v847_v51  ;;  %v804_v25 = vsel %vm4341_vm6, %v792_v8, 0.0  ;;  %v805_v21 = vsel %vm4325_vm5, %v788_v58, 0.0 }
 0x1f4   : > { %v806_v30 = vsel %vm4341_vm6, %v793_v57, 0.0  ;;  %v807_v33 = vsel %vm4325_vm5, %v789_v31, 0.0  ;;  %v4485_v37 = vpack.c.b16 %v1035_v49, %v1033_v34  ;;  %v810_v1 = vpack.c.bf16 %v805_v21, %v804_v25 }
 0x1f5   : > { %v3807_v38 = vpop.permute.xlu0 %3806  ;;  %v1093_v14 = vunpack.c.l.b16 %v851_v4  ;;  %v1095_v24 = vunpack.c.l.b16 %v852_v5  ;;  %v1094_v45 = vunpack.c.h.b16 %v851_v4  ;;  %v1096_v46 = vunpack.c.h.b16 %v852_v5  ;;  %v4490_v31 = vpop.permute.xlu2 %3851 }
 0x1f6   : > { %v3809_v48 = vunpack.i.h.bf16 %v3807_v38  ;;  %v3808_v28 = vunpack.i.l.bf16 %v3807_v38  ;;  %v4487_v53 = vpop.permute.xlu1 %3801  ;;  %v1053_v54 = vunpack.c.l.b16 %v767_v50  ;;  %v1055_v58 = vunpack.c.l.b16 %v768_v52 }
 0x1f7   : > { %v1099_v39 = vpack.c.b16 %v1095_v24, %v1093_v14  ;;  %v1100_v57 = vpack.c.b16 %v1096_v46, %v1094_v45  ;;  %v1054_v8 = vunpack.c.h.b16 %v767_v50  ;;  %v811_v34 = vpack.c.bf16 %v807_v33, %v806_v30 }
 0x1f8   : > { %v960_v49 = vsel %vm957_vm8, %v3808_v28, %v3823_v9  ;;  %v961_v0 = vsel %vm957_vm8, %v3809_v48, %v3824_v6  ;;  %v1056_v61 = vunpack.c.h.b16 %v768_v52  ;;  %v3828_v51 = vunpack.i.l.bf16 %v4400_v3 }
 0x1f9   : > { %1250 = vmatpush.bf16.msra.mxu2 %v1099_v39  ;;  %1307 = vmatpush.bf16.msrb.mxu1 %v1100_v57  ;;  %v964_v50 = vsel %vm957_vm8, %v3823_v9, %v3808_v28  ;;  %v965_v56 = vsel %vm957_vm8, %v3824_v6, %v3809_v48  ;;  %v4509_v4 = vpack.c.b16 %v1036_v13, %v1034_v36  ;;  %v1073_v5 = vunpack.c.l.b16 %v810_v1 }
 0x1fa   : > { %v1075_v25 = vunpack.c.l.b16 %v811_v34  ;;  %v975_v52 = vsel %vm680_vm9, %v964_v50, 0.0  ;;  %v977_v21 = vsel %vm680_vm9, %v965_v56, 0.0  ;;  %v1074_v9 = vunpack.c.h.b16 %v810_v1 }
 0x1fb   : > { %v4515_v30 = vpack.c.bf16 %v975_v52, %v960_v49  ;;  %v4517_v33 = vpack.c.bf16 %v977_v21, %v961_v0  ;;  %v1076_v38 = vunpack.c.h.b16 %v811_v34  ;;  %v3833_v6 = vunpack.i.l.bf16 %v4449_v41  ;;  %v3590_v41 = vld [vmem:[%s7304_s2] sm:$0xf] }
 0x1fc   : > { %v4521_v36 = vpack.c.b16 %v1055_v58, %v1053_v54  ;;  %v4523_v13 = vpack.c.b16 %v1056_v61, %v1054_v8  ;;  %v3854_v14 = vunpack.i.h.bf16 %v4490_v31  ;;  %v3853_v24 = vunpack.i.l.bf16 %v4490_v31 }
 0x1fd   : > { %1251 = vmatpush.bf16.msra.mxu2 %v4432_v23  ;;  %1308 = vmatpush.bf16.msrb.mxu1 %v4434_v60  ;;  %v3812_v45 = vpop.permute.xlu0 %3811  ;;  %v1173_v46 = vunpack.c.l.b16 %v4515_v30  ;;  %v1175_v48 = vunpack.c.l.b16 %v4517_v33  ;;  %v3804_v28 = vunpack.i.h.bf16 %v4487_v53  ;;  %v1079_v57 = vpack.c.b16 %v1075_v25, %v1073_v5  ;;  %v4569_v63 = vpop.permute.xlu2 %3866 }
 0x1fe   : > { %v3814_v1 = vunpack.i.h.bf16 %v3812_v45  ;;  %v3813_v54 = vunpack.i.l.bf16 %v3812_v45  ;;  %v3837_v39 = vpop.permute.xlu1 %3836  ;;  %v1080_v49 = vpack.c.b16 %v1076_v38, %v1074_v9  ;;  %v3803_v38 = vunpack.i.l.bf16 %v4487_v53 }
 0x1ff   : > { %v3839_v58 = vunpack.i.h.bf16 %v3837_v39  ;;  %v3838_v8 = vunpack.i.l.bf16 %v3837_v39  ;;  %v1179_v34 = vpack.c.b16 %v1175_v48, %v1173_v46  ;;  %v1174_v48 = vunpack.c.h.b16 %v4515_v30 }
 0x200   : > { %v958_v60 = vsel %vm957_vm8, %v3758_v22, %v3813_v54  ;;  %v959_v0 = vsel %vm957_vm8, %v3759_v20, %v3814_v1  ;;  %v962_v55 = vsel %vm957_vm8, %v3813_v54, %v3758_v22  ;;  %v963_v61 = vsel %vm957_vm8, %v3814_v1, %v3759_v20 }
 0x201   : > { %v918_v50 = vsel %vm914_vm10, %v3829_v40, %v3839_v58  ;;  %v922_v56 = vsel %vm914_vm10, %v3839_v58, %v3829_v40  ;;  %v917_v5 = vsel %vm914_vm10, %v3828_v51, %v3838_v8  ;;  %v921_v22 = vsel %vm914_vm10, %v3838_v8, %v3828_v51  ;;  %1252 = vmatpush.bf16.msra.mxu2 %v1079_v57 }
 0x202   : > { %1269 = vmatpush.bf16.msra.mxu3 %v1179_v34  ;;  %1309 = vmatpush.bf16.msrb.mxu1 %v1080_v49  ;;  %v971_v20 = vsel %vm680_vm9, %v962_v55, 0.0  ;;  %v973_v3 = vsel %vm680_vm9, %v963_v61, 0.0  ;;  %v933_v40 = vsel %vm4273_vm13, %v917_v5, 0.0  ;;  %v934_v25 = vsel %vm4537_vm12, %v921_v22, 0.0 }
 0x203   : > { %v4579_v52 = vpack.c.bf16 %v971_v20, %v958_v60  ;;  %v4581_v51 = vpack.c.bf16 %v973_v3, %v959_v0  ;;  %v935_v21 = vsel %vm4273_vm13, %v918_v50, 0.0  ;;  %v936_v9 = vsel %vm4537_vm12, %v922_v56, 0.0 }
 0x204   : > { %v4588_v45 = vpack.c.bf16 %v934_v25, %v933_v40  ;;  %v4590_v46 = vpack.c.bf16 %v936_v9, %v935_v21  ;;  %v3869_v1 = vunpack.i.h.bf16 %v4569_v63  ;;  %v1176_v58 = vunpack.c.h.b16 %v4517_v33 }
 0x205   : > { %1253 = vmatpush.bf16.msra.mxu2 %v4412_v62  ;;  %v3817_v54 = vpop.permute.xlu0 %3816  ;;  %v1169_v39 = vunpack.c.l.b16 %v4579_v52  ;;  %v1171_v57 = vunpack.c.l.b16 %v4581_v51  ;;  %v3868_v62 = vunpack.i.l.bf16 %v4569_v63 }
 0x206   : > { %1310 = vmatpush.bf16.msrb.mxu1 %v4414_v26  ;;  %v3819_v53 = vunpack.i.h.bf16 %v3817_v54  ;;  %v3818_v8 = vunpack.i.l.bf16 %v3817_v54  ;;  %v3842_v34 = vpop.permute.xlu1 %3841  ;;  %v1153_v49 = vunpack.c.l.b16 %v4588_v45  ;;  %v1155_v30 = vunpack.c.l.b16 %v4590_v46 }
 0x207   : > { %v3844_v60 = vunpack.i.h.bf16 %v3842_v34  ;;  %v3843_v0 = vunpack.i.l.bf16 %v3842_v34  ;;  %v1177_v55 = vpack.c.b16 %v1171_v57, %v1169_v39  ;;  %v1180_v57 = vpack.c.b16 %v1176_v58, %v1174_v48 }
 0x208   : > { %v915_v33 = vsel %vm914_vm10, %v3818_v8, %v3833_v6  ;;  %v916_v26 = vsel %vm914_vm10, %v3819_v53, %v3834_v7  ;;  %v919_v61 = vsel %vm914_vm10, %v3833_v6, %v3818_v8  ;;  %v920_v50 = vsel %vm914_vm10, %v3834_v7, %v3819_v53 }
 0x209   : > { %v876_v56 = vsel %vm873_vm11, %v3803_v38, %v3843_v0  ;;  %v877_v5 = vsel %vm873_vm11, %v3804_v28, %v3844_v60  ;;  %v880_v22 = vsel %vm873_vm11, %v3843_v0, %v3803_v38  ;;  %v881_v20 = vsel %vm873_vm11, %v3844_v60, %v3804_v28  ;;  %1254 = vmatpush.bf16.msra.mxu2 %v4521_v36  ;;  %v3671_v36 = vld [vmem:[%s7304_s2 + $0x8] sm:$0xf0] }
 0x20a   : > { %1270 = vmatpush.bf16.msra.mxu3 %v1177_v55  ;;  %1311 = vmatpush.bf16.msrb.mxu1 %v4523_v13  ;;  %v1159_v7 = vpack.c.b16 %v1155_v30, %v1153_v49  ;;  %v929_v6 = vsel %vm4273_vm13, %v915_v33, 0.0  ;;  %v930_v3 = vsel %vm4537_vm12, %v919_v61, 0.0  ;;  %v931_v40 = vsel %vm4273_vm13, %v916_v26, 0.0  ;;  %vm4705_vm13 = vmand %vm680_vm9, %vm4325_vm5 }
 0x20b   : > { %v932_v28 = vsel %vm4537_vm12, %v920_v50, 0.0  ;;  %v4643_v25 = vpack.c.bf16 %v930_v3, %v929_v6  ;;  %v890_v13 = vsel %vm4318_vm4, %v876_v56, 0.0  ;;  %v891_v21 = vsel %vm4325_vm5, %v880_v22, 0.0 }
 0x20c   : > { %v4649_v9 = vpack.c.bf16 %v932_v28, %v931_v40  ;;  %v892_v47 = vsel %vm4318_vm4, %v877_v5, 0.0  ;;  %v893_v38 = vsel %vm4325_vm5, %v881_v20, 0.0  ;;  %v4655_v54 = vpack.c.bf16 %v891_v21, %v890_v13 }
 0x20d   : > { %1255 = vmatpush.bf16.msra.mxu2 %v4426_v18  ;;  %v3847_v23 = vpop.permute.xlu0 %3846  ;;  %v1149_v39 = vunpack.c.l.b16 %v4643_v25  ;;  %v4659_v53 = vor.u32 %v3671_v36, %v3590_v41  ;;  %v1170_v8 = vunpack.c.h.b16 %v4579_v52  ;;  %v4664_v0 = vpack.c.bf16 %v893_v38, %v892_v47 }
 0x20e   : > { %1271 = vmatpush.bf16.msra.mxu3 %v1159_v7  ;;  %1312 = vmatpush.bf16.msrb.mxu1 %v4428_v17  ;;  %v3849_v34 = vunpack.i.h.bf16 %v3847_v23  ;;  %v3848_v49 = vunpack.i.l.bf16 %v3847_v23  ;;  %v3857_v30 = vpop.permute.xlu1 %3856  ;;  %v1151_v60 = vunpack.c.l.b16 %v4649_v9  ;;  %v1133_v33 = vunpack.c.l.b16 %v4655_v54 }
 0x20f   : > { %v3859_v55 = vunpack.i.h.bf16 %v3857_v30  ;;  %v3858_v18 = vunpack.i.l.bf16 %v3857_v30  ;;  %v1172_v48 = vunpack.c.h.b16 %v4581_v51  ;;  %v1135_v50 = vunpack.c.l.b16 %v4664_v0 }
 0x210   : > { %v875_v52 = vsel %vm873_vm11, %v3754_v10, %v3849_v34  ;;  %v879_v17 = vsel %vm873_vm11, %v3849_v34, %v3754_v10  ;;  %v874_v58 = vsel %vm873_vm11, %v3753_v16, %v3848_v49  ;;  %v878_v51 = vsel %vm873_vm11, %v3848_v49, %v3753_v16 }
 0x211   : > { %v1002_v26 = vsel %vm998_vm14, %v3854_v14, %v3859_v55  ;;  %v1006_v10 = vsel %vm998_vm14, %v3859_v55, %v3854_v14  ;;  %v1001_v61 = vsel %vm998_vm14, %v3853_v24, %v3858_v18  ;;  %v1005_v43 = vsel %vm998_vm14, %v3858_v18, %v3853_v24  ;;  %1256 = vmatpush.bf16.msra.mxu2 %v4485_v37 }
 0x212   : > { %v1157_v14 = vpack.c.b16 %v1151_v60, %v1149_v39  ;;  %1313 = vmatpush.bf16.msrb.mxu1 %v4509_v4  ;;  %v886_v31 = vsel %vm4318_vm4, %v874_v58, 0.0  ;;  %v887_v24 = vsel %vm4325_vm5, %v878_v51, 0.0  ;;  %v888_v37 = vsel %vm4318_vm4, %v875_v52, 0.0 }
 0x213   : > { %v889_v44 = vsel %vm4325_vm5, %v879_v17, 0.0  ;;  %v4719_v56 = vpack.c.bf16 %v887_v24, %v886_v31  ;;  %v1017_v5 = vsel %vm4318_vm4, %v1001_v61, 0.0  ;;  %v1018_v22 = vsel %vm4705_vm13, %v1005_v43, 0.0  ;;  %v3674_v61 = vld [vmem:[%s7304_s2 + $0x20] sm:$0xf0] }
 0x214   : > { %1272 = vmatpush.bf16.msra.mxu3 %v1157_v14  ;;  %v4723_v4 = vpack.c.bf16 %v889_v44, %v888_v37  ;;  %v1019_v20 = vsel %vm4318_vm4, %v1002_v26, 0.0  ;;  %v1020_v41 = vsel %vm4705_vm13, %v1006_v10, 0.0  ;;  %v1023_v6 = vpack.c.bf16 %v1018_v22, %v1017_v5  ;;  %v3673_v5 = vld [vmem:[%s7304_s2 + $0x1c] sm:$0xf] }
 0x215   : > { %1257 = vmatpush.bf16.msra.mxu2 %v4311_v29  ;;  %v3862_v27 = vpop.permute.xlu0 %3861  ;;  %v1129_v7 = vunpack.c.l.b16 %v4719_v56  ;;  %v1024_v3 = vpack.c.bf16 %v1020_v41, %v1019_v20  ;;  %v1178_v40 = vpack.c.b16 %v1172_v48, %v1170_v8  ;;  %v1139_v36 = vpack.c.b16 %v1135_v50, %v1133_v33 }
 0x216   : > { %1314 = vmatpush.bf16.msrb.mxu1 %v4313_v15  ;;  %v3864_v28 = vunpack.i.h.bf16 %v3862_v27  ;;  %v3863_v13 = vunpack.i.l.bf16 %v3862_v27  ;;  %v1131_v21 = vunpack.c.l.b16 %v4723_v4  ;;  %v1193_v47 = vunpack.c.l.b16 %v1023_v6 }
 0x217   : > { %v1195_v38 = vunpack.c.l.b16 %v1024_v3  ;;  %v1154_v23 = vunpack.c.h.b16 %v4588_v45  ;;  %v1156_v29 = vunpack.c.h.b16 %v4590_v46  ;;  %v1150_v55 = vunpack.c.h.b16 %v4643_v25  ;;  %v3670_v25 = vld [vmem:[%s7304_s2 + $0x4] sm:$0xf] }
 0x218   : > { %1273 = vmatpush.bf16.msra.mxu3 %v1139_v36  ;;  %v999_v39 = vsel %vm998_vm14, %v3863_v13, %v3868_v62  ;;  %v1000_v15 = vsel %vm998_vm14, %v3864_v28, %v3869_v1  ;;  %v1004_v45 = vsel %vm998_vm14, %v3869_v1, %v3864_v28  ;;  %v1137_v46 = vpack.c.b16 %v1131_v21, %v1129_v7 }
 0x219   : > { %1326 = vmatpush.bf16.msrb.mxu2 %v1180_v57  ;;  %v1003_v57 = vsel %vm998_vm14, %v3868_v62, %v3863_v13  ;;  %v1199_v8 = vpack.c.b16 %v1195_v38, %v1193_v47  ;;  %v1013_v34 = vsel %vm4318_vm4, %v999_v39, 0.0  ;;  %1315 = vmatmul.bf16.vlgmr.msrb.gmra.mxu1 %v4659_v53  ;;  %v1015_v62 = vsel %vm4318_vm4, %v1000_v15, 0.0 }
 0x21a   : > { %1258 = vmatmul.bf16.vlgmr.msra.gmra.mxu2 %v4659_v53  ;;  %v1014_v49 = vsel %vm4705_vm13, %v1003_v57, 0.0  ;;  %v1016_v42 = vsel %vm4705_vm13, %v1004_v45, 0.0  ;;  %v1160_v30 = vpack.c.b16 %v1156_v29, %v1154_v23  ;;  %v1152_v18 = vunpack.c.h.b16 %v4649_v9  ;;  %v3598_v53 = vld [vmem:[%s7304_s2 + $0x8] sm:$0xf]  ;;  %v3592_v9 = vld [vmem:[%s7304_s2 + $0xc] sm:$0xf0] }
 0x21b   : > { %v1021_v63 = vpack.c.bf16 %v1014_v49, %v1013_v34  ;;  %1294 = vmatpush.bf16.msrb.mxu0 %v1199_v8  ;;  %v1022_v1 = vpack.c.bf16 %v1016_v42, %v1015_v62  ;;  %v1194_v52 = vunpack.c.h.b16 %v1023_v6  ;;  %v1196_v17 = vunpack.c.h.b16 %v1024_v3 }
 0x21c   : > { %1274 = vmatpush.bf16.msra.mxu3 %v1137_v46  ;;  %v1158_v58 = vpack.c.b16 %v1152_v18, %v1150_v55  ;;  %v1134_v51 = vunpack.c.h.b16 %v4655_v54  ;;  %v1136_v26 = vunpack.c.h.b16 %v4664_v0  ;;  %v3599_v10 = vor.u32 %v3672_v59, %v3598_v53 }
 0x21d   : > { %1327 = vmatpush.bf16.msrb.mxu2 %v1178_v40  ;;  %v1189_v60 = vunpack.c.l.b16 %v1021_v63  ;;  %v1191_v33 = vunpack.c.l.b16 %v1022_v1  ;;  %v1200_v43 = vpack.c.b16 %v1196_v17, %v1194_v52  ;;  %v3595_v16 = vor.u32 %v3670_v25, %v3592_v9 }
 0x21e   : > { %v1190_v14 = vunpack.c.h.b16 %v1021_v63  ;;  %v1192_v50 = vunpack.c.h.b16 %v1022_v1  ;;  %v1140_v54 = vpack.c.b16 %v1136_v26, %v1134_v51  ;;  %v1130_v0 = vunpack.c.h.b16 %v4719_v56  ;;  %v3675_v56 = vld [vmem:[%s7304_s2 + $0x28] sm:$0xf0] }
 0x21f   : > { %v1197_v48 = vpack.c.b16 %v1191_v33, %v1189_v60  ;;  %v1132_v31 = vunpack.c.h.b16 %v4723_v4  ;;  %v3604_v4 = vld [vmem:[%s7304_s2 + $0x24] sm:$0xf0] }
 0x220   : > { %1275 = vmatpush.bf16.msra.mxu3 %v4229_v19  ;;  %v3602_v19 = vld [vmem:[%s7304_s2 + $0x18] sm:$0xf]  ;;  %v1198_v37 = vpack.c.b16 %v1192_v50, %v1190_v14  ;;  %v3607_v20 = vor.u32 %v3673_v5, %v3604_v4  ;;  %v1370_v5 = vld [vmem:[%s7309_s7 + $0x10] sm:$0xff] }
 0x221   : > { %1328 = vmatpush.bf16.msrb.mxu2 %v1160_v30  ;;  %1295 = vmatpush.bf16.msrb.mxu0 %v1197_v48  ;;  %v3603_v24 = vor.u32 %v3674_v61, %v3602_v19  ;;  %v1138_v44 = vpack.c.b16 %v1132_v31, %v1130_v0  ;;  %v1371_v4 = vld [vmem:[%s7309_s7 + $0x18] sm:$0xff] }
 0x224   : > { %1276 = vmatpush.bf16.msra.mxu3 %v4210_v11  ;;  %3612 = vmatmul.msk.bf16.vlgmr.msrb.gmra.mxu0 %vm1243_vm15, %v3599_v10  ;;  %v3610_v11 = vld [vmem:[%s7304_s2 + $0x20] sm:$0xf] }
 0x225   : > { %1329 = vmatpush.bf16.msrb.mxu2 %v1158_v58  ;;  %v3611_v22 = vor.u32 %v3675_v56, %v3610_v11  ;;  %v1369_v11 = vld [vmem:[%s7309_s7 + $0x8] sm:$0xff] }
 0x226   : > { %v1727_v56 = vld [vmem:[%s7310_s8 + $0x8] sm:$0xff] }
 0x227   : > { %1277 = vmatmul.bf16.vlgmr.msra.gmra.mxu3 %v3595_v16 }
 0x228   : > { %1351 = vmatpush.bf16.msrb.mxu3 %v1200_v43 }
 0x229   : > { %1330 = vmatpush.bf16.msrb.mxu2 %v1140_v54  ;;  %1320 = vmatmul.bf16.gmra.mxu1 %v3603_v24 }
 0x22a   : > { %1263 = vmatmul.bf16.gmra.mxu2 %v3603_v24 }
 0x22c   : > { %1352 = vmatpush.bf16.msrb.mxu3 %v1198_v37 }
 0x22d   : > { %1331 = vmatpush.bf16.msrb.mxu2 %v1138_v44 }
 0x231   : > { %1332 = vmatpush.bf16.msrb.mxu2 %v4231_v35 }
 0x234   : > { %3613 = vmatmul.msk.bf16.gmra.mxu0 %vm1243_vm15, %v3611_v22 }
 0x235   : > { %1333 = vmatpush.bf16.msrb.mxu2 %v4212_v12 }
 0x237   : > { %1282 = vmatmul.bf16.gmra.mxu3 %v3607_v20 }
 0x23a   : > { %1334 = vmatmul.bf16.vlgmr.msrb.gmra.mxu2 %v3595_v16 }
 0x247   : > { %3614 = vmatmul.msk.bf16.vlgmr.msrb.gmra.mxu3 %vm1243_vm15, %v3599_v10 }
 0x24a   : > { %1339 = vmatmul.bf16.gmra.mxu2 %v3607_v20  ;;  %v1726_v20 = vld [vmem:[%s7310_s8] sm:$0xff] }
 0x257   : > { %3615 = vmatmul.msk.bf16.gmra.mxu3 %vm1243_vm15, %v3611_v22  ;;  %v1730_v22 = vld [vmem:[%s7310_s8 + $0x20] sm:$0xff] }
 0x296   : > { %v1316_v28 = vpop.f32.mrf.mxu1 }
 0x29d   : > { %v1259_v35 = vpop.f32.mrf.mxu2 }
 0x29e   : > { %v1318_v29 = vpop.f32.mrf.mxu1 }
 0x2a1   : > { %v1297_v36 = vpop.f32.mrf.mxu0 }
 0x2a5   : > { %v1261_v41 = vpop.f32.mrf.mxu2 }
 0x2a6   : > { %v1321_v1 = vpop.f32.mrf.mxu1 }
 0x2a9   : > { %v1299_v23 = vpop.f32.mrf.mxu0 }
 0x2aa   : > { %v1278_v27 = vpop.f32.mrf.mxu3 }
 0x2ab   : > { %v1279_v21 = vadd.f32 %v1278_v27, %v1259_v35  ;;  %v1728_v35 = vld [vmem:[%s7310_s8 + $0x10] sm:$0xff]  ;;  %v1729_v27 = vld [vmem:[%s7310_s8 + $0x18] sm:$0xff] }
 0x2ad   : > { %v1264_v7 = vpop.f32.mrf.mxu2  ;;  %v4807_v38 = vadd.f32 %v1297_v36, %v1279_v21  ;;  %v1739_v36 = vld [vmem:[%s7310_s8 + $0x68] sm:$0xff]  ;;  %v1738_v21 = vld [vmem:[%s7310_s8 + $0x60] sm:$0xff] }
 0x2ae   : > { %v1323_v51 = vpop.f32.mrf.mxu1 }
 0x2af   : > { %v1384_v46 = vmul.f32 %v4807_v38, %v4807_v38 }
 0x2b1   : > { %v1302_v55 = vpop.f32.mrf.mxu0 }
 0x2b2   : > { %v1280_v6 = vpop.f32.mrf.mxu3 }
 0x2b3   : > { %v1281_v34 = vadd.f32 %v1280_v6, %v1261_v41  ;;  %v1733_v41 = vld [vmem:[%s7310_s8 + $0x38] sm:$0xff]  ;;  %v1736_v6 = vld [vmem:[%s7310_s8 + $0x50] sm:$0xff] }
 0x2b5   : > { %v1266_v3 = vpop.f32.mrf.mxu2  ;;  %v4817_v63 = vadd.f32 %v1299_v23, %v1281_v34  ;;  %v1745_v23 = vld [vmem:[%s7311_s9 + $0x18] sm:$0xff]  ;;  %v4924_v34 = vpop.permute.xlu0 %1482 }
 0x2b7   : > { %v1386_v58 = vmul.f32 %v4817_v63, %v4817_v63 }
 0x2b9   : > { %v1304_v61 = vpop.f32.mrf.mxu0 }
 0x2ba   : > { %v1283_v40 = vpop.f32.mrf.mxu3 }
 0x2bb   : > { %v1284_v60 = vadd.f32 %v1283_v40, %v1264_v7  ;;  %v1731_v7 = vld [vmem:[%s7310_s8 + $0x28] sm:$0xff]  ;;  %v1734_v40 = vld [vmem:[%s7310_s8 + $0x40] sm:$0xff] }
 0x2bd   : > { %v1335_v12 = vpop.f32.mrf.mxu2  ;;  %v4823_v59 = vadd.f32 %v1302_v55, %v1284_v60  ;;  %v1749_v60 = vld [vmem:[%s7311_s9 + $0x38] sm:$0xff]  ;;  %v1754_v55 = vld [vmem:[%s7311_s9 + $0x60] sm:$0xff] }
 0x2be   : > { %v1336_v47 = vadd.f32 %v1335_v12, %v1316_v28  ;;  %v1735_v28 = vld [vmem:[%s7310_s8 + $0x48] sm:$0xff]  ;;  %v1737_v12 = vld [vmem:[%s7310_s8 + $0x58] sm:$0xff] }
 0x2bf   : > { %v1388_v25 = vmul.f32 %v4823_v59, %v4823_v59 }
 0x2c2   : > { %v1285_v13 = vpop.f32.mrf.mxu3 }
 0x2c3   : > { %v1286_v9 = vadd.f32 %v1285_v13, %v1266_v3  ;;  %v1732_v3 = vld [vmem:[%s7310_s8 + $0x30] sm:$0xff]  ;;  %v1742_v13 = vld [vmem:[%s7311_s9] sm:$0xff] }
 0x2c5   : > { %v1337_v39 = vpop.f32.mrf.mxu2  ;;  %v4837_v14 = vadd.f32 %v1304_v61, %v1286_v9 }
 0x2c6   : > { %v1338_v62 = vadd.f32 %v1337_v39, %v1318_v29  ;;  %v1741_v29 = vld [vmem:[%s7310_s8 + $0x78] sm:$0xff]  ;;  %v1743_v39 = vld [vmem:[%s7311_s9 + $0x8] sm:$0xff] }
 0x2c7   : > { %v1390_v31 = vmul.f32 %v4837_v14, %v4837_v14 }
 0x2ca   : > { %v1354_v15 = vpop.f32.mrf.mxu3 }
 0x2cb   : > { %v4809_v57 = vadd.f32 %v1354_v15, %v1336_v47  ;;  %v1740_v47 = vld [vmem:[%s7310_s8 + $0x70] sm:$0xff]  ;;  %v4913_v15 = vpop.permute.xlu1 %1487 }
 0x2cd   : > { %v1372_v45 = vadd.f32 %v4809_v57, %v4807_v38  ;;  %v1385_v8 = vmul.f32 %v4809_v57, %v4809_v57  ;;  %v1340_v18 = vpop.f32.mrf.mxu2 }
 0x2ce   : > { %v1341_v53 = vadd.f32 %v1340_v18, %v1321_v1  ;;  %v1747_v1 = vld [vmem:[%s7311_s9 + $0x28] sm:$0xff]  ;;  %v4942_v18 = vpop.permute.xlu0 %1497 }
 0x2cf   : > { %1373 = vadd.xlane.f32.xlu1 %v1372_v45  ;;  %v1392_v49 = vadd.f32 %v1385_v8, %v1384_v46  ;;  %v1748_v45 = vld [vmem:[%s7311_s9 + $0x30] sm:$0xff]  ;;  %v1746_v8 = vld [vmem:[%s7311_s9 + $0x20] sm:$0xff] }
 0x2d0   : > { %v1744_v46 = vld [vmem:[%s7311_s9 + $0x10] sm:$0xff] }
 0x2d1   : > { %1393 = vadd.xlane.f32.xlu2 %v1392_v49  ;;  %v1751_v49 = vld [vmem:[%s7311_s9 + $0x48] sm:$0xff] }
 0x2d2   : > { %v1356_v42 = vpop.f32.mrf.mxu3 }
 0x2d3   : > { %v4819_v30 = vadd.f32 %v1356_v42, %v1338_v62  ;;  %v4929_v62 = vpop.permute.xlu1 %1510  ;;  %v4931_v42 = vpop.permute.xlu2 %1492 }
 0x2d5   : > { %v1375_v33 = vadd.f32 %v4819_v30, %v4817_v63  ;;  %v1387_v48 = vmul.f32 %v4819_v30, %v4819_v30  ;;  %v1342_v43 = vpop.f32.mrf.mxu2 }
 0x2d6   : > { %v1343_v50 = vadd.f32 %v1342_v43, %v1323_v51 }
 0x2d7   : > { %1376 = vadd.xlane.f32.xlu0 %v1375_v33  ;;  %v1395_v26 = vadd.f32 %v1387_v48, %v1386_v58  ;;  %v1752_v58 = vld [vmem:[%s7311_s9 + $0x50] sm:$0xff] }
 0x2da   : > { %v1359_v52 = vpop.f32.mrf.mxu3 }
 0x2db   : > { %v4827_v17 = vadd.f32 %v1359_v52, %v1341_v53  ;;  %v1750_v52 = vld [vmem:[%s7311_s9 + $0x40] sm:$0xff] }
 0x2dd   : > { %v1378_v10 = vadd.f32 %v4827_v17, %v4823_v59  ;;  %v1389_v19 = vmul.f32 %v4827_v17, %v4827_v17 }
 0x2df   : > { %1396 = vadd.xlane.f32.xlu0 %v1395_v26  ;;  %1379 = vadd.xlane.f32.xlu2 %v1378_v10  ;;  %v1398_v16 = vadd.f32 %v1389_v19, %v1388_v25  ;;  %v1753_v10 = vld [vmem:[%s7311_s9 + $0x58] sm:$0xff] }
 0x2e1   : > { %1399 = vadd.xlane.f32.xlu1 %v1398_v16 }
 0x2e2   : > { %v1361_v54 = vpop.f32.mrf.mxu3 }
 0x2e3   : > { %v4839_v0 = vadd.f32 %v1361_v54, %v1343_v50 }
 0x2e5   : > { %v1391_v24 = vmul.f32 %v4839_v0, %v4839_v0  ;;  %v1381_v44 = vadd.f32 %v4839_v0, %v4837_v14 }
 0x2e7   : > { %v1401_v37 = vadd.f32 %v1391_v24, %v1390_v31 }
 0x2e9   : > { %1402 = vadd.xlane.f32.xlu2 %v1401_v37  ;;  %1382 = vadd.xlane.f32.xlu1 %v1381_v44 }
 0x2f3   : > { %1515 = vperm.xlu0 %3708, %v1369_v11  }
 0x2fb   : > { %3203 = vperm.xlu0 %3708, %v1727_v56  }
 0x301   : > { %1520 = vperm.xlu2 %3707, %v1370_v5  }
 0x302   : > { %1525 = vperm.xlu1 %3709, %v1371_v4  }
 0x303   : > { %3218 = vperm.xlu0 %3708, %v1730_v22  }
 0x309   : > { %3198 = vperm.xlu2 %3707, %v1726_v20  }
 0x30a   : > { %3208 = vperm.xlu1 %3709, %v1728_v35  }
 0x30b   : > { %3233 = vperm.xlu0 %3708, %v1733_v41  }
 0x311   : > { %3213 = vperm.xlu2 %3707, %v1729_v27  }
 0x312   : > { %3223 = vperm.xlu1 %3709, %v1731_v7  }
 0x313   : > { %3248 = vperm.xlu0 %3708, %v1736_v6  }
 0x319   : > { %3228 = vperm.xlu2 %3707, %v1732_v3  }
 0x31a   : > { %3238 = vperm.xlu1 %3709, %v1734_v40  }
 0x31b   : > { %3263 = vperm.xlu0 %3708, %v1739_v36  }
 0x321   : > { %3243 = vperm.xlu2 %3707, %v1735_v28  }
 0x322   : > { %3253 = vperm.xlu1 %3709, %v1737_v12  }
 0x323   : > { %3310 = vperm.xlu0 %3708, %v1742_v13  }
 0x329   : > { %3258 = vperm.xlu2 %3707, %v1738_v21  }
 0x32a   : > { %3268 = vperm.xlu1 %3709, %v1740_v47  }
 0x32b   : > { %3325 = vperm.xlu0 %3708, %v1745_v23  }
 0x331   : > { %3273 = vperm.xlu2 %3707, %v1741_v29  }
 0x332   : > { %3315 = vperm.xlu1 %3709, %v1743_v39  }
 0x333   : > { %3340 = vperm.xlu0 %3708, %v1748_v45  }
 0x339   : > { %3320 = vperm.xlu2 %3707, %v1744_v46  }
 0x33a   : > { %3330 = vperm.xlu1 %3709, %v1746_v8  }
 0x33b   : > { %3355 = vperm.xlu0 %3708, %v1751_v49  }
 0x341   : > { %3335 = vperm.xlu2 %3707, %v1747_v1  }
 0x342   : > { %v1374_v33 = vpop.xlane.xlu1 %1373  ;;  %3345 = vperm.xlu1 %3709, %v1749_v60  }
 0x343   : > { %3370 = vperm.xlu0 %3708, %v1754_v55   ;;  %v4945_v53 = vmul.f32 %v1374_v33, %v4158_v32 }
 0x344   : > { %v1394_v48 = vpop.xlane.xlu2 %1393 }
 0x345   : > { %v1408_v25 = vmul.f32 %v1394_v48, %v4158_v32  ;;  %v1412_v9 = vmul.f32 %v4945_v53, %v4945_v53 }
 0x347   : > { %v1416_v26 = vsub.f32 %v1408_v25, %v1412_v9 }
 0x349   : > { %3350 = vperm.xlu2 %3707, %v1750_v52   ;;  %v1428_v61 = vadd.f32 1e-05, %v1416_v26 }
 0x34a   : > { %v1377_v51 = vpop.xlane.xlu0 %1376  ;;  %3360 = vperm.xlu1 %3709, %v1752_v58  }
 0x34b   : > { %v4960_v19 = vmul.f32 %v1377_v51, %v4158_v32  ;;  %3880 = vrsqrt.f32 %v1428_v61  ;;  %vm1438_vm6 = vweird.f32 %v1428_v61 }
 0x34d   : > { %v1413_v50 = vmul.f32 %v4960_v19, %v4960_v19 }
 0x351   : > { %3365 = vperm.xlu2 %3707, %v1753_v10   ;;  %v3881_v4 = vpop.eup %3880  ;;  %v1422_v10 = vsub.f32 %v4817_v63, %v4960_v19 }
 0x352   : > { %v1397_v43 = vpop.xlane.xlu0 %1396  ;;  %v1380_v16 = vpop.xlane.xlu2 %1379  ;;  %v1433_v41 = vmul.f32 %v3881_v4, %v1428_v61  ;;  %vm1439_vm3 = vweird.f32 %v3881_v4  ;;  %v1423_v61 = vsub.f32 %v4819_v30, %v4960_v19 }
 0x353   : > { %v1409_v54 = vmul.f32 %v1397_v43, %v4158_v32  ;;  %v1406_v31 = vmul.f32 %v1380_v16, %v4158_v32  ;;  %vm1440_vm8 = vmor %vm1438_vm6, %vm1439_vm3 }
 0x354   : > { %v1400_v24 = vpop.xlane.xlu1 %1399  ;;  %v1434_v36 = vmul.f32 %v3881_v4, %v1433_v41 }
 0x355   : > { %v1417_v37 = vsub.f32 %v1409_v54, %v1413_v50  ;;  %v1414_v44 = vmul.f32 %v1406_v31, %v1406_v31  ;;  %v1410_v11 = vmul.f32 %v1400_v24, %v4158_v32  ;;  %v1424_v58 = vsub.f32 %v4823_v59, %v1406_v31 }
 0x356   : > { %v1435_v29 = vmul.f32 0.5, %v1434_v36  ;;  %v1425_v25 = vsub.f32 %v4827_v17, %v1406_v31  ;;  %v1420_v50 = vsub.f32 %v4807_v38, %v4945_v53  ;;  %v1421_v59 = vsub.f32 %v4809_v57, %v4945_v53 }
 0x357   : > { %v1429_v56 = vadd.f32 1e-05, %v1417_v37  ;;  %v1418_v5 = vsub.f32 %v1410_v11, %v1414_v44 }
 0x358   : > { %v1436_v8 = vsub.f32 1.5, %v1435_v29 }
 0x359   : > { %3882 = vrsqrt.f32 %v1429_v56  ;;  %v1430_v22 = vadd.f32 1e-05, %v1418_v5  ;;  %vm1448_vm5 = vweird.f32 %v1429_v56 }
 0x35a   : > { %v1437_v33 = vmul.f32 %v3881_v4, %v1436_v8  ;;  %v3676_v8 = vld [vmem:[%s7305_s3] sm:$0xff] }
 0x35b   : > { %3884 = vrsqrt.f32 %v1430_v22  ;;  %vm1458_vm2 = vweird.f32 %v1430_v22 }
 0x35c   : > { %v1403_v20 = vpop.xlane.xlu2 %1402  ;;  %v1383_v35 = vpop.xlane.xlu1 %1382  ;;  %v1441_v26 = vsel %vm1440_vm8, %v3881_v4, %v1437_v33  ;;  %v3683_v33 = vld [vmem:[%s7305_s3 + $0x38] sm:$0xff] }
 0x35d   : > { %v4968_v27 = vmul.f32 %v1383_v35, %v4158_v32  ;;  %v1411_v6 = vmul.f32 %v1403_v20, %v4158_v32  ;;  %v1472_v37 = vmul.f32 %v1441_v26, %v1420_v50  ;;  %v1473_v11 = vmul.f32 %v1441_v26, %v1421_v59 }
 0x35f   : > { %v3883_v7 = vpop.eup %3882  ;;  %v1415_v3 = vmul.f32 %v4968_v27, %v4968_v27  ;;  %v1426_v63 = vsub.f32 %v4837_v14, %v4968_v27  ;;  %v1427_v44 = vsub.f32 %v4839_v0, %v4968_v27  ;;  %v1501_v27 = vmul.f32 %v4924_v34, %v1473_v11 }
 0x360   : > { %v1443_v40 = vmul.f32 %v3883_v7, %v1429_v56  ;;  %vm1449_vm1 = vweird.f32 %v3883_v7 }
 0x361   : > { %v1419_v28 = vsub.f32 %v1411_v6, %v1415_v3  ;;  %v3885_v12 = vpop.eup %3884  ;;  %vm1450_vm7 = vmor %vm1448_vm5, %vm1449_vm1 }
 0x362   : > { %v1444_v13 = vmul.f32 %v3883_v7, %v1443_v40  ;;  %v1453_v21 = vmul.f32 %v3885_v12, %v1430_v22  ;;  %vm1459_vm0 = vweird.f32 %v3885_v12  ;;  %v1500_v22 = vmul.f32 %v4924_v34, %v1472_v37 }
 0x363   : > { %v1431_v47 = vadd.f32 1e-05, %v1419_v28  ;;  %vm1460_vm4 = vmor %vm1458_vm2, %vm1459_vm0 }
 0x364   : > { %v1445_v23 = vmul.f32 0.5, %v1444_v13  ;;  %v1454_v39 = vmul.f32 %v3885_v12, %v1453_v21  ;;  %v1521_v5 = vpop.permute.xlu2 %1520  ;;  %v1528_v36 = vadd.f32 %v4929_v62, %v1500_v22  ;;  %v1529_v21 = vadd.f32 %v4929_v62, %v1501_v27  ;;  %v3680_v62 = vld [vmem:[%s7305_s3 + $0x20] sm:$0xff] }
 0x365   : > { %3886 = vrsqrt.f32 %v1431_v47  ;;  %vm1468_vm10 = vweird.f32 %v1431_v47  ;;  %v1516_v41 = vpop.permute.xlu0 %1515 }
 0x366   : > { %v1455_v45 = vmul.f32 0.5, %v1454_v39  ;;  %v1446_v46 = vsub.f32 1.5, %v1445_v23  ;;  %v1536_v39 = vmax.f32 %v1528_v36, 0.0  ;;  %v1537_v34 = vmax.f32 %v1529_v21, 0.0 }
 0x368   : > { %v1456_v49 = vsub.f32 1.5, %v1455_v45  ;;  %v1447_v55 = vmul.f32 %v3883_v7, %v1446_v46 }
 0x36a   : > { %v1457_v1 = vmul.f32 %v3885_v12, %v1456_v49  ;;  %v1451_v9 = vsel %vm1450_vm7, %v3883_v7, %v1447_v55  ;;  %v3681_v49 = vld [vmem:[%s7305_s3 + $0x28] sm:$0xff]  ;;  %v3679_v55 = vld [vmem:[%s7305_s3 + $0x18] sm:$0xff] }
 0x36b   : > { %v3887_v32 = vpop.eup %3886  ;;  %v1474_v17 = vmul.f32 %v1451_v9, %v1422_v10  ;;  %v1475_v31 = vmul.f32 %v1451_v9, %v1423_v61 }
 0x36c   : > { %v1463_v60 = vmul.f32 %v3887_v32, %v1431_v47  ;;  %v1461_v52 = vsel %vm1460_vm4, %v3885_v12, %v1457_v1  ;;  %vm1469_vm9 = vweird.f32 %v3887_v32  ;;  %v3678_v1 = vld [vmem:[%s7305_s3 + $0x10] sm:$0xff]  ;;  %v5087_v22 = vpop.permute.xlu2 %3198 }
 0x36d   : > { %v1476_v43 = vmul.f32 %v1461_v52, %v1424_v58  ;;  %v1477_v16 = vmul.f32 %v1461_v52, %v1425_v25  ;;  %vm1470_vm11 = vmor %vm1468_vm10, %vm1469_vm9  ;;  %v1502_v57 = vmul.f32 %v4913_v15, %v1474_v17  ;;  %v1503_v4 = vmul.f32 %v4913_v15, %v1475_v31  ;;  %7461 = vst [vmem:[#allocation10_spill] sm:$0xff] %v5087_v22 }
 0x36e   : > { %v1464_v48 = vmul.f32 %v3887_v32, %v1463_v60  ;;  %v3682_v60 = vld [vmem:[%s7305_s3 + $0x30] sm:$0xff] }
 0x36f   : > { %v1504_v38 = vmul.f32 %v4931_v42, %v1476_v43  ;;  %v1505_v30 = vmul.f32 %v4931_v42, %v1477_v16  ;;  %v1530_v7 = vadd.f32 %v1516_v41, %v1502_v57  ;;  %v1531_v40 = vadd.f32 %v1516_v41, %v1503_v4 }
 0x370   : > { %v1465_v51 = vmul.f32 0.5, %v1464_v48 }
 0x371   : > { %v1532_v14 = vadd.f32 %v1521_v5, %v1504_v38  ;;  %v1533_v20 = vadd.f32 %v1521_v5, %v1505_v30  ;;  %v1538_v47 = vmax.f32 %v1530_v7, 0.0 }
 0x372   : > { %v1466_v54 = vsub.f32 1.5, %v1465_v51 }
 0x373   : > { %v1540_v28 = vmax.f32 %v1532_v14, 0.0  ;;  %v1541_v15 = vmax.f32 %v1533_v20, 0.0  ;;  %v1560_v45 = vpack.c.bf16 %v1538_v47, %v1536_v39 }
 0x374   : > { %v1467_v24 = vmul.f32 %v3887_v32, %v1466_v54  ;;  %v1526_v42 = vpop.permute.xlu1 %1525  ;;  %v5107_v36 = vpop.permute.xlu2 %3213 }
 0x375   : > { %7467 = vst [vmem:[#allocation16_spill] sm:$0xff] %v5107_v36 }
 0x376   : > { %v1471_v19 = vsel %vm1470_vm11, %v3887_v32, %v1467_v24  ;;  %v3677_v32 = vld [vmem:[%s7305_s3 + $0x8] sm:$0xff] }
 0x377   : > { %v1478_v53 = vmul.f32 %v1471_v19, %v1426_v63  ;;  %v1479_v56 = vmul.f32 %v1471_v19, %v1427_v44 }
 0x379   : > { %v1506_v0 = vmul.f32 %v4942_v18, %v1478_v53  ;;  %v1507_v35 = vmul.f32 %v4942_v18, %v1479_v56  ;;  %v1539_v18 = vmax.f32 %v1531_v40, 0.0  ;;  %v5081_v53 = vpop.permute.xlu0 %3203 }
 0x37b   : > { %v1534_v6 = vadd.f32 %v1526_v42, %v1506_v0  ;;  %v1535_v3 = vadd.f32 %v1526_v42, %v1507_v35  ;;  %v1561_v46 = vpack.c.bf16 %v1539_v18, %v1537_v34 }
 0x37c   : > { %v5119_v47 = vpop.permute.xlu1 %3208 }
 0x37d   : > { %v1542_v12 = vmax.f32 %v1534_v6, 0.0  ;;  %v1543_v13 = vmax.f32 %v1535_v3, 0.0  ;;  %7470 = vst [vmem:[#allocation19_spill] sm:$0xff] %v5119_v47 }
 0x37f   : > { %v1562_v23 = vpack.c.bf16 %v1542_v12, %v1540_v28  ;;  %v1563_v29 = vpack.c.bf16 %v1543_v13, %v1541_v15 }
 0x381   : > { %1634 = vmatpush.bf16.msra.mxu0 %v1562_v23  ;;  %3684 = vmatpush.bf16.msra.mxu2 %v1562_v23  ;;  %v5105_v3 = vpop.permute.xlu0 %3218 }
 0x382   : > { %1683 = vmatpush.bf16.msra.mxu1 %v1563_v29  ;;  %3686 = vmatpush.bf16.msra.mxu3 %v1563_v29  ;;  %7466 = vst [vmem:[#allocation15_spill] sm:$0xff] %v5105_v3 }
 0x385   : > { %1635 = vmatpush.bf16.msra.mxu0 %v1560_v45  ;;  %3685 = vmatpush.bf16.msra.mxu2 %v1560_v45 }
 0x386   : > { %1684 = vmatpush.bf16.msra.mxu1 %v1561_v46  ;;  %3687 = vmatpush.bf16.msra.mxu3 %v1561_v46 }
 0x388   : > { %3648 = vmatmul.msk.bf16.vlgmr.msra.gmra.mxu0 %vm1243_vm15, %v3676_v8  ;;  %3652 = vmatmul.msk.bf16.vlgmr.msra.gmra.mxu2 %vm1243_vm15, %v3680_v62 }
 0x389   : > { %3656 = vmatmul.msk.bf16.vlgmr.msra.gmra.mxu1 %vm1243_vm15, %v3676_v8  ;;  %3660 = vmatmul.msk.bf16.vlgmr.msra.gmra.mxu3 %vm1243_vm15, %v3680_v62  ;;  %v5125_v39 = vpop.permute.xlu0 %3233  ;;  %v5133_v8 = vpop.permute.xlu2 %3228 }
 0x38a   : > { %7471 = vst [vmem:[#allocation20_spill] sm:$0xff] %v5125_v39 }
 0x38b   : > { %7474 = vst [vmem:[#allocation23_spill] sm:$0xff] %v5133_v8 }
 0x398   : > { %3653 = vmatmul.msk.bf16.gmra.mxu2 %vm1243_vm15, %v3681_v49  ;;  %3649 = vmatmul.msk.bf16.gmra.mxu0 %vm1243_vm15, %v3677_v32 }
 0x399   : > { %3661 = vmatmul.msk.bf16.gmra.mxu3 %vm1243_vm15, %v3681_v49  ;;  %3657 = vmatmul.msk.bf16.gmra.mxu1 %vm1243_vm15, %v3677_v32 }
 0x3a8   : > { %3650 = vmatmul.msk.bf16.gmra.mxu0 %vm1243_vm15, %v3678_v1  ;;  %3654 = vmatmul.msk.bf16.gmra.mxu2 %vm1243_vm15, %v3682_v60 }
 0x3a9   : > { %3658 = vmatmul.msk.bf16.gmra.mxu1 %vm1243_vm15, %v3678_v1  ;;  %3662 = vmatmul.msk.bf16.gmra.mxu3 %vm1243_vm15, %v3682_v60 }
 0x3b8   : > { %3651 = vmatmul.msk.bf16.gmra.mxu0 %vm1243_vm15, %v3679_v55  ;;  %3655 = vmatmul.msk.bf16.gmra.mxu2 %vm1243_vm15, %v3683_v33 }
 0x3b9   : > { %3659 = vmatmul.msk.bf16.gmra.mxu1 %vm1243_vm15, %v3679_v55  ;;  %3663 = vmatmul.msk.bf16.gmra.mxu3 %vm1243_vm15, %v3683_v33  ;;  %v5145_v33 = vpop.permute.xlu1 %3223 }
 0x3ba   : > { %7477 = vst [vmem:[#allocation26_spill] sm:$0xff] %v5145_v33 }
 0x405   : > { %v5037_v48 = vpop.f32.mrf.mxu0 }
 0x406   : > { %7453 = vst [vmem:[#allocation2_spill] sm:$0xff] %v5037_v48  ;;  %v5039_v52 = vpop.f32.mrf.mxu1  ;;  %v1806_v58 = vmul.f32 %v5037_v48, %v5037_v48 }
 0x407   : > { %7454 = vst [vmem:[#allocation3_spill] sm:$0xff] %v5039_v52  ;;  %v1758_v25 = vadd.f32 %v5039_v52, %v5037_v48  ;;  %v1807_v9 = vmul.f32 %v5039_v52, %v5039_v52 }
 0x409   : > { %1759 = vadd.xlane.f32.xlu0 %v1758_v25  ;;  %v1838_v51 = vadd.f32 %v1807_v9, %v1806_v58 }
 0x40b   : > { %1839 = vadd.xlane.f32.xlu2 %v1838_v51  ;;  %v5047_v26 = vpop.f32.mrf.mxu2 }
 0x40c   : > { %7455 = vst [vmem:[#allocation4_spill] sm:$0xff] %v5047_v26  ;;  %v5049_v10 = vpop.f32.mrf.mxu3  ;;  %v1822_v43 = vmul.f32 %v5047_v26, %v5047_v26 }
 0x40d   : > { %7456 = vst [vmem:[#allocation5_spill] sm:$0xff] %v5049_v10  ;;  %v1782_v16 = vadd.f32 %v5049_v10, %v5047_v26  ;;  %v1823_v50 = vmul.f32 %v5049_v10, %v5049_v10  ;;  %v5057_v61 = vpop.f32.mrf.mxu0 }
 0x40e   : > { %v5059_v54 = vpop.f32.mrf.mxu1  ;;  %v1808_v31 = vmul.f32 %v5057_v61, %v5057_v61 }
 0x40f   : > { %1783 = vadd.xlane.f32.xlu1 %v1782_v16  ;;  %v1862_v59 = vadd.f32 %v1823_v50, %v1822_v43  ;;  %v1761_v17 = vadd.f32 %v5059_v54, %v5057_v61  ;;  %v1809_v24 = vmul.f32 %v5059_v54, %v5059_v54  ;;  %v5153_v43 = vpop.permute.xlu0 %3248 }
 0x410   : > { %7478 = vst [vmem:[#allocation27_spill] sm:$0xff] %v5153_v43 }
 0x411   : > { %1863 = vadd.xlane.f32.xlu0 %v1862_v59  ;;  %v1841_v44 = vadd.f32 %v1809_v24, %v1808_v31 }
 0x413   : > { %1762 = vadd.xlane.f32.xlu2 %v1761_v17  ;;  %v5067_v37 = vpop.f32.mrf.mxu2  ;;  %v5159_v17 = vpop.permute.xlu2 %3243 }
 0x414   : > { %7457 = vst [vmem:[#allocation6_spill] sm:$0xff] %v5067_v37  ;;  %v5069_v63 = vpop.f32.mrf.mxu3  ;;  %v1824_v38 = vmul.f32 %v5067_v37, %v5067_v37 }
 0x415   : > { %7458 = vst [vmem:[#allocation7_spill] sm:$0xff] %v5069_v63  ;;  %v1825_v30 = vmul.f32 %v5069_v63, %v5069_v63  ;;  %v1785_v19 = vadd.f32 %v5069_v63, %v5067_v37  ;;  %v5077_v11 = vpop.f32.mrf.mxu0 }
 0x416   : > { %7459 = vst [vmem:[#allocation8_spill] sm:$0xff] %v5077_v11  ;;  %v5079_v57 = vpop.f32.mrf.mxu1  ;;  %v1810_v5 = vmul.f32 %v5077_v11, %v5077_v11 }
 0x417   : > { %1842 = vadd.xlane.f32.xlu1 %v1841_v44  ;;  %7460 = vst [vmem:[#allocation9_spill] sm:$0xff] %v5079_v57  ;;  %v1865_v56 = vadd.f32 %v1825_v30, %v1824_v38  ;;  %v1811_v4 = vmul.f32 %v5079_v57, %v5079_v57  ;;  %v1764_v14 = vadd.f32 %v5079_v57, %v5077_v11  ;;  %v5165_v44 = vpop.permute.xlu1 %3238 }
 0x418   : > { %7481 = vst [vmem:[#allocation30_spill] sm:$0xff] %v5159_v17 }
 0x419   : > { %1786 = vadd.xlane.f32.xlu0 %v1785_v19  ;;  %v1844_v20 = vadd.f32 %v1811_v4, %v1810_v5  ;;  %7482 = vst [vmem:[#allocation31_spill] sm:$0xff] %v5165_v44  ;;  %v5173_v5 = vpop.permute.xlu0 %3263 }
 0x41a   : > { %7485 = vst [vmem:[#allocation34_spill] sm:$0xff] %v5173_v5 }
 0x41b   : > { %1866 = vadd.xlane.f32.xlu2 %v1865_v56  ;;  %v5091_v0 = vpop.f32.mrf.mxu2 }
 0x41c   : > { %7462 = vst [vmem:[#allocation11_spill] sm:$0xff] %v5091_v0  ;;  %v5093_v35 = vpop.f32.mrf.mxu3  ;;  %v1826_v42 = vmul.f32 %v5091_v0, %v5091_v0 }
 0x41d   : > { %7463 = vst [vmem:[#allocation12_spill] sm:$0xff] %v5093_v35  ;;  %v1788_v41 = vadd.f32 %v5093_v35, %v5091_v0  ;;  %v1827_v27 = vmul.f32 %v5093_v35, %v5093_v35  ;;  %v5101_v7 = vpop.f32.mrf.mxu0 }
 0x41e   : > { %7464 = vst [vmem:[#allocation13_spill] sm:$0xff] %v5101_v7  ;;  %v5103_v6 = vpop.f32.mrf.mxu1  ;;  %v1812_v28 = vmul.f32 %v5101_v7, %v5101_v7 }
 0x41f   : > { %1765 = vadd.xlane.f32.xlu1 %v1764_v14  ;;  %7465 = vst [vmem:[#allocation14_spill] sm:$0xff] %v5103_v6  ;;  %v1868_v40 = vadd.f32 %v1827_v27, %v1826_v42  ;;  %v1813_v15 = vmul.f32 %v5103_v6, %v5103_v6  ;;  %v1767_v12 = vadd.f32 %v5103_v6, %v5101_v7  ;;  %v5185_v27 = vpop.permute.xlu2 %3258 }
 0x420   : > { %7488 = vst [vmem:[#allocation37_spill] sm:$0xff] %v5185_v27 }
 0x421   : > { %1845 = vadd.xlane.f32.xlu0 %v1844_v20  ;;  %v1847_v23 = vadd.f32 %v1813_v15, %v1812_v28 }
 0x423   : > { %1789 = vadd.xlane.f32.xlu2 %v1788_v41  ;;  %v5115_v13 = vpop.f32.mrf.mxu2 }
 0x424   : > { %7468 = vst [vmem:[#allocation17_spill] sm:$0xff] %v5115_v13  ;;  %v5117_v21 = vpop.f32.mrf.mxu3  ;;  %v1828_v29 = vmul.f32 %v5115_v13, %v5115_v13 }
 0x425   : > { %7469 = vst [vmem:[#allocation18_spill] sm:$0xff] %v5117_v21  ;;  %v1829_v18 = vmul.f32 %v5117_v21, %v5117_v21  ;;  %v1791_v34 = vadd.f32 %v5117_v21, %v5115_v13  ;;  %v5129_v45 = vpop.f32.mrf.mxu0 }
 0x426   : > { %7472 = vst [vmem:[#allocation21_spill] sm:$0xff] %v5129_v45  ;;  %v5131_v46 = vpop.f32.mrf.mxu1  ;;  %v1814_v32 = vmul.f32 %v5129_v45, %v5129_v45 }
 0x427   : > { %1869 = vadd.xlane.f32.xlu1 %v1868_v40  ;;  %7473 = vst [vmem:[#allocation22_spill] sm:$0xff] %v5131_v46  ;;  %v1871_v62 = vadd.f32 %v1829_v18, %v1828_v29  ;;  %v1770_v49 = vadd.f32 %v5131_v46, %v5129_v45  ;;  %v1815_v1 = vmul.f32 %v5131_v46, %v5131_v46 }
 0x429   : > { %1768 = vadd.xlane.f32.xlu0 %v1767_v12  ;;  %v1850_v58 = vadd.f32 %v1815_v1, %v1814_v32  ;;  %v5205_v1 = vpop.permute.xlu0 %3310 }
 0x42a   : > { %7492 = vst [vmem:[#allocation41_spill] sm:$0xff] %v5205_v1 }
 0x42b   : > { %1848 = vadd.xlane.f32.xlu2 %v1847_v23  ;;  %v5141_v60 = vpop.f32.mrf.mxu2  ;;  %v5193_v23 = vpop.permute.xlu1 %3253 }
 0x42c   : > { %7475 = vst [vmem:[#allocation24_spill] sm:$0xff] %v5141_v60  ;;  %v5143_v55 = vpop.f32.mrf.mxu3  ;;  %v1830_v25 = vmul.f32 %v5141_v60, %v5141_v60 }
 0x42d   : > { %7476 = vst [vmem:[#allocation25_spill] sm:$0xff] %v5143_v55  ;;  %v1831_v9 = vmul.f32 %v5143_v55, %v5143_v55  ;;  %v1794_v51 = vadd.f32 %v5143_v55, %v5141_v60  ;;  %v5155_v50 = vpop.f32.mrf.mxu0 }
 0x42e   : > { %7479 = vst [vmem:[#allocation28_spill] sm:$0xff] %v5155_v50  ;;  %v5157_v59 = vpop.f32.mrf.mxu1  ;;  %v1816_v31 = vmul.f32 %v5155_v50, %v5155_v50 }
 0x42f   : > { %1792 = vadd.xlane.f32.xlu1 %v1791_v34  ;;  %v1874_v16 = vadd.f32 %v1831_v9, %v1830_v25  ;;  %7480 = vst [vmem:[#allocation29_spill] sm:$0xff] %v5157_v59  ;;  %v1817_v24 = vmul.f32 %v5157_v59, %v5157_v59  ;;  %v1773_v38 = vadd.f32 %v5157_v59, %v5155_v50 }
 0x430   : > { %7489 = vst [vmem:[#allocation38_spill] sm:$0xff] %v5193_v23 }
 0x431   : > { %1872 = vadd.xlane.f32.xlu0 %v1871_v62  ;;  %v1853_v56 = vadd.f32 %v1817_v24, %v1816_v31 }
 0x433   : > { %1771 = vadd.xlane.f32.xlu2 %v1770_v49  ;;  %v5169_v30 = vpop.f32.mrf.mxu2 }
 0x434   : > { %7483 = vst [vmem:[#allocation32_spill] sm:$0xff] %v5169_v30  ;;  %v5171_v19 = vpop.f32.mrf.mxu3  ;;  %v1832_v14 = vmul.f32 %v5169_v30, %v5169_v30 }
 0x435   : > { %7484 = vst [vmem:[#allocation33_spill] sm:$0xff] %v5171_v19  ;;  %v1797_v4 = vadd.f32 %v5171_v19, %v5169_v30  ;;  %v1833_v20 = vmul.f32 %v5171_v19, %v5171_v19  ;;  %v5181_v41 = vpop.f32.mrf.mxu0 }
 0x436   : > { %7486 = vst [vmem:[#allocation35_spill] sm:$0xff] %v5181_v41  ;;  %v5183_v42 = vpop.f32.mrf.mxu1  ;;  %v1818_v40 = vmul.f32 %v5181_v41, %v5181_v41 }
 0x437   : > { %1851 = vadd.xlane.f32.xlu1 %v1850_v58  ;;  %7487 = vst [vmem:[#allocation36_spill] sm:$0xff] %v5183_v42  ;;  %v1819_v28 = vmul.f32 %v5183_v42, %v5183_v42  ;;  %v1877_v15 = vadd.f32 %v1833_v20, %v1832_v14  ;;  %v1776_v12 = vadd.f32 %v5183_v42, %v5181_v41  ;;  %v5207_v58 = vpop.permute.xlu2 %3273 }
 0x438   : > { %7493 = vst [vmem:[#allocation42_spill] sm:$0xff] %v5207_v58 }
 0x439   : > { %1795 = vadd.xlane.f32.xlu0 %v1794_v51  ;;  %v1856_v29 = vadd.f32 %v1819_v28, %v1818_v40  ;;  %v5229_v28 = vpop.permute.xlu0 %3325 }
 0x43a   : > { %7499 = vst [vmem:[#allocation48_spill] sm:$0xff] %v5229_v28 }
 0x43b   : > { %1875 = vadd.xlane.f32.xlu2 %v1874_v16  ;;  %v5195_v18 = vpop.f32.mrf.mxu2  ;;  %v5213_v16 = vpop.permute.xlu1 %3268 }
 0x43c   : > { %7490 = vst [vmem:[#allocation39_spill] sm:$0xff] %v5195_v18  ;;  %v5197_v34 = vpop.f32.mrf.mxu3  ;;  %v1834_v62 = vmul.f32 %v5195_v18, %v5195_v18 }
 0x43d   : > { %7491 = vst [vmem:[#allocation40_spill] sm:$0xff] %v5197_v34  ;;  %v1835_v49 = vmul.f32 %v5197_v34, %v5197_v34  ;;  %v1800_v32 = vadd.f32 %v5197_v34, %v5195_v18  ;;  %v5209_v9 = vpop.f32.mrf.mxu0 }
 0x43e   : > { %7494 = vst [vmem:[#allocation43_spill] sm:$0xff] %v5209_v9  ;;  %v5211_v51 = vpop.f32.mrf.mxu1  ;;  %v1820_v31 = vmul.f32 %v5209_v9, %v5209_v9 }
 0x43f   : > { %1774 = vadd.xlane.f32.xlu1 %v1773_v38  ;;  %v1880_v25 = vadd.f32 %v1835_v49, %v1834_v62  ;;  %7495 = vst [vmem:[#allocation44_spill] sm:$0xff] %v5211_v51  ;;  %v1821_v24 = vmul.f32 %v5211_v51, %v5211_v51  ;;  %v1779_v38 = vadd.f32 %v5211_v51, %v5209_v9 }
 0x440   : > { %7496 = vst [vmem:[#allocation45_spill] sm:$0xff] %v5213_v16 }
 0x441   : > { %1854 = vadd.xlane.f32.xlu0 %v1853_v56  ;;  %v1859_v40 = vadd.f32 %v1821_v24, %v1820_v31  ;;  %v5237_v49 = vpop.permute.xlu0 %3340 }
 0x442   : > { %7502 = vst [vmem:[#allocation51_spill] sm:$0xff] %v5237_v49 }
 0x443   : > { %1798 = vadd.xlane.f32.xlu2 %v1797_v4  ;;  %v5221_v56 = vpop.f32.mrf.mxu2  ;;  %v5235_v62 = vpop.permute.xlu1 %3315 }
 0x444   : > { %7497 = vst [vmem:[#allocation46_spill] sm:$0xff] %v5221_v56  ;;  %v5223_v4 = vpop.f32.mrf.mxu3  ;;  %v1836_v14 = vmul.f32 %v5221_v56, %v5221_v56 }
 0x445   : > { %7498 = vst [vmem:[#allocation47_spill] sm:$0xff] %v5223_v4  ;;  %v1837_v20 = vmul.f32 %v5223_v4, %v5223_v4 }
 0x446   : > { %7501 = vst [vmem:[#allocation50_spill] sm:$0xff] %v5235_v62 }
 0x447   : > { %1878 = vadd.xlane.f32.xlu1 %v1877_v15  ;;  %v1803_v15 = vadd.f32 %v5223_v4, %v5221_v56 }
 0x449   : > { %1777 = vadd.xlane.f32.xlu0 %v1776_v12  ;;  %v5233_v12 = vpop.permute.xlu2 %3320  ;;  %v5243_v31 = vpop.permute.xlu0 %3355 }
 0x44a   : > { %7500 = vst [vmem:[#allocation49_spill] sm:$0xff] %v5233_v12 }
 0x44b   : > { %1857 = vadd.xlane.f32.xlu2 %v1856_v29  ;;  %v1883_v29 = vadd.f32 %v1837_v20, %v1836_v14  ;;  %7505 = vst [vmem:[#allocation54_spill] sm:$0xff] %v5243_v31 }
 0x44f   : > { %1801 = vadd.xlane.f32.xlu1 %v1800_v32 }
 0x451   : > { %1881 = vadd.xlane.f32.xlu0 %v1880_v25  ;;  %v5239_v32 = vpop.permute.xlu2 %3335  ;;  %v5241_v25 = vpop.permute.xlu1 %3330 }
 0x452   : > { %7503 = vst [vmem:[#allocation52_spill] sm:$0xff] %v5239_v32 }
 0x453   : > { %1780 = vadd.xlane.f32.xlu2 %v1779_v38  ;;  %7504 = vst [vmem:[#allocation53_spill] sm:$0xff] %v5241_v25 }
 0x457   : > { %1860 = vadd.xlane.f32.xlu1 %v1859_v40  ;;  %v5249_v40 = vpop.permute.xlu0 %3370 }
 0x458   : > { %7508 = vst [vmem:[#allocation57_spill] sm:$0xff] %v5249_v40 }
 0x459   : > { %1804 = vadd.xlane.f32.xlu0 %v1803_v15  ;;  %v5245_v24 = vpop.permute.xlu2 %3350  ;;  %v5247_v38 = vpop.permute.xlu1 %3345 }
 0x45a   : > { %7506 = vst [vmem:[#allocation55_spill] sm:$0xff] %v5245_v24 }
 0x45b   : > { %1884 = vadd.xlane.f32.xlu2 %v1883_v29  ;;  %7507 = vst [vmem:[#allocation56_spill] sm:$0xff] %v5247_v38  ;;  %v7511_v29 = vlaneseq }
 0x45d   : > { %v5260_v5 = vshrl.u32 %v7511_v29, 7 }
 0x45f   : > { %v2035_v19 = vadd.s32 8, %v5260_v5  ;;  %v2043_v4 = vadd.s32 72, %v5260_v5  ;;  %v5269_v56 = vadd.s32 16, %v5260_v5  ;;  %vm1904_vm12 = vcmp.lt.s32.totalorder %v5260_v5, 1 }
 0x460   : > { %vm1953_vm14 = vcmp.lt.s32.totalorder %v5260_v5, 2  ;;  %vm2002_vm13 = vcmp.lt.s32.totalorder %v5260_v5, 3  ;;  %v5309_v42 = vadd.s32 80, %v5260_v5  ;;  %vm2290_vm5 = vcmp.lt.s32.totalorder %v5260_v5, 7 }
 0x461   : > { %v5251_v2 = vpop.permute.xlu2 %3365  ;;  %v5253_v14 = vpop.permute.xlu1 %3360  ;;  %v2061_v16 = vand.u32 3, %v2035_v19  ;;  %v2117_v52 = vand.u32 3, %v2043_v4  ;;  %v7534_v23 = vand.u32 3, %v5269_v56  ;;  %vm2339_vm7 = vcmp.lt.s32.totalorder %v5260_v5, 6 }
 0x462   : > { %7509 = vst [vmem:[#allocation58_spill] sm:$0xff] %v5251_v2  ;;  %vm2388_vm8 = vcmp.lt.s32.totalorder %v5260_v5, 5 }
 0x463   : > { %7510 = vst [vmem:[#allocation59_spill] sm:$0xff] %v5253_v14  ;;  %vm5287_vm15 = vcmp.eq.s32.totalorder %v2061_v16, 3  ;;  %vm5358_vm0 = vcmp.eq.s32.totalorder %v2117_v52, 3  ;;  %vm5416_vm1 = vcmp.eq.s32.totalorder %v7534_v23, 3 }
 0x47c   : > { %v5255_v20 = vpop.xlane.xlu0 %1759 }
 0x47d   : > { %v7332_v22 = vrot.slane %v5255_v20, 7  ;;  %v7336_v48 = vrot.slane %v5255_v20, 6 }
 0x47e   : > { %v5257_v15 = vpop.xlane.xlu2 %1839 }
 0x47f   : > { %v7516_v49 = vrot.slane %v5257_v15, 7  ;;  %v7526_v55 = vrot.slane %v5257_v15, 5 }
 0x482   : > { %v5262_v58 = vpop.xlane.xlu1 %1783 }
 0x484   : > { %v5265_v30 = vpop.xlane.xlu0 %1863 }
 0x486   : > { %v5272_v1 = vpop.xlane.xlu2 %1762 }
 0x487   : > { %v1887_v29 = vrot.slane %v5272_v1, 7  ;;  %v7514_v24 = vrot.slane %v5272_v1, 6  ;;  %v7520_v40 = vrot.slane %v5272_v1, 5 }
 0x489   : > { %v1919_v18 = vsel %vm1904_vm12, %v7332_v22, %v1887_v29  ;;  %v1968_v16 = vsel %vm1953_vm14, %v7336_v48, %v7514_v24  ;;  %v7521_v48 = vrot.slane %v5255_v20, 5  ;;  %v7522_v24 = vrot.slane %v5265_v30, 7 }
 0x48a   : > { %v1922_v34 = vadd.f32 %v1919_v18, %v5272_v1  ;;  %v5292_v44 = vpop.xlane.xlu1 %1842 }
 0x48b   : > { %v7515_v19 = vrot.slane %v5292_v44, 7  ;;  %v2017_v32 = vsel %vm2002_vm13, %v7521_v48, %v7520_v40  ;;  %v7528_v48 = vrot.slane %v5265_v30, 6  ;;  %v7539_v8 = vrot.slane %v5292_v44, 7 }
 0x48c   : > { %v5306_v41 = vpop.xlane.xlu0 %1786  ;;  %v1971_v22 = vadd.f32 %v1968_v16, %v1922_v34  ;;  %v7517_v34 = vrot.slane %v5292_v44, 6  ;;  %v7518_v16 = vrot.slane %v5257_v15, 6 }
 0x48d   : > { %v2451_v10 = vsel %vm1904_vm12, %v7516_v49, %v7515_v19  ;;  %v7342_v26 = vrot.slane %v5306_v41, 7  ;;  %v7519_v49 = vrot.slane %v5262_v58, 7 }
 0x48e   : > { %v2454_v18 = vadd.f32 %v2451_v10, %v5292_v44  ;;  %v5323_v27 = vpop.xlane.xlu2 %1866  ;;  %v2499_v4 = vsel %vm1953_vm14, %v7518_v16, %v7517_v34  ;;  %v1946_v34 = vrot.slane %v5306_v41, 6  ;;  %v5347_v16 = vadd.s32 24, %v5260_v5 }
 0x48f   : > { %v1911_v19 = vsel %vm1904_vm12, %v7519_v49, %v7342_v26  ;;  %v7344_v10 = vrot.slane %v5323_v27, 7  ;;  %v2020_v49 = vadd.f32 %v2017_v32, %v1971_v22  ;;  %v2124_v32 = vand.u32 3, %v5309_v42 }
 0x490   : > { %v2502_v33 = vadd.f32 %v2499_v4, %v2454_v18  ;;  %v1930_v26 = vadd.f32 %v1911_v19, %v5306_v41  ;;  %v7525_v19 = vrot.slane %v5292_v44, 5  ;;  %v7529_v42 = vrot.slane %v5262_v58, 6 }
 0x491   : > { %v2443_v60 = vsel %vm1904_vm12, %v7522_v24, %v7344_v10  ;;  %v7527_v10 = vrot.slane %v5323_v27, 6  ;;  %vm5464_vm2 = vcmp.eq.s32.totalorder %v2124_v32, 3 }
 0x492   : > { %v2462_v4 = vadd.f32 %v2443_v60, %v5323_v27  ;;  %v5364_v22 = vpop.xlane.xlu1 %1765  ;;  %v2547_v24 = vsel %vm2002_vm13, %v7526_v55, %v7525_v19  ;;  %v1960_v50 = vsel %vm1953_vm14, %v7529_v42, %v1946_v34  ;;  %v5390_v19 = vsel %vm5287_vm15, %v2020_v49, 0.0 }
 0x493   : > { %v2491_v60 = vsel %vm1953_vm14, %v7528_v48, %v7527_v10  ;;  %v1888_v18 = vrot.slane %v5364_v22, 7  ;;  %v2550_v59 = vadd.f32 %v2547_v24, %v2502_v33  ;;  %v1979_v52 = vadd.f32 %v1960_v50, %v1930_v26 }
 0x494   : > { %v2510_v2 = vadd.f32 %v2491_v60, %v2462_v4  ;;  %v5385_v38 = vpop.xlane.xlu0 %1845  ;;  %v7530_v48 = vrot.slane %v5323_v27, 5  ;;  %v7531_v24 = vrot.slane %v5265_v30, 5  ;;  %v5406_v26 = vadd.s32 88, %v5260_v5 }
 0x495   : > { %v1918_v10 = vsel %vm1904_vm12, %v1887_v29, %v1888_v18  ;;  %v7532_v50 = vrot.slane %v5306_v41, 5  ;;  %v7533_v29 = vrot.slane %v5262_v58, 5  ;;  %v5424_v42 = vsel %vm5287_vm15, %v2550_v59, 0.0 }
 0x496   : > { %v2539_v4 = vsel %vm2002_vm13, %v7531_v24, %v7530_v48  ;;  %v1923_v60 = vadd.f32 %v1918_v10, %v5364_v22  ;;  %v5403_v55 = vpop.xlane.xlu2 %1789  ;;  %v7353_v10 = vrot.slane %v5385_v38, 7  ;;  %v7537_v23 = vrot.slane %v5364_v22, 6 }
 0x497   : > { %v2009_v49 = vsel %vm2002_vm13, %v7533_v29, %v7532_v50  ;;  %v2558_v33 = vadd.f32 %v2539_v4, %v2510_v2  ;;  %v5429_v2 = vadd.s32 32, %v5260_v5  ;;  %v7538_v4 = vrot.slane %v5272_v1, 6 }
 0x498   : > { %v2028_v56 = vadd.f32 %v2009_v49, %v1979_v52  ;;  %v2450_v59 = vsel %vm1904_vm12, %v7539_v8, %v7353_v10  ;;  %v7540_v28 = vrot.slane %v5364_v22, 5  ;;  %v7541_v52 = vrot.slane %v5272_v1, 5 }
 0x499   : > { %v1967_v50 = vsel %vm1953_vm14, %v7538_v4, %v7537_v23  ;;  %v2455_v24 = vadd.f32 %v2450_v59, %v5385_v38  ;;  %v5456_v51 = vsel %vm5358_vm0, %v2558_v33, 0.0  ;;  %v7542_v8 = vrot.slane %v5385_v38, 6 }
 0x49a   : > { %v1972_v39 = vadd.f32 %v1967_v50, %v1923_v60  ;;  %v2016_v49 = vsel %vm2002_vm13, %v7541_v52, %v7540_v28  ;;  %v5451_v23 = vpop.xlane.xlu1 %1869  ;;  %v7543_v60 = vrot.slane %v5292_v44, 6  ;;  %v7546_v28 = vrot.slane %v5403_v55, 7 }
 0x49b   : > { %v7547_v59 = vrot.slane %v5306_v41, 7  ;;  %v2431_v33 = vrot.slane %v5451_v23, 7  ;;  %v7548_v10 = vrot.slane %v5385_v38, 5  ;;  %v7549_v29 = vrot.slane %v5292_v44, 5 }
 0x49c   : > { %v2498_v1 = vsel %vm1953_vm14, %v7543_v60, %v7542_v8  ;;  %v5483_v9 = vpop.xlane.xlu0 %1768  ;;  %v7550_v21 = vrot.slane %v5403_v55, 6  ;;  %v2527_v6 = vrot.slane %v5451_v23, 5 }
 0x49d   : > { %v1910_v52 = vsel %vm1904_vm12, %v7547_v59, %v7546_v28  ;;  %v2503_v4 = vadd.f32 %v2498_v1, %v2455_v24  ;;  %v2546_v32 = vsel %vm2002_vm13, %v7549_v29, %v7548_v10  ;;  %v7551_v1 = vrot.slane %v5323_v27, 7 }
 0x49e   : > { %v1931_v8 = vadd.f32 %v1910_v52, %v5403_v55  ;;  %v1959_v28 = vsel %vm1953_vm14, %v1946_v34, %v7550_v21  ;;  %v1889_v10 = vrot.slane %v5483_v9, 7  ;;  %v2021_v29 = vadd.f32 %v2016_v49, %v1972_v39  ;;  %v5496_v13 = vpop.xlane.xlu2 %1848 }
 0x49f   : > { %v2442_v44 = vsel %vm1904_vm12, %v7551_v1, %v2431_v33  ;;  %v2551_v59 = vadd.f32 %v2546_v32, %v2503_v4  ;;  %v7552_v34 = vrot.slane %v5451_v23, 6  ;;  %v7553_v24 = vrot.slane %v5323_v27, 6 }
 0x4a0   : > { %v1980_v52 = vadd.f32 %v1959_v28, %v1931_v8  ;;  %v2463_v60 = vadd.f32 %v2442_v44, %v5451_v23  ;;  %v5510_v49 = vsel %vm5358_vm0, %v2028_v56, 0.0  ;;  %v1917_v32 = vsel %vm1904_vm12, %v1888_v18, %v1889_v10 }
 0x4a1   : > { %v2490_v1 = vsel %vm1953_vm14, %v7553_v24, %v7552_v34  ;;  %v5518_v44 = vsel %vm5416_vm1, %v2551_v59, 0.0  ;;  %v7554_v24 = vrot.slane %v5403_v55, 5  ;;  %v7555_v34 = vrot.slane %v5306_v41, 5 }
 0x4a2   : > { %v2511_v4 = vadd.f32 %v2490_v1, %v2463_v60  ;;  %v5529_v18 = vsel %vm5416_vm1, %v2021_v29, 0.0  ;;  %v7360_v1 = vrot.slane %v5483_v9, 6  ;;  %v5532_v28 = vpop.xlane.xlu1 %1792  ;;  %v7556_v59 = vrot.slane %v5323_v27, 5 }
 0x4a3   : > { %v2008_v40 = vsel %vm2002_vm13, %v7555_v34, %v7554_v24  ;;  %v1924_v41 = vadd.f32 %v1917_v32, %v5483_v9  ;;  %v7359_v24 = vrot.slane %v5496_v13, 7  ;;  %v7361_v34 = vrot.slane %v5496_v13, 6 }
 0x4a4   : > { %v2029_v60 = vadd.f32 %v2008_v40, %v1980_v52  ;;  %v2538_v8 = vsel %vm2002_vm13, %v7556_v59, %v2527_v6  ;;  %v7362_v40 = vrot.slane %v5532_v28, 7  ;;  %v5544_v56 = vpop.xlane.xlu0 %1872  ;;  %v7557_v59 = vand.u32 3, %v5347_v16 }
 0x4a5   : > { %v2559_v29 = vadd.f32 %v2538_v8, %v2511_v4  ;;  %v7560_v4 = vrot.slane %v5385_v38, 7  ;;  %v7363_v21 = vrot.slane %v5496_v13, 5  ;;  %v7561_v16 = vrot.slane %v5364_v22, 6 }
 0x4a6   : > { %vm5550_vm3 = vcmp.eq.s32.totalorder %v7557_v59, 3  ;;  %v5563_v27 = vsel %vm5464_vm2, %v2029_v60, 0.0  ;;  %v5573_v48 = vpop.xlane.xlu2 %1771  ;;  %v7563_v52 = vrot.slane %v5403_v55, 7  ;;  %v7372_v36 = vrot.slane %v5544_v56, 6 }
 0x4a7   : > { %v2449_v8 = vsel %vm1904_vm12, %v7560_v4, %v7359_v24  ;;  %v1966_v59 = vsel %vm1953_vm14, %v7561_v16, %v7360_v1  ;;  %v7562_v24 = vrot.slane %v5385_v38, 6  ;;  %v5590_v1 = vsel %vm5464_vm2, %v2559_v29, 0.0 }
 0x4a8   : > { %v2456_v39 = vadd.f32 %v2449_v8, %v5496_v13  ;;  %v1973_v4 = vadd.f32 %v1966_v59, %v1924_v41  ;;  %v1909_v16 = vsel %vm1904_vm12, %v7563_v52, %v7362_v40  ;;  %v7364_v8 = vrot.slane %v5544_v56, 7 }
 0x4a9   : > { %v2497_v60 = vsel %vm1953_vm14, %v7562_v24, %v7361_v34  ;;  %v1932_v59 = vadd.f32 %v1909_v16, %v5532_v28  ;;  %v7564_v24 = vrot.slane %v5385_v38, 5  ;;  %v7566_v16 = vrot.slane %v5403_v55, 6 }
 0x4aa   : > { %v2504_v41 = vadd.f32 %v2497_v60, %v2456_v39  ;;  %v2441_v52 = vsel %vm1904_vm12, %v2431_v33, %v7364_v8  ;;  %v7365_v39 = vrot.slane %v5573_v48, 7  ;;  %v7565_v60 = vrot.slane %v5532_v28, 6 }
 0x4ab   : > { %v2545_v34 = vsel %vm2002_vm13, %v7564_v24, %v7363_v21  ;;  %v7373_v40 = vrot.slane %v5532_v28, 5  ;;  %v2464_v24 = vadd.f32 %v2441_v52, %v5544_v56  ;;  %v7567_v21 = vrot.slane %v5483_v9, 5 }
 0x4ac   : > { %v2552_v29 = vadd.f32 %v2545_v34, %v2504_v41  ;;  %v1958_v38 = vsel %vm1953_vm14, %v7566_v16, %v7565_v60  ;;  %v7568_v33 = vrot.slane %v5364_v22, 5  ;;  %v7569_v34 = vrot.slane %v5451_v23, 6 }
 0x4ad   : > { %v1981_v50 = vadd.f32 %v1958_v38, %v1932_v59  ;;  %v1916_v52 = vsel %vm1904_vm12, %v1889_v10, %v7365_v39  ;;  %v7570_v16 = vand.u32 3, %v5406_v26  ;;  %v2082_v59 = vand.u32 3, %v5429_v2  ;;  %v5688_v39 = vpop.xlane.xlu1 %1851 }
 0x4ae   : > { %v2015_v8 = vsel %vm2002_vm13, %v7568_v33, %v7567_v21  ;;  %v2489_v41 = vsel %vm1953_vm14, %v7569_v34, %v7372_v36  ;;  %v7573_v33 = vrot.slane %v5544_v56, 5  ;;  %v7366_v10 = vrot.slane %v5573_v48, 6 }
 0x4af   : > { %v2022_v60 = vadd.f32 %v2015_v8, %v1973_v4  ;;  %vm5632_vm4 = vcmp.eq.s32.totalorder %v7570_v16, 3  ;;  %v2512_v21 = vadd.f32 %v2489_v41, %v2464_v24  ;;  %v5646_v26 = vsel %vm5550_vm3, %v2552_v29, 0.0 }
 0x4b0   : > { %v2537_v34 = vsel %vm2002_vm13, %v2527_v6, %v7573_v33  ;;  %v7574_v4 = vrot.slane %v5403_v55, 5  ;;  %v1925_v24 = vadd.f32 %v1916_v52, %v5573_v48  ;;  %v7368_v6 = vrot.slane %v5529_v18, 1 }
 0x4b1   : > { %v2560_v8 = vadd.f32 %v2537_v34, %v2512_v21  ;;  %v5660_v29 = vsel %vm5550_vm3, %v2022_v60, 0.0  ;;  %vm5662_vm6 = vcmp.eq.s32.totalorder %v2082_v59, 3  ;;  %v7370_v55 = vrot.slane %v5573_v48, 5 }
 0x4b2   : > { %v2007_v2 = vsel %vm2002_vm13, %v7574_v4, %v7373_v40  ;;  %v7367_v21 = vrot.slane %v5390_v19, 1  ;;  %v7577_v32 = vrot.slane %v5483_v9, 6  ;;  %v7580_v22 = vrot.slane %v5483_v9, 5 }
 0x4b3   : > { %v2030_v16 = vadd.f32 %v2007_v2, %v1981_v50  ;;  %v5672_v34 = vsel %vm5632_vm4, %v2560_v8, 0.0  ;;  %v7371_v8 = vrot.slane %v5529_v18, 2  ;;  %v3972_v59 = vmov 1024.0  }
 0x4b4   : > { %v1965_v60 = vsel %vm1953_vm14, %v7577_v32, %v7366_v10  ;;  %v2304_v2 = vsel %vm2290_vm5, %v7367_v21, %v7368_v6  ;;  %v7369_v32 = vrot.slane %v5390_v19, 2  ;;  %v5711_v6 = vpop.xlane.xlu0 %1795  ;;  %3888 = vrcp.f32 %v3972_v59 }
 0x4b5   : > { %v1974_v4 = vadd.f32 %v1965_v60, %v1925_v24  ;;  %v5692_v50 = vsel %vm5632_vm4, %v2030_v16, 0.0  ;;  %v7578_v24 = vrot.slane %v5518_v44, 1  ;;  %v7579_v60 = vrot.slane %v5424_v42, 1 }
 0x4b6   : > { %v2014_v16 = vsel %vm2002_vm13, %v7580_v22, %v7370_v55  ;;  %v2308_v52 = vadd.f32 %v2304_v2, %v5390_v19  ;;  %v2353_v9 = vsel %vm2339_vm7, %v7369_v32, %v7371_v8  ;;  %v7376_v2 = vrot.slane %v5688_v39, 6  ;;  %v5723_v22 = vpop.xlane.xlu2 %1875 }
 0x4b7   : > { %v2610_v10 = vsel %vm2290_vm5, %v7579_v60, %v7578_v24  ;;  %v7374_v24 = vrot.slane %v5688_v39, 7  ;;  %v2023_v60 = vadd.f32 %v2014_v16, %v1974_v4  ;;  %v7379_v41 = vrot.slane %v5390_v19, 3 }
 0x4b8   : > { %v2614_v38 = vadd.f32 %v2610_v10, %v5424_v42  ;;  %v7380_v10 = vrot.slane %v5529_v18, 3  ;;  %v7581_v4 = vrot.slane %v5496_v13, 7  ;;  %v7375_v21 = vrot.slane %v5711_v6, 7 }
 0x4b9   : > { %v2357_v32 = vadd.f32 %v2353_v9, %v2308_v52  ;;  %v7582_v59 = vrot.slane %v5518_v44, 2  ;;  %v7583_v55 = vrot.slane %v5424_v42, 2  ;;  %v7588_v7 = vrot.slane %v5723_v22, 7 }
 0x4ba   : > { %v2448_v16 = vsel %vm1904_vm12, %v7581_v4, %v7374_v24  ;;  %v7584_v4 = vrot.slane %v5532_v28, 7  ;;  %v5752_v24 = vsel %vm5662_vm6, %v2023_v60, 0.0  ;;  %v7586_v60 = vrot.slane %v5518_v44, 3 }
 0x4bb   : > { %v2658_v8 = vsel %vm2339_vm7, %v7583_v55, %v7582_v59  ;;  %v2457_v23 = vadd.f32 %v2448_v16, %v5688_v39  ;;  %v7585_v55 = vrot.slane %v5496_v13, 6  ;;  %v2402_v59 = vsel %vm2388_vm8, %v7379_v41, %v7380_v10 }
 0x4bc   : > { %v2662_v36 = vadd.f32 %v2658_v8, %v2614_v38  ;;  %v1908_v52 = vsel %vm1904_vm12, %v7584_v4, %v7375_v21  ;;  %v2046_v8 = vadd.s32 96, %v5260_v5  ;;  %v7587_v4 = vrot.slane %v5424_v42, 3 }
 0x4bd   : > { %v2496_v38 = vsel %vm1953_vm14, %v7585_v55, %v7376_v2  ;;  %v1933_v55 = vadd.f32 %v1908_v52, %v5711_v6  ;;  %v3889_v2 = vpop.eup %3888  ;;  %v2406_v9 = vadd.f32 %v2402_v59, %v2357_v32  ;;  %v7589_v25 = vrot.slane %v5544_v56, 7 }
 0x4be   : > { %v2706_v21 = vsel %vm2388_vm8, %v7587_v4, %v7586_v60  ;;  %v2505_v40 = vadd.f32 %v2496_v38, %v2457_v23  ;;  %v2726_v46 = vmul.f32 1024.0, %v3889_v2  ;;  %v7590_v60 = vrot.slane %v5688_v39, 5 }
 0x4bf   : > { %v2440_v41 = vsel %vm1904_vm12, %v7589_v25, %v7588_v7  ;;  %v2710_v3 = vadd.f32 %v2706_v21, %v2662_v36  ;;  %v7591_v23 = vrot.slane %v5496_v13, 5  ;;  %v2138_v38 = vand.u32 3, %v2046_v8 }
 0x4c0   : > { %v7592_v59 = vrot.slane %v5711_v6, 6  ;;  %v7593_v4 = vrot.slane %v5532_v28, 6  ;;  %v7383_v36 = vrot.slane %v5510_v49, 1  ;;  %v7384_v25 = vrot.slane %v5563_v27, 1 }
 0x4c1   : > { %v2544_v32 = vsel %vm2002_vm13, %v7591_v23, %v7590_v60  ;;  %v2727_v21 = vsub.f32 1.0, %v2726_v46  ;;  %v2465_v16 = vadd.f32 %v2440_v41, %v5723_v22  ;;  %vm2730_vm9 = vweird.f32 %v3889_v2 }
 0x4c2   : > { %v1957_v7 = vsel %vm1953_vm14, %v7593_v4, %v7592_v59  ;;  %v2553_v10 = vadd.f32 %v2544_v32, %v2505_v40  ;;  %v7594_v60 = vrot.slane %v5711_v6, 5  ;;  %v7595_v8 = vrot.slane %v5532_v28, 5 }
 0x4c3   : > { %v1982_v13 = vadd.f32 %v1957_v7, %v1933_v55  ;;  %v7596_v52 = vrot.slane %v5723_v22, 6  ;;  %v7597_v59 = vrot.slane %v5544_v56, 6  ;;  %v2296_v46 = vsel %vm2290_vm5, %v7383_v36, %v7384_v25 }
 0x4c4   : > { %v2006_v23 = vsel %vm2002_vm13, %v7595_v8, %v7594_v60  ;;  %v2728_v40 = vmul.f32 %v3889_v2, %v2727_v21  ;;  %v7598_v28 = vrot.slane %v5723_v22, 5  ;;  %v7599_v41 = vrot.slane %v5544_v56, 5 }
 0x4c5   : > { %v2488_v4 = vsel %vm1953_vm14, %v7597_v59, %v7596_v52  ;;  %v2316_v32 = vadd.f32 %v2296_v46, %v5510_v49  ;;  %v7388_v7 = vrot.slane %v5563_v27, 2  ;;  %vm5825_vm10 = vcmp.eq.s32.totalorder %v2138_v38, 3 }
 0x4c6   : > { %v2536_v55 = vsel %vm2002_vm13, %v7599_v41, %v7598_v28  ;;  %v7385_v60 = vrot.slane %v5510_v49, 2  ;;  %v7386_v8 = vrot.slane %v5510_v49, 3  ;;  %v7387_v21 = vrot.slane %v5563_v27, 3 }
 0x4c7   : > { %v7602_v59 = vrot.slane %v5590_v1, 1  ;;  %v7603_v56 = vrot.slane %v5456_v51, 1  ;;  %v2729_v46 = vadd.f32 %v3889_v2, %v2728_v40  ;;  %v5840_v38 = vsel %vm5662_vm6, %v2553_v10, 0.0 }
 0x4c8   : > { %v2031_v41 = vadd.f32 %v2006_v23, %v1982_v13  ;;  %v2513_v36 = vadd.f32 %v2488_v4, %v2465_v16  ;;  %v2345_v25 = vsel %vm2339_vm7, %v7385_v60, %v7388_v7  ;;  %v2394_v40 = vsel %vm2388_vm8, %v7386_v8, %v7387_v21 }
 0x4c9   : > { %v2602_v28 = vsel %vm2290_vm5, %v7603_v56, %v7602_v59  ;;  %v7604_v10 = vrot.slane %v5590_v1, 2  ;;  %v7605_v16 = vrot.slane %v5456_v51, 2  ;;  %v5862_v23 = vsel %vm2730_vm9, %v3889_v2, %v2729_v46 }
 0x4ca   : > { %v2622_v33 = vadd.f32 %v2602_v28, %v5456_v51  ;;  %v2365_v4 = vadd.f32 %v2345_v25, %v2316_v32  ;;  %v7389_v59 = vrot.slane %v5660_v29, 1  ;;  %v7392_v56 = vrot.slane %v5660_v29, 2 }
 0x4cb   : > { %v2650_v13 = vsel %vm2339_vm7, %v7605_v16, %v7604_v10  ;;  %v2733_v60 = vmul.f32 %v5862_v23, %v2406_v9  ;;  %v2749_v8 = vmul.f32 %v5862_v23, %v2710_v3  ;;  %v7606_v21 = vrot.slane %v5590_v1, 3 }
 0x4cc   : > { %v2670_v28 = vadd.f32 %v2650_v13, %v2622_v33  ;;  %v7607_v7 = vrot.slane %v5456_v51, 3  ;;  %v2414_v16 = vadd.f32 %v2394_v40, %v2365_v4  ;;  %v7608_v2 = vrot.slane %v5529_v18, 1  ;;  %v5889_v13 = vpop.xlane.xlu1 %1774 }
 0x4cd   : > { %v7391_v9 = vrot.slane %v5660_v29, 3  ;;  %v7609_v3 = vrot.slane %v5646_v26, 1  ;;  %v7610_v32 = vrot.slane %v5518_v44, 1  ;;  %2803 = vperm.xlu0 %3708, %v2733_v60   ;;  %v2765_v33 = vmul.f32 %v2733_v60, %v2733_v60 }
 0x4ce   : > { %v2698_v10 = vsel %vm2388_vm8, %v7607_v7, %v7606_v21  ;;  %v2303_v25 = vsel %vm2290_vm5, %v7608_v2, %v7389_v59  ;;  %v7611_v59 = vrot.slane %v5529_v18, 2  ;;  %v7613_v7 = vrot.slane %v5518_v44, 2 }
 0x4cf   : > { %v2609_v46 = vsel %vm2290_vm5, %v7610_v32, %v7609_v3  ;;  %v2718_v21 = vadd.f32 %v2698_v10, %v2670_v28  ;;  %v2309_v40 = vadd.f32 %v2303_v25, %v5529_v18  ;;  %v2561_v32 = vadd.f32 %v2536_v55, %v2513_v36 }
 0x4d0   : > { %v2352_v3 = vsel %vm2339_vm7, %v7611_v59, %v7392_v56  ;;  %v2615_v60 = vadd.f32 %v2609_v46, %v5518_v44  ;;  %v2741_v28 = vmul.f32 %v5862_v23, %v2414_v16  ;;  %v7612_v25 = vrot.slane %v5646_v26, 2 }
 0x4d1   : > { %v2358_v10 = vadd.f32 %v2352_v3, %v2309_v40  ;;  %v2781_v4 = vsub.f32 %v2749_v8, %v2765_v33  ;;  %v7614_v45 = vrot.slane %v5529_v18, 3  ;;  %v7400_v36 = vrot.slane %v5889_v13, 7 }
 0x4d2   : > { %v2657_v2 = vsel %vm2339_vm7, %v7613_v7, %v7612_v25  ;;  %v2757_v55 = vmul.f32 %v5862_v23, %v2718_v21  ;;  %v7615_v40 = vrot.slane %v5646_v26, 3  ;;  %v7616_v3 = vrot.slane %v5518_v44, 3  ;;  %v5922_v7 = vpop.xlane.xlu0 %1854 }
 0x4d3   : > { %v2401_v59 = vsel %vm2388_vm8, %v7614_v45, %v7391_v9  ;;  %v2663_v46 = vadd.f32 %v2657_v2, %v2615_v60  ;;  %v7393_v33 = vrot.slane %v5889_v13, 6  ;;  %v5926_v45 = vsel %vm5825_vm10, %v2031_v41, 0.0 }
 0x4d4   : > { %v2407_v16 = vadd.f32 %v2401_v59, %v2358_v10  ;;  %v2705_v8 = vsel %vm2388_vm8, %v7616_v3, %v7615_v40  ;;  %v2039_v2 = vadd.s32 40, %v5260_v5  ;;  %v7617_v21 = vrot.slane %v5573_v48, 7  ;;  %v5941_v59 = vpop.xlane.xlu2 %1798 }
 0x4d5   : > { %v2711_v18 = vadd.f32 %v2705_v8, %v2663_v46  ;;  %v5937_v60 = vsel %vm5825_vm10, %v2561_v32, 0.0  ;;  %v2773_v10 = vmul.f32 %v2741_v28, %v2741_v28  ;;  %v5943_v46 = vadd.f32 1e-05, %v2781_v4  ;;  %2843 = vperm.xlu0 %3708, %v2741_v28  }
 0x4d6   : > { %v1915_v44 = vsel %vm1904_vm12, %v7617_v21, %v7400_v36  ;;  %v2734_v25 = vmul.f32 %v5862_v23, %v2407_v16  ;;  %v7397_v3 = vrot.slane %v5889_v13, 5  ;;  %v7395_v8 = vrot.slane %v5922_v7, 7 }
 0x4d7   : > { %v1926_v41 = vadd.f32 %v1915_v44, %v5889_v13  ;;  %v2750_v40 = vmul.f32 %v5862_v23, %v2711_v18  ;;  %v2789_v21 = vsub.f32 %v2757_v55, %v2773_v10  ;;  %v7618_v32 = vrot.slane %v5573_v48, 6 }
 0x4d8   : > { %2808 = vperm.xlu2 %3707, %v2734_v25   ;;  %v2766_v52 = vmul.f32 %v2734_v25, %v2734_v25  ;;  %v7394_v4 = vrot.slane %v5922_v7, 6  ;;  %v2089_v44 = vand.u32 3, %v2039_v2  ;;  %v7619_v18 = vrot.slane %v5688_v39, 7 }
 0x4d9   : > { %v1964_v16 = vsel %vm1953_vm14, %v7618_v32, %v7393_v33  ;;  %v7396_v55 = vrot.slane %v5941_v59, 7  ;;  %v7398_v56 = vrot.slane %v5922_v7, 5  ;;  %v2047_v32 = vadd.s32 104, %v5260_v5 }
 0x4da   : > { %v1975_v9 = vadd.f32 %v1964_v16, %v1926_v41  ;;  %v2447_v28 = vsel %vm1904_vm12, %v7619_v18, %v7395_v8  ;;  %v2782_v10 = vsub.f32 %v2750_v40, %v2766_v52  ;;  %v7620_v41 = vrot.slane %v5688_v39, 6 }
 0x4db   : > { %v2458_v25 = vadd.f32 %v2447_v28, %v5922_v7  ;;  %v7621_v40 = vrot.slane %v5711_v6, 7  ;;  %3890 = vrsqrt.f32 %v5943_v46  ;;  %v5980_v18 = vadd.f32 1e-05, %v2789_v21 }
 0x4dc   : > { %v2495_v16 = vsel %vm1953_vm14, %v7620_v41, %v7394_v4  ;;  %v7622_v28 = vrot.slane %v5573_v48, 5  ;;  %vm5988_vm11 = vcmp.eq.s32.totalorder %v2089_v44, 3  ;;  %v7401_v8 = vrot.slane %v5941_v59, 6  ;;  %v6153_v11 = vpop.xlane.xlu2 %1857 }
 0x4dd   : > { %v1907_v52 = vsel %vm1904_vm12, %v7621_v40, %v7396_v55  ;;  %v2506_v33 = vadd.f32 %v2495_v16, %v2458_v25  ;;  %v7399_v40 = vrot.slane %v5692_v50, 1  ;;  %v7625_v21 = vrot.slane %v5688_v39, 5 }
 0x4de   : > { %v2013_v2 = vsel %vm2002_vm13, %v7622_v28, %v7397_v3  ;;  %v2145_v55 = vand.u32 3, %v2047_v32  ;;  %v1934_v28 = vadd.f32 %v1907_v52, %v5941_v59  ;;  %v7402_v44 = vrot.slane %v5692_v50, 2  ;;  %v6039_v52 = vpop.xlane.xlu0 %1777 }
 0x4df   : > { %v2024_v4 = vadd.f32 %v2013_v2, %v1975_v9  ;;  %v2543_v48 = vsel %vm2002_vm13, %v7625_v21, %v7398_v56  ;;  %v7626_v9 = vrot.slane %v5563_v27, 1  ;;  %v7627_v39 = vrot.slane %v5672_v34, 1 }
 0x4e0   : > { %v2554_v25 = vadd.f32 %v2543_v48, %v2506_v33  ;;  %v7628_v3 = vrot.slane %v5590_v1, 1  ;;  %3892 = vrsqrt.f32 %v5980_v18  ;;  %v6017_v33 = vadd.f32 1e-05, %v2782_v10  ;;  %v6020_v48 = vpop.xlane.xlu1 %1878 }
 0x4e1   : > { %v2295_v2 = vsel %vm2290_vm5, %v7626_v9, %v7399_v40  ;;  %v6024_v9 = vsel %vm5988_vm11, %v2024_v4, 0.0  ;;  %v7629_v56 = vrot.slane %v5711_v6, 6  ;;  %v7630_v10 = vrot.slane %v5563_v27, 2  ;;  %v6041_v4 = vpop.eup %3890 }
 0x4e2   : > { %v2601_v32 = vsel %vm2290_vm5, %v7628_v3, %v7627_v39  ;;  %v2317_v21 = vadd.f32 %v2295_v2, %v5563_v27  ;;  %vm6043_vm15 = vcmp.eq.s32.totalorder %v2145_v55, 3  ;;  %v7633_v39 = vrot.slane %v5692_v50, 3 }
 0x4e3   : > { %v1956_v3 = vsel %vm1953_vm14, %v7629_v56, %v7401_v8  ;;  %v2344_v2 = vsel %vm2339_vm7, %v7630_v10, %v7402_v44  ;;  %v2623_v56 = vadd.f32 %v2601_v32, %v5590_v1  ;;  %v6050_v8 = vsel %vm5988_vm11, %v2554_v25, 0.0 }
 0x4e4   : > { %v1983_v36 = vadd.f32 %v1956_v3, %v1934_v28  ;;  %v2366_v16 = vadd.f32 %v2344_v2, %v2317_v21  ;;  %v7634_v10 = vrot.slane %v5563_v27, 3  ;;  %v7635_v55 = vrot.slane %v5672_v34, 2 }
 0x4e5   : > { %v7636_v12 = vrot.slane %v5590_v1, 2  ;;  %v7404_v32 = vrot.slane %v6020_v48, 7  ;;  %3894 = vrsqrt.f32 %v6017_v33  ;;  %v7637_v27 = vrot.slane %v5941_v59, 5 }
 0x4e6   : > { %v2393_v44 = vsel %vm2388_vm8, %v7634_v10, %v7633_v39  ;;  %v7638_v39 = vrot.slane %v5711_v6, 5  ;;  %v7639_v10 = vrot.slane %v5672_v34, 3  ;;  %v7656_v63 = vrot.slane %v6039_v52, 6 }
 0x4e7   : > { %v2649_v28 = vsel %vm2339_vm7, %v7636_v12, %v7635_v55  ;;  %v2415_v21 = vadd.f32 %v2393_v44, %v2366_v16  ;;  %v7640_v12 = vrot.slane %v5590_v1, 3  ;;  %v7641_v16 = vrot.slane %v5723_v22, 7  ;;  %v6086_v55 = vpop.eup %3892 }
 0x4e8   : > { %v2671_v41 = vadd.f32 %v2649_v28, %v2623_v56  ;;  %v2005_v2 = vsel %vm2002_vm13, %v7638_v39, %v7637_v27  ;;  %v7646_v1 = vrot.slane %v5660_v29, 1  ;;  %v7417_v40 = vrot.slane %v5926_v45, 3 }
 0x4e9   : > { %v2697_v44 = vsel %vm2388_vm8, %v7640_v12, %v7639_v10  ;;  %v2439_v56 = vsel %vm1904_vm12, %v7641_v16, %v7404_v32  ;;  %v2032_v6 = vadd.f32 %v2005_v2, %v1983_v36  ;;  %v2742_v27 = vmul.f32 %v5862_v23, %v2415_v21 }
 0x4ea   : > { %v2719_v28 = vadd.f32 %v2697_v44, %v2671_v41  ;;  %v2466_v39 = vadd.f32 %v2439_v56, %v6020_v48  ;;  %v7407_v12 = vrot.slane %v5752_v24, 1  ;;  %v7642_v16 = vrot.slane %v6020_v48, 6 }
 0x4eb   : > { %2848 = vperm.xlu1 %3709, %v2742_v27   ;;  %v7643_v36 = vrot.slane %v5723_v22, 6  ;;  %v6102_v41 = vadd.s32 48, %v5260_v5  ;;  %v7644_v2 = vrot.slane %v6039_v52, 7  ;;  %v7645_v44 = vrot.slane %v5889_v13, 7 }
 0x4ec   : > { %v2758_v25 = vmul.f32 %v5862_v23, %v2719_v28  ;;  %v2774_v3 = vmul.f32 %v2742_v27, %v2742_v27  ;;  %v2302_v32 = vsel %vm2290_vm5, %v7646_v1, %v7407_v12  ;;  %v7650_v12 = vrot.slane %v5840_v38, 2 }
 0x4ed   : > { %v2487_v21 = vsel %vm1953_vm14, %v7643_v36, %v7642_v16  ;;  %v1914_v56 = vsel %vm1904_vm12, %v7645_v44, %v7644_v2  ;;  %v7408_v16 = vrot.slane %v5752_v24, 2  ;;  %v2310_v47 = vadd.f32 %v2302_v32, %v5660_v29  ;;  %v6121_v2 = vpop.eup %3894 }
 0x4ee   : > { %v2514_v28 = vadd.f32 %v2487_v21, %v2466_v39  ;;  %v1927_v27 = vadd.f32 %v1914_v56, %v6039_v52  ;;  %v7647_v39 = vrot.slane %v5660_v29, 2  ;;  %v7648_v21 = vrot.slane %v5840_v38, 1 }
 0x4ef   : > { %v7649_v44 = vrot.slane %v5646_v26, 1  ;;  %v7651_v10 = vrot.slane %v5646_v26, 2  ;;  %v6145_v57 = vsel %vm6043_vm15, %v2032_v6, 0.0  ;;  %v2790_v31 = vsub.f32 %v2758_v25, %v2774_v3 }
 0x4f0   : > { %v2351_v1 = vsel %vm2339_vm7, %v7647_v39, %v7408_v16  ;;  %v7652_v39 = vrot.slane %v6020_v48, 5  ;;  %v7653_v16 = vrot.slane %v5723_v22, 5  ;;  %v7655_v36 = vrot.slane %v5660_v29, 3 }
 0x4f1   : > { %v2608_v32 = vsel %vm2290_vm5, %v7649_v44, %v7648_v21  ;;  %v2656_v56 = vsel %vm2339_vm7, %v7651_v10, %v7650_v12  ;;  %v2359_v44 = vadd.f32 %v2351_v1, %v2310_v47  ;;  %v2096_v10 = vand.u32 3, %v6102_v41 }
 0x4f2   : > { %v2535_v21 = vsel %vm2002_vm13, %v7653_v16, %v7652_v39  ;;  %v7654_v12 = vrot.slane %v5752_v24, 3  ;;  %v7657_v22 = vrot.slane %v5889_v13, 6  ;;  %v2616_v25 = vadd.f32 %v2608_v32, %v5646_v26 }
 0x4f3   : > { %v2562_v17 = vadd.f32 %v2535_v21, %v2514_v28  ;;  %v7658_v3 = vrot.slane %v5840_v38, 3  ;;  %v7659_v41 = vrot.slane %v5646_v26, 3  ;;  %v7661_v1 = vrot.slane %v5889_v13, 5 }
 0x4f4   : > { %v2400_v6 = vsel %vm2388_vm8, %v7655_v36, %v7654_v12  ;;  %v1963_v47 = vsel %vm1953_vm14, %v7657_v22, %v7656_v63  ;;  %v7660_v36 = vrot.slane %v6039_v52, 5  ;;  %v7424_v63 = vrot.slane %v6153_v11, 7 }
 0x4f5   : > { %v2408_v16 = vadd.f32 %v2400_v6, %v2359_v44  ;;  %v2704_v29 = vsel %vm2388_vm8, %v7659_v41, %v7658_v3  ;;  %v1976_v28 = vadd.f32 %v1963_v47, %v1927_v27  ;;  %v7414_v21 = vrot.slane %v6153_v11, 6 }
 0x4f6   : > { %v2012_v39 = vsel %vm2002_vm13, %v7661_v1, %v7660_v36  ;;  %v2664_v44 = vadd.f32 %v2656_v56, %v2616_v25  ;;  %v7413_v26 = vrot.slane %v5926_v45, 1  ;;  %v7415_v12 = vrot.slane %v5926_v45, 2  ;;  %v6207_v25 = vpop.xlane.xlu1 %1801 }
 0x4f7   : > { %v2735_v32 = vmul.f32 %v5862_v23, %v2408_v16  ;;  %v6186_v6 = vadd.f32 1e-05, %v2790_v31  ;;  %v6190_v27 = vsel %vm6043_vm15, %v2562_v17, 0.0  ;;  %v7662_v13 = vrot.slane %v5922_v7, 7 }
 0x4f8   : > { %v7416_v47 = vrot.slane %v6153_v11, 5  ;;  %v2712_v56 = vadd.f32 %v2704_v29, %v2664_v44  ;;  %v7663_v31 = vrot.slane %v5692_v50, 1  ;;  %v7664_v41 = vrot.slane %v5922_v7, 6 }
 0x4f9   : > { %v2446_v22 = vsel %vm1904_vm12, %v7662_v13, %v7424_v63  ;;  %2813 = vperm.xlu0 %3708, %v2735_v32   ;;  %v2767_v3 = vmul.f32 %v2735_v32, %v2735_v32  ;;  %v7665_v1 = vrot.slane %v5937_v60, 1  ;;  %v7666_v44 = vrot.slane %v5672_v34, 1 }
 0x4fa   : > { %v2459_v16 = vadd.f32 %v2446_v22, %v6153_v11  ;;  %v2294_v17 = vsel %vm2290_vm5, %v7663_v31, %v7413_v26  ;;  %v2494_v29 = vsel %vm1953_vm14, %v7664_v41, %v7414_v21  ;;  %v2751_v22 = vmul.f32 %v5862_v23, %v2712_v56 }
 0x4fb   : > { %v2318_v36 = vadd.f32 %v2294_v17, %v5692_v50  ;;  %v2600_v13 = vsel %vm2290_vm5, %v7666_v44, %v7665_v1  ;;  %v7667_v32 = vrot.slane %v5692_v50, 2  ;;  %v7668_v17 = vrot.slane %v5922_v7, 5 }
 0x4fc   : > { %v2507_v31 = vadd.f32 %v2494_v29, %v2459_v16  ;;  %v2624_v41 = vadd.f32 %v2600_v13, %v5672_v34  ;;  %v7669_v56 = vrot.slane %v5937_v60, 2  ;;  %v7670_v16 = vrot.slane %v5672_v34, 2 }
 0x4fd   : > { %v2343_v26 = vsel %vm2339_vm7, %v7667_v32, %v7415_v12  ;;  %v2542_v21 = vsel %vm2002_vm13, %v7668_v17, %v7416_v47  ;;  %v7422_v44 = vrot.slane %v6207_v25, 7  ;;  %v2783_v32 = vsub.f32 %v2751_v22, %v2767_v3 }
 0x4fe   : > { %v2367_v1 = vadd.f32 %v2343_v26, %v2318_v36  ;;  %v2648_v29 = vsel %vm2339_vm7, %v7670_v16, %v7669_v56  ;;  %v7671_v13 = vrot.slane %v5692_v50, 3  ;;  %v7672_v26 = vrot.slane %v5937_v60, 3 }
 0x4ff   : > { %v2672_v12 = vadd.f32 %v2648_v29, %v2624_v41  ;;  %v7673_v36 = vrot.slane %v5672_v34, 3  ;;  %v2555_v47 = vadd.f32 %v2542_v21, %v2507_v31  ;;  %v7674_v3 = vrot.slane %v5941_v59, 7 }
 0x500   : > { %v2392_v7 = vsel %vm2388_vm8, %v7671_v13, %v7417_v40  ;;  %v7421_v22 = vrot.slane %v6207_v25, 6  ;;  %v2025_v16 = vadd.f32 %v2012_v39, %v1976_v28  ;;  %v2048_v29 = vadd.s32 112, %v5260_v5  ;;  %v6264_v13 = vpop.xlane.xlu0 %1881 }
 0x501   : > { %v2696_v17 = vsel %vm2388_vm8, %v7673_v36, %v7672_v26  ;;  %v2416_v56 = vadd.f32 %v2392_v7, %v2367_v1  ;;  %v1906_v50 = vsel %vm1904_vm12, %v7674_v3, %v7422_v44  ;;  %vm2248_vm0 = vcmp.eq.s32.totalorder %v2096_v10, 3 }
 0x502   : > { %v2720_v41 = vadd.f32 %v2696_v17, %v2672_v12  ;;  %v1935_v34 = vadd.f32 %v1906_v50, %v6207_v25  ;;  %3896 = vrsqrt.f32 %v6186_v6  ;;  %v7419_v39 = vrot.slane %v6207_v25, 5  ;;  %v6273_v12 = vpop.xlane.xlu2 %1780 }
 0x503   : > { %v2743_v1 = vmul.f32 %v5862_v23, %v2416_v56  ;;  %v6275_v26 = vsel %vm2248_vm0, %v2555_v47, 0.0  ;;  %v7675_v10 = vrot.slane %v5941_v59, 6  ;;  %v7418_v56 = vrot.slane %v6264_v13, 7 }
 0x504   : > { %v2759_v28 = vmul.f32 %v5862_v23, %v2720_v41  ;;  %v6284_v3 = vsel %vm2248_vm0, %v2025_v16, 0.0  ;;  %v2152_v50 = vand.u32 3, %v2048_v29  ;;  %v7420_v7 = vrot.slane %v6264_v13, 6 }
 0x505   : > { %2853 = vperm.xlu2 %3707, %v2743_v1   ;;  %v2775_v36 = vmul.f32 %v2743_v1, %v2743_v1  ;;  %v1955_v17 = vsel %vm1953_vm14, %v7675_v10, %v7421_v22  ;;  %v7676_v47 = vrot.slane %v6020_v48, 7  ;;  %v7423_v40 = vrot.slane %v6264_v13, 5 }
 0x506   : > { %v1984_v41 = vadd.f32 %v1955_v17, %v1935_v34  ;;  %v1893_v10 = vrot.slane %v6273_v12, 7  ;;  %v6295_v21 = vadd.f32 1e-05, %v2783_v32  ;;  %v7678_v17 = vrot.slane %v6020_v48, 6 }
 0x507   : > { %v2791_v31 = vsub.f32 %v2759_v28, %v2775_v36  ;;  %v2438_v1 = vsel %vm1904_vm12, %v7676_v47, %v7418_v56  ;;  %v7677_v28 = vrot.slane %v5941_v59, 5  ;;  %v2041_v47 = vadd.s32 56, %v5260_v5 }
 0x508   : > { %v2467_v34 = vadd.f32 %v2438_v1, %v6264_v13  ;;  %v2486_v32 = vsel %vm1953_vm14, %v7678_v17, %v7420_v7  ;;  %v7679_v29 = vrot.slane %v5262_v58, 7  ;;  %v6317_v16 = vpop.eup %3896  ;;  %vm6319_vm1 = vcmp.eq.s32.totalorder %v2152_v50, 3 }
 0x509   : > { %v2004_v36 = vsel %vm2002_vm13, %v7677_v28, %v7419_v39  ;;  %v7682_v39 = vrot.slane %v6039_v52, 7  ;;  %v6327_v7 = vadd.f32 1e-05, %v2791_v31  ;;  %v7683_v22 = vrot.slane %v6020_v48, 5 }
 0x50a   : > { %v1912_v1 = vsel %vm1904_vm12, %v1893_v10, %v7679_v29  ;;  %v2033_v28 = vadd.f32 %v2004_v36, %v1984_v41  ;;  %v2515_v56 = vadd.f32 %v2486_v32, %v2467_v34  ;;  %v2042_v50 = vadd.s32 64, %v5260_v5 }
 0x50b   : > { %v1913_v17 = vsel %vm1904_vm12, %v7682_v39, %v1893_v10  ;;  %v2534_v29 = vsel %vm2002_vm13, %v7683_v22, %v7423_v40  ;;  %v1944_v44 = vrot.slane %v6273_v12, 6  ;;  %v1929_v36 = vadd.f32 %v1912_v1, %v5262_v58 }
 0x50c   : > { %v2563_v41 = vadd.f32 %v2534_v29, %v2515_v56  ;;  %v1928_v34 = vadd.f32 %v1913_v17, %v6273_v12  ;;  %v7426_v39 = vrot.slane %v6024_v9, 1  ;;  %3898 = vrsqrt.f32 %v6295_v21 }
 0x50d   : > { %v2103_v10 = vand.u32 3, %v2041_v47  ;;  %v1993_v48 = vrot.slane %v6273_v12, 5  ;;  %v6345_v22 = vsel %vm6319_vm1, %v2033_v28, 0.0  ;;  %v7425_v32 = vrot.slane %v6024_v9, 2 }
 0x50e   : > { %v6349_v56 = vsel %vm6319_vm1, %v2563_v41, 0.0  ;;  %v7684_v1 = vrot.slane %v6050_v8, 1  ;;  %v7685_v17 = vrot.slane %v5840_v38, 1  ;;  %v2110_v47 = vand.u32 3, %v2042_v50 }
 0x50f   : > { %v7686_v12 = vrot.slane %v5262_v58, 6  ;;  %v7687_v31 = vrot.slane %v6039_v52, 6  ;;  %3900 = vrsqrt.f32 %v6327_v7  ;;  %v7688_v50 = vrot.slane %v5752_v24, 1 }
 0x510   : > { %v2607_v29 = vsel %vm2290_vm5, %v7685_v17, %v7684_v1  ;;  %vm6398_vm2 = vcmp.eq.s32.totalorder %v2103_v10, 3  ;;  %vm6402_vm3 = vcmp.eq.s32.totalorder %v2110_v47, 3  ;;  %v7700_v14 = vrot.slane %v6050_v8, 3 }
 0x511   : > { %v1961_v28 = vsel %vm1953_vm14, %v1944_v44, %v7686_v12  ;;  %v1962_v59 = vsel %vm1953_vm14, %v7687_v31, %v1944_v44  ;;  %v2301_v1 = vsel %vm2290_vm5, %v7688_v50, %v7426_v39  ;;  %v7689_v12 = vrot.slane %v5262_v58, 5 }
 0x512   : > { %v1977_v40 = vadd.f32 %v1962_v59, %v1928_v34  ;;  %v1978_v63 = vadd.f32 %v1961_v28, %v1929_v36  ;;  %v2311_v31 = vadd.f32 %v2301_v1, %v5752_v24  ;;  %v2617_v41 = vadd.f32 %v2607_v29, %v5840_v38  ;;  %v1861_v34 = vpop.xlane.xlu1 %1860  ;;  %v6396_v1 = vpop.eup %3898 }
 0x513   : > { %v2010_v44 = vsel %vm2002_vm13, %v1993_v48, %v7689_v12  ;;  %v7690_v28 = vrot.slane %v5752_v24, 2  ;;  %v7691_v50 = vrot.slane %v6050_v8, 2  ;;  %v7692_v58 = vrot.slane %v5840_v38, 2 }
 0x514   : > { %v2935_v29 = vmul.f32 %v6041_v4, %v5943_v46  ;;  %v7701_v47 = vrot.slane %v5840_v38, 3  ;;  %v2428_v35 = vrot.slane %v1861_v34, 7  ;;  %v7703_v38 = vrot.slane %v6153_v11, 7 }
 0x515   : > { %v2350_v59 = vsel %vm2339_vm7, %v7690_v28, %v7425_v32  ;;  %v2655_v12 = vsel %vm2339_vm7, %v7692_v58, %v7691_v50  ;;  %v7697_v28 = vrot.slane %v6039_v52, 5  ;;  %v7698_v50 = vrot.slane %v6024_v9, 3 }
 0x516   : > { %v2360_v39 = vadd.f32 %v2350_v59, %v2311_v31  ;;  %v7699_v58 = vrot.slane %v5752_v24, 3  ;;  %v2665_v37 = vadd.f32 %v2655_v12, %v2617_v41  ;;  %v2703_v43 = vsel %vm2388_vm8, %v7701_v47, %v7700_v14  ;;  %v6423_v24 = vpop.eup %3900 }
 0x517   : > { %v2011_v32 = vsel %vm2002_vm13, %v7697_v28, %v1993_v48  ;;  %v2936_v52 = vmul.f32 %v6041_v4, %v2935_v29  ;;  %v2476_v48 = vrot.slane %v1861_v34, 6  ;;  %v2027_v59 = vadd.f32 %v2010_v44, %v1978_v63 }
 0x518   : > { %v2399_v10 = vsel %vm2388_vm8, %v7699_v58, %v7698_v50  ;;  %v2026_v31 = vadd.f32 %v2011_v32, %v1977_v40  ;;  %v2713_v0 = vadd.f32 %v2703_v43, %v2665_v37  ;;  %v7702_v41 = vrot.slane %v5265_v30, 7  ;;  %v1805_v43 = vpop.xlane.xlu0 %1804 }
 0x519   : > { %v2409_v28 = vadd.f32 %v2399_v10, %v2360_v39  ;;  %v2937_v62 = vmul.f32 0.5, %v2936_v52  ;;  %v2445_v14 = vsel %vm1904_vm12, %v7703_v38, %v2428_v35  ;;  %v2524_v29 = vrot.slane %v1861_v34, 5 }
 0x51a   : > { %v2444_v12 = vsel %vm1904_vm12, %v2428_v35, %v7702_v41  ;;  %v2752_v63 = vmul.f32 %v5862_v23, %v2713_v0  ;;  %v2460_v40 = vadd.f32 %v2445_v14, %v1861_v34  ;;  %vm2941_vm4 = vweird.f32 %v6041_v4 }
 0x51b   : > { %v2736_v50 = vmul.f32 %v5862_v23, %v2409_v28  ;;  %v2461_v37 = vadd.f32 %v2444_v12, %v5265_v30  ;;  %v2938_v39 = vsub.f32 1.5, %v2937_v62  ;;  %v7704_v32 = vrot.slane %v5265_v30, 6 }
 0x51c   : > { %v7705_v58 = vrot.slane %v6153_v11, 6  ;;  %vm2940_vm6 = vweird.f32 %v5943_v46  ;;  %v7706_v47 = vrot.slane %v5265_v30, 5  ;;  %v7707_v28 = vrot.slane %v6153_v11, 5 }
 0x51d   : > { %v2492_v44 = vsel %vm1953_vm14, %v2476_v48, %v7704_v32  ;;  %2818 = vperm.xlu1 %3709, %v2736_v50   ;;  %v2768_v10 = vmul.f32 %v2736_v50, %v2736_v50  ;;  %v2939_v62 = vmul.f32 %v6041_v4, %v2938_v39  ;;  %v1901_v12 = vrot.slane %v1805_v43, 7  ;;  %vm2942_vm9 = vmor %vm2940_vm6, %vm2941_vm4 }
 0x51e   : > { %v2493_v35 = vsel %vm1953_vm14, %v7705_v58, %v2476_v48  ;;  %v2509_v34 = vadd.f32 %v2492_v44, %v2461_v37  ;;  %v2540_v52 = vsel %vm2002_vm13, %v2524_v29, %v7706_v47  ;;  %v2541_v41 = vsel %vm2002_vm13, %v7707_v28, %v2524_v29 }
 0x51f   : > { %v2508_v0 = vadd.f32 %v2493_v35, %v2460_v40  ;;  %v2784_v48 = vsub.f32 %v2752_v63, %v2768_v10  ;;  %v2049_v46 = vadd.s32 120, %v5260_v5  ;;  %v2943_v50 = vsel %vm2942_vm9, %v6041_v4, %v2939_v62 }
 0x520   : > { %v2557_v14 = vadd.f32 %v2540_v52, %v2509_v34  ;;  %v7708_v40 = vrot.slane %v6207_v25, 7  ;;  %v7709_v37 = vrot.slane %v5255_v20, 7  ;;  %v1952_v29 = vrot.slane %v1805_v43, 6  ;;  %3091 = vperm.xlu2 %3707, %v2943_v50  }
 0x521   : > { %v2556_v38 = vadd.f32 %v2541_v41, %v2508_v0  ;;  %v6477_v44 = vsel %vm6398_vm2, %v2026_v31, 0.0  ;;  %v6481_v58 = vsel %vm6402_vm3, %v2027_v59, 0.0  ;;  %v6483_v35 = vadd.f32 1e-05, %v2784_v48 }
 0x522   : > { %v1905_v30 = vsel %vm1904_vm12, %v7708_v40, %v1901_v12  ;;  %v1920_v11 = vsel %vm1904_vm12, %v1901_v12, %v7709_v37  ;;  %v6472_v4 = vsel %vm6402_vm3, %v2557_v14, 0.0  ;;  %v2054_v10 = vand.u32 3, %v5260_v5 }
 0x523   : > { %v6468_v39 = vsel %vm6398_vm2, %v2556_v38, 0.0  ;;  %v1921_v32 = vadd.f32 %v1920_v11, %v5255_v20  ;;  %v7433_v34 = vrot.slane %v6472_v4, 1  ;;  %v2159_v62 = vand.u32 3, %v2049_v46 }
 0x524   : > { %v7434_v0 = vrot.slane %v6468_v39, 1  ;;  %v1936_v47 = vadd.f32 %v1905_v30, %v1805_v43  ;;  %v7710_v52 = vrot.slane %v6207_v25, 6  ;;  %v7711_v31 = vrot.slane %v5255_v20, 6 }
 0x525   : > { %v2001_v59 = vrot.slane %v1805_v43, 5  ;;  %v2287_v28 = vrot.slane %v6145_v57, 1  ;;  %v2336_v38 = vrot.slane %v6145_v57, 2  ;;  %3902 = vrsqrt.f32 %v6483_v35 }
 0x526   : > { %v1954_v36 = vsel %vm1953_vm14, %v7710_v52, %v1952_v29  ;;  %v1969_v17 = vsel %vm1953_vm14, %v1952_v29, %v7711_v31  ;;  %v7712_v46 = vrot.slane %v5926_v45, 1  ;;  %v2385_v50 = vrot.slane %v6145_v57, 3 }
 0x527   : > { %v1970_v48 = vadd.f32 %v1969_v17, %v1921_v32  ;;  %v2604_v40 = vsel %vm2290_vm5, %v7434_v0, %v7433_v34  ;;  %v1985_v30 = vadd.f32 %v1954_v36, %v1936_v47  ;;  %v7713_v37 = vrot.slane %v5255_v20, 5  ;;  %v1885_v32 = vpop.xlane.xlu2 %1884 }
 0x528   : > { %v2293_v43 = vsel %vm2290_vm5, %v7712_v46, %v2287_v28  ;;  %v7714_v52 = vrot.slane %v6207_v25, 5  ;;  %v7715_v46 = vrot.slane %v5926_v45, 2  ;;  %v7716_v20 = vrot.slane %v6190_v27, 1 }
 0x529   : > { %v2018_v11 = vsel %vm2002_vm13, %v2001_v59, %v7713_v37  ;;  %v2319_v29 = vadd.f32 %v2293_v43, %v5926_v45  ;;  %v7717_v36 = vrot.slane %v5937_v60, 1  ;;  %vm6536_vm10 = vcmp.eq.s32.totalorder %v2054_v10, 3 }
 0x52a   : > { %v2003_v31 = vsel %vm2002_vm13, %v7714_v52, %v2001_v59  ;;  %v2019_v17 = vadd.f32 %v2018_v11, %v1970_v48  ;;  %v2342_v47 = vsel %vm2339_vm7, %v7715_v46, %v2336_v38  ;;  %vm6540_vm11 = vcmp.eq.s32.totalorder %v2159_v62, 3 }
 0x52b   : > { %v2599_v43 = vsel %vm2290_vm5, %v7717_v36, %v7716_v20  ;;  %v2368_v48 = vadd.f32 %v2342_v47, %v2319_v29  ;;  %v7722_v37 = vrot.slane %v5926_v45, 3  ;;  %v7723_v46 = vrot.slane %v6190_v27, 2  ;;  %v6565_v41 = vpop.eup %3902 }
 0x52c   : > { %v2625_v52 = vadd.f32 %v2599_v43, %v5937_v60  ;;  %v7724_v10 = vrot.slane %v5937_v60, 2  ;;  %v2436_v20 = vrot.slane %v1885_v32, 7  ;;  %v2484_v36 = vrot.slane %v1885_v32, 6 }
 0x52d   : > { %v2391_v11 = vsel %vm2388_vm8, %v7722_v37, %v2385_v50  ;;  %v2532_v34 = vrot.slane %v1885_v32, 5  ;;  %v3015_v29 = vmul.f32 %v6086_v55, %v5980_v18  ;;  %v2034_v47 = vadd.f32 %v2003_v31, %v1985_v30 }
 0x52e   : > { %v2647_v62 = vsel %vm2339_vm7, %v7724_v10, %v7723_v46  ;;  %v2417_v45 = vadd.f32 %v2391_v11, %v2368_v48  ;;  %v7725_v37 = vrot.slane %v6190_v27, 3  ;;  %v7726_v43 = vrot.slane %v5937_v60, 3 }
 0x52f   : > { %v2673_v12 = vadd.f32 %v2647_v62, %v2625_v52  ;;  %v7727_v46 = vrot.slane %v6264_v13, 7  ;;  %v7728_v0 = vrot.slane %v5257_v15, 7  ;;  %v7729_v31 = vrot.slane %v6264_v13, 6 }
 0x530   : > { %v2695_v14 = vsel %vm2388_vm8, %v7726_v43, %v7725_v37  ;;  %v7730_v48 = vrot.slane %v5257_v15, 6  ;;  %v2744_v52 = vmul.f32 %v5862_v23, %v2417_v45  ;;  %v3016_v63 = vmul.f32 %v6086_v55, %v3015_v29 }
 0x531   : > { %v2437_v10 = vsel %vm1904_vm12, %v7727_v46, %v2436_v20  ;;  %v2452_v30 = vsel %vm1904_vm12, %v2436_v20, %v7728_v0  ;;  %v2485_v60 = vsel %vm1953_vm14, %v7729_v31, %v2484_v36  ;;  %v2721_v62 = vadd.f32 %v2695_v14, %v2673_v12 }
 0x532   : > { %v2500_v11 = vsel %vm1953_vm14, %v2484_v36, %v7730_v48  ;;  %v2453_v37 = vadd.f32 %v2452_v30, %v5257_v15  ;;  %v2468_v43 = vadd.f32 %v2437_v10, %v1885_v32  ;;  %v7731_v46 = vrot.slane %v6264_v13, 5  ;;  %2858 = vperm.xlu0 %3708, %v2744_v52  }
 0x533   : > { %v7732_v20 = vrot.slane %v5257_v15, 5  ;;  %v2280_v36 = vrot.slane %v6284_v3, 1  ;;  %v2760_v12 = vmul.f32 %v5862_v23, %v2721_v62  ;;  %v2776_v14 = vmul.f32 %v2744_v52, %v2744_v52 }
 0x534   : > { %v2533_v0 = vsel %vm2002_vm13, %v7731_v46, %v2532_v34  ;;  %v2501_v45 = vadd.f32 %v2500_v11, %v2453_v37  ;;  %v2516_v32 = vadd.f32 %v2485_v60, %v2468_v43  ;;  %v3017_v10 = vmul.f32 0.5, %v3016_v63 }
 0x535   : > { %v2548_v31 = vsel %vm2002_vm13, %v2532_v34, %v7732_v20  ;;  %v7733_v13 = vrot.slane %v6024_v9, 1  ;;  %v2329_v34 = vrot.slane %v6284_v3, 2  ;;  %v2378_v29 = vrot.slane %v6284_v3, 3 }
 0x536   : > { %v2792_v30 = vsub.f32 %v2760_v12, %v2776_v14  ;;  %v2549_v48 = vadd.f32 %v2548_v31, %v2501_v45  ;;  %v2564_v46 = vadd.f32 %v2533_v0, %v2516_v32  ;;  %v3018_v52 = vsub.f32 1.5, %v3017_v10 }
 0x537   : > { %v2300_v15 = vsel %vm2290_vm5, %v7733_v13, %v2280_v36  ;;  %vm3021_vm12 = vweird.f32 %v6086_v55  ;;  %v7734_v63 = vrot.slane %v6024_v9, 2  ;;  %v7735_v11 = vrot.slane %v6275_v26, 1 }
 0x538   : > { %v2312_v62 = vadd.f32 %v2300_v15, %v6024_v9  ;;  %v7736_v37 = vrot.slane %v6050_v8, 1  ;;  %v6618_v0 = vadd.f32 1e-05, %v2792_v30  ;;  %v6622_v20 = vsel %vm6536_vm10, %v2549_v48, 0.0 }
 0x539   : > { %v2349_v60 = vsel %vm2339_vm7, %v7734_v63, %v2329_v34  ;;  %v6626_v31 = vsel %vm6540_vm11, %v2564_v46, 0.0  ;;  %v6629_v14 = vadd.f32 %v2604_v40, %v6468_v39  ;;  %v2685_v45 = vrot.slane %v6472_v4, 3 }
 0x53a   : > { %v2606_v43 = vsel %vm2290_vm5, %v7736_v37, %v7735_v11  ;;  %v2361_v12 = vadd.f32 %v2349_v60, %v2312_v62  ;;  %v6634_v32 = vsel %vm6536_vm10, %v2019_v17, 0.0  ;;  %v6638_v10 = vsel %vm6540_vm11, %v2034_v47, 0.0 }
 0x53b   : > { %v7435_v13 = vrot.slane %v6622_v20, 1  ;;  %v3019_v15 = vmul.f32 %v6086_v55, %v3018_v52  ;;  %vm3020_vm14 = vweird.f32 %v5980_v18  ;;  %v7737_v40 = vrot.slane %v6024_v9, 3 }
 0x53c   : > { %v2596_v17 = vrot.slane %v6626_v31, 1  ;;  %v2629_v25 = vrot.slane %v6622_v20, 2  ;;  %vm3022_vm13 = vmor %vm3020_vm14, %vm3021_vm12  ;;  %v2618_v47 = vadd.f32 %v2606_v43, %v6050_v8  ;;  %3904 = vrsqrt.f32 %v6618_v0 }
 0x53d   : > { %v2398_v30 = vsel %vm2388_vm8, %v7737_v40, %v2378_v29  ;;  %v2644_v18 = vrot.slane %v6626_v31, 2  ;;  %v3023_v48 = vsel %vm3022_vm13, %v6086_v55, %v3019_v15  ;;  %v7738_v9 = vrot.slane %v6275_v26, 2 }
 0x53e   : > { %v2410_v59 = vadd.f32 %v2398_v30, %v2361_v12  ;;  %v7739_v46 = vrot.slane %v6050_v8, 2  ;;  %v2677_v52 = vrot.slane %v6622_v20, 3  ;;  %3131 = vperm.xlu1 %3709, %v3023_v48   ;;  %v2945_v11 = vmul.f32 %v6121_v2, %v6017_v33 }
 0x53f   : > { %v7740_v55 = vrot.slane %v6275_v26, 3  ;;  %v7741_v43 = vrot.slane %v6050_v8, 3  ;;  %v2288_v15 = vrot.slane %v6345_v22, 1  ;;  %v2337_v40 = vrot.slane %v6345_v22, 2 }
 0x540   : > { %v2654_v62 = vsel %vm2339_vm7, %v7739_v46, %v7738_v9  ;;  %v2737_v60 = vmul.f32 %v5862_v23, %v2410_v59  ;;  %v2946_v59 = vmul.f32 %v6121_v2, %v2945_v11  ;;  %v7742_v48 = vrot.slane %v6349_v56, 1 }
 0x541   : > { %v2666_v63 = vadd.f32 %v2654_v62, %v2618_v47  ;;  %v2702_v12 = vsel %vm2388_vm8, %v7741_v43, %v7740_v55  ;;  %v7436_v47 = vrot.slane %v6345_v22, 3  ;;  %v7743_v9 = vrot.slane %v6190_v27, 1 }
 0x542   : > { %2823 = vperm.xlu2 %3707, %v2737_v60   ;;  %v6690_v46 = vsel %vm2290_vm5, %v2596_v17, %v7435_v13  ;;  %vm2951_vm15 = vweird.f32 %v6121_v2  ;;  %v2292_v62 = vsel %vm2290_vm5, %v2287_v28, %v2288_v15  ;;  %v6700_v11 = vmul.f32 %v2737_v60, %v2737_v60  ;;  %v6709_v13 = vpop.eup %3904 }
 0x543   : > { %v2714_v30 = vadd.f32 %v2702_v12, %v2666_v63  ;;  %v2598_v8 = vsel %vm2290_vm5, %v7743_v9, %v7742_v48  ;;  %v2947_v55 = vmul.f32 0.5, %v2946_v59  ;;  %v2320_v43 = vadd.f32 %v2292_v62, %v6145_v57 }
 0x544   : > { %v2626_v63 = vadd.f32 %v2598_v8, %v6190_v27  ;;  %v7744_v12 = vrot.slane %v6349_v56, 2  ;;  %v7745_v48 = vrot.slane %v6190_v27, 2  ;;  %v2341_v28 = vsel %vm2339_vm7, %v2336_v38, %v2337_v40 }
 0x545   : > { %v2753_v37 = vmul.f32 %v5862_v23, %v2714_v30  ;;  %v3025_v59 = vmul.f32 %v6317_v16, %v6186_v6  ;;  %v2948_v8 = vsub.f32 1.5, %v2947_v55  ;;  %v2369_v62 = vadd.f32 %v2341_v28, %v2320_v43 }
 0x546   : > { %v2646_v9 = vsel %vm2339_vm7, %v7745_v48, %v7744_v12  ;;  %v2390_v30 = vsel %vm2388_vm8, %v2385_v50, %v7436_v47  ;;  %v7746_v12 = vrot.slane %v6349_v56, 3  ;;  %v7747_v48 = vrot.slane %v6190_v27, 3 }
 0x547   : > { %v2674_v60 = vadd.f32 %v2646_v9, %v2626_v63  ;;  %v3026_v9 = vmul.f32 %v6317_v16, %v3025_v59  ;;  %v2281_v55 = vrot.slane %v6477_v44, 1  ;;  %v2330_v43 = vrot.slane %v6477_v44, 2 }
 0x548   : > { %v2694_v38 = vsel %vm2388_vm8, %v7747_v48, %v7746_v12  ;;  %v2949_v28 = vmul.f32 %v6121_v2, %v2948_v8  ;;  %vm2950_vm0 = vweird.f32 %v6017_v33  ;;  %v2418_v57 = vadd.f32 %v2390_v30, %v2369_v62 }
 0x549   : > { %v2722_v63 = vadd.f32 %v2694_v38, %v2674_v60  ;;  %v2379_v50 = vrot.slane %v6477_v44, 3  ;;  %v2785_v47 = vsub.f32 %v2753_v37, %v6700_v11  ;;  %vm2952_vm1 = vmor %vm2950_vm0, %vm2951_vm15  ;;  %v3027_v27 = vmul.f32 0.5, %v3026_v9 }
 0x54a   : > { %vm3030_vm2 = vweird.f32 %v6186_v6  ;;  %v2299_v60 = vsel %vm2290_vm5, %v2280_v36, %v2281_v55  ;;  %v2953_v59 = vsel %vm2952_vm1, %v6121_v2, %v2949_v28  ;;  %v2745_v33 = vmul.f32 %v5862_v23, %v2418_v57 }
 0x54b   : > { %v2761_v8 = vmul.f32 %v5862_v23, %v2722_v63  ;;  %v2313_v62 = vadd.f32 %v2299_v60, %v6284_v3  ;;  %3096 = vperm.xlu0 %3708, %v2953_v59   ;;  %v3028_v37 = vsub.f32 1.5, %v3027_v27  ;;  %vm3031_vm3 = vweird.f32 %v6317_v16 }
 0x54c   : > { %v2348_v11 = vsel %vm2339_vm7, %v2329_v34, %v2330_v43  ;;  %v7748_v30 = vrot.slane %v6468_v39, 1  ;;  %v7749_v36 = vrot.slane %v6275_v26, 1  ;;  %2863 = vperm.xlu1 %3709, %v2745_v33   ;;  %v2777_v12 = vmul.f32 %v2745_v33, %v2745_v33  ;;  %vm3032_vm4 = vmor %vm3030_vm2, %vm3031_vm3 }
 0x54d   : > { %v2362_v48 = vadd.f32 %v2348_v11, %v2313_v62  ;;  %v2397_v38 = vsel %vm2388_vm8, %v2378_v29, %v2379_v50  ;;  %v3029_v9 = vmul.f32 %v6317_v16, %v3028_v37  ;;  %v7750_v34 = vrot.slane %v6468_v39, 2 }
 0x54e   : > { %v2605_v2 = vsel %vm2290_vm5, %v7749_v36, %v7748_v30  ;;  %v7751_v28 = vrot.slane %v6275_v26, 2  ;;  %v2282_v27 = vrot.slane %v6481_v58, 1  ;;  %v2331_v60 = vrot.slane %v6481_v58, 2 }
 0x54f   : > { %v2619_v63 = vadd.f32 %v2605_v2, %v6275_v26  ;;  %v2793_v59 = vsub.f32 %v2761_v8, %v2777_v12  ;;  %v2411_v3 = vadd.f32 %v2397_v38, %v2362_v48  ;;  %v2380_v33 = vrot.slane %v6481_v58, 3 }
 0x550   : > { %v2653_v57 = vsel %vm2339_vm7, %v7751_v28, %v7750_v34  ;;  %v7752_v62 = vrot.slane %v6349_v56, 1  ;;  %v3033_v11 = vsel %vm3032_vm4, %v6317_v16, %v3029_v9  ;;  %v7753_v30 = vrot.slane %v6468_v39, 3 }
 0x551   : > { %v2667_v29 = vadd.f32 %v2653_v57, %v2619_v63  ;;  %v7754_v8 = vrot.slane %v6275_v26, 3  ;;  %v2298_v36 = vsel %vm2290_vm5, %v2281_v55, %v2282_v27  ;;  %3136 = vperm.xlu2 %3707, %v3033_v11   ;;  %v2738_v2 = vmul.f32 %v5862_v23, %v2411_v3 }
 0x552   : > { %v6784_v37 = vsel %vm2290_vm5, %v7752_v62, %v2596_v17  ;;  %v2314_v48 = vadd.f32 %v2298_v36, %v6477_v44  ;;  %v7755_v17 = vrot.slane %v6472_v4, 2  ;;  %v7756_v16 = vmov %v7750_v34 }
 0x553   : > { %v2701_v6 = vsel %vm2388_vm8, %v7754_v8, %v7753_v30  ;;  %v2628_v26 = vadd.f32 %v6690_v46, %v6626_v31  ;;  %v2347_v63 = vsel %vm2339_vm7, %v2330_v43, %v2331_v60  ;;  %v7757_v9 = vrot.slane %v5510_v49, 1  ;;  %2828 = vperm.xlu0 %3708, %v2738_v2  }
 0x554   : > { %v2715_v12 = vadd.f32 %v2701_v6, %v2667_v29  ;;  %v2652_v38 = vsel %vm2339_vm7, %v7756_v16, %v7755_v17  ;;  %v6812_v34 = vadd.f32 1e-05, %v2785_v47  ;;  %v6814_v28 = vadd.f32 1e-05, %v2793_v59 }
 0x555   : > { %v2668_v55 = vadd.f32 %v2652_v38, %v6629_v14  ;;  %v2297_v44 = vsel %vm2290_vm5, %v2282_v27, %v7757_v9  ;;  %v2363_v57 = vadd.f32 %v2347_v63, %v2314_v48  ;;  %v2396_v3 = vsel %vm2388_vm8, %v2379_v50, %v2380_v33 }
 0x556   : > { %v7758_v46 = vmov %v7753_v30  ;;  %v2315_v43 = vadd.f32 %v2297_v44, %v6481_v58  ;;  %v7759_v27 = vrot.slane %v5510_v49, 2  ;;  %v7760_v59 = vrot.slane %v5456_v51, 1 }
 0x557   : > { %v2700_v14 = vsel %vm2388_vm8, %v7758_v46, %v2685_v45  ;;  %v7761_v29 = vrot.slane %v6472_v4, 1  ;;  %v2754_v62 = vmul.f32 %v5862_v23, %v2715_v12  ;;  %v2770_v39 = vmul.f32 %v2738_v2, %v2738_v2 }
 0x558   : > { %v2346_v47 = vsel %vm2339_vm7, %v2331_v60, %v7759_v27  ;;  %v2412_v11 = vadd.f32 %v2396_v3, %v2363_v57  ;;  %v2716_v8 = vadd.f32 %v2700_v14, %v2668_v55  ;;  %v7762_v6 = vrot.slane %v5456_v51, 2 }
 0x559   : > { %v2603_v50 = vsel %vm2290_vm5, %v7761_v29, %v7760_v59  ;;  %v2364_v58 = vadd.f32 %v2346_v47, %v2315_v43  ;;  %v7763_v36 = vmov %v7755_v17  ;;  %v2274_v48 = vrot.slane %v6634_v32, 1 }
 0x55a   : > { %v2621_v30 = vadd.f32 %v2603_v50, %v6472_v4  ;;  %v2651_v60 = vsel %vm2339_vm7, %v7763_v36, %v7762_v6  ;;  %v2739_v17 = vmul.f32 %v5862_v23, %v2412_v11  ;;  %v7764_v16 = vrot.slane %v5510_v49, 3 }
 0x55b   : > { %v2289_v38 = vrot.slane %v6638_v10, 1  ;;  %v7765_v55 = vrot.slane %v5456_v51, 3  ;;  %v2323_v44 = vrot.slane %v6634_v32, 2  ;;  %v2338_v57 = vrot.slane %v6638_v10, 2 }
 0x55c   : > { %v2395_v2 = vsel %vm2388_vm8, %v2380_v33, %v7764_v16  ;;  %v2669_v12 = vadd.f32 %v2651_v60, %v2621_v30  ;;  %3906 = vrsqrt.f32 %v6812_v34  ;;  %2833 = vperm.xlu1 %3709, %v2739_v17   ;;  %v2372_v3 = vrot.slane %v6634_v32, 3 }
 0x55d   : > { %v2413_v63 = vadd.f32 %v2395_v2, %v2364_v58  ;;  %v2699_v9 = vsel %vm2388_vm8, %v2685_v45, %v7765_v55  ;;  %v2306_v33 = vsel %vm2290_vm5, %v2289_v38, %v2274_v48  ;;  %v2786_v46 = vsub.f32 %v2754_v62, %v2770_v39 }
 0x55e   : > { %v2717_v49 = vadd.f32 %v2699_v9, %v2669_v12  ;;  %v2322_v4 = vadd.f32 %v2306_v33, %v6638_v10  ;;  %v2387_v45 = vrot.slane %v6638_v10, 3  ;;  %v2755_v14 = vmul.f32 %v5862_v23, %v2716_v8 }
 0x55f   : > { %v2740_v51 = vmul.f32 %v5862_v23, %v2413_v63  ;;  %v2355_v27 = vsel %vm2339_vm7, %v2338_v57, %v2323_v44  ;;  %v2660_v47 = vsel %vm2339_vm7, %v2644_v18, %v2629_v25  ;;  %3908 = vrsqrt.f32 %v6814_v28 }
 0x560   : > { %v2756_v43 = vmul.f32 %v5862_v23, %v2717_v49  ;;  %v2771_v59 = vmul.f32 %v2739_v17, %v2739_v17  ;;  %v2371_v10 = vadd.f32 %v2355_v27, %v2322_v4  ;;  %v2676_v29 = vadd.f32 %v2660_v47, %v2628_v26 }
 0x561   : > { %2838 = vperm.xlu2 %3707, %v2740_v51   ;;  %v2772_v50 = vmul.f32 %v2740_v51, %v2740_v51  ;;  %v2404_v62 = vsel %vm2388_vm8, %v2387_v45, %v2372_v3  ;;  %v7766_v39 = vrot.slane %v6626_v31, 3  ;;  %v2955_v30 = vmul.f32 %v6396_v1, %v6295_v21 }
 0x562   : > { %v6890_v8 = vadd.f32 1e-05, %v2786_v46  ;;  %v2420_v58 = vadd.f32 %v2404_v62, %v2371_v10  ;;  %v2291_v6 = vsel %vm2290_vm5, %v2288_v15, %v2289_v38  ;;  %v6896_v36 = vpop.eup %3906  ;;  %v2787_v60 = vsub.f32 %v2755_v14, %v2771_v59 }
 0x563   : > { %v2708_v11 = vsel %vm2388_vm8, %v7766_v39, %v2677_v52  ;;  %v2788_v17 = vsub.f32 %v2756_v43, %v2772_v50  ;;  %v2956_v16 = vmul.f32 %v6396_v1, %v2955_v30  ;;  %v2321_v2 = vadd.f32 %v2291_v6, %v6345_v22 }
 0x564   : > { %v2724_v26 = vadd.f32 %v2708_v11, %v2676_v29  ;;  %v2747_v12 = vmul.f32 %v5862_v23, %v2420_v58  ;;  %vm2960_vm6 = vweird.f32 %v6295_v21  ;;  %v2340_v55 = vsel %vm2339_vm7, %v2337_v40, %v2338_v57 }
 0x565   : > { %v2957_v15 = vmul.f32 0.5, %v2956_v16  ;;  %vm2961_vm9 = vweird.f32 %v6396_v1  ;;  %v2370_v38 = vadd.f32 %v2340_v55, %v2321_v2  ;;  %v2627_v9 = vadd.f32 %v6784_v37, %v6349_v56  ;;  %v6910_v49 = vpop.eup %3908 }
 0x566   : > { %v2763_v63 = vmul.f32 %v5862_v23, %v2724_v26  ;;  %2873 = vperm.xlu0 %3708, %v2747_v12   ;;  %v2779_v33 = vmul.f32 %v2747_v12, %v2747_v12  ;;  %v7767_v46 = vrot.slane %v6345_v22, 3  ;;  %v7768_v40 = vrot.slane %v6349_v56, 2  ;;  %vm2962_vm10 = vmor %vm2960_vm6, %vm2961_vm9 }
 0x567   : > { %v3035_v4 = vmul.f32 %v6423_v24, %v6327_v7  ;;  %v6924_v37 = vadd.f32 1e-05, %v2788_v17  ;;  %v2958_v14 = vsub.f32 1.5, %v2957_v15  ;;  %v7769_v22 = vmov %v7766_v39 }
 0x568   : > { %v2389_v51 = vsel %vm2388_vm8, %v7767_v46, %v2387_v45  ;;  %v2645_v57 = vsel %vm2339_vm7, %v7768_v40, %v2644_v18  ;;  %v2795_v47 = vsub.f32 %v2763_v63, %v2779_v33  ;;  %v7770_v45 = vrot.slane %v6349_v56, 3 }
 0x569   : > { %v2419_v43 = vadd.f32 %v2389_v51, %v2370_v38  ;;  %v2675_v27 = vadd.f32 %v2645_v57, %v2627_v9  ;;  %v3036_v10 = vmul.f32 %v6423_v24, %v3035_v4  ;;  %v7771_v18 = vrot.slane %v5390_v19, 1 }
 0x56a   : > { %v2693_v59 = vsel %vm2388_vm8, %v7770_v45, %v7769_v22  ;;  %v2959_v50 = vmul.f32 %v6396_v1, %v2958_v14  ;;  %3910 = vrsqrt.f32 %v6890_v8  ;;  %v6941_v56 = vadd.f32 1e-05, %v2787_v60 }
 0x56b   : > { %v2305_v29 = vsel %vm2290_vm5, %v2274_v48, %v7771_v18  ;;  %v2723_v62 = vadd.f32 %v2693_v59, %v2675_v27  ;;  %v2746_v39 = vmul.f32 %v5862_v23, %v2419_v43  ;;  %v3037_v31 = vmul.f32 0.5, %v3036_v10 }
 0x56c   : > { %v2307_v11 = vadd.f32 %v2305_v29, %v6634_v32  ;;  %v7772_v30 = vrot.slane %v5390_v19, 2  ;;  %3912 = vrsqrt.f32 %v6924_v37  ;;  %v2963_v58 = vsel %vm2962_vm10, %v6396_v1, %v2959_v50 }
 0x56d   : > { %2868 = vperm.xlu2 %3707, %v2746_v39   ;;  %vm3040_vm11 = vweird.f32 %v6327_v7  ;;  %3101 = vperm.xlu1 %3709, %v2963_v58   ;;  %v3038_v6 = vsub.f32 1.5, %v3037_v31  ;;  %vm3041_vm12 = vweird.f32 %v6423_v24  ;;  %v7773_v21 = vrot.slane %v5390_v19, 3  ;;  %v7025_v31 = vpop.permute.xlu2 %2808 }
 0x56e   : > { %v2354_v48 = vsel %vm2339_vm7, %v2323_v44, %v7772_v30  ;;  %v7774_v44 = vrot.slane %v5424_v42, 1  ;;  %v7775_v17 = vrot.slane %v6622_v20, 1  ;;  %v6969_v16 = vadd.f32 1e-05, %v2795_v47 }
 0x56f   : > { %v2356_v26 = vadd.f32 %v2354_v48, %v2307_v11  ;;  %v2403_v60 = vsel %vm2388_vm8, %v2372_v3, %v7773_v21  ;;  %v6972_v2 = vmul.f32 %v5862_v23, %v2723_v62  ;;  %v6975_v63 = vmul.f32 %v2746_v39, %v2746_v39 }
 0x570   : > { %v2611_v1 = vsel %vm2290_vm5, %v7775_v17, %v7774_v44  ;;  %v3039_v32 = vmul.f32 %v6423_v24, %v3038_v6  ;;  %v7776_v3 = vrot.slane %v5424_v42, 2  ;;  %v2965_v15 = vmul.f32 %v6565_v41, %v6483_v35  ;;  %vm3042_vm5 = vmor %vm3040_vm11, %vm3041_vm12  ;;  %v6992_v46 = vpop.eup %3910 }
 0x571   : > { %v2405_v12 = vadd.f32 %v2403_v60, %v2356_v26  ;;  %v2613_v19 = vadd.f32 %v2611_v1, %v6622_v20  ;;  %3914 = vrsqrt.f32 %v6941_v56  ;;  %v2975_v33 = vmul.f32 %v6896_v36, %v6812_v34 }
 0x572   : > { %v2659_v55 = vsel %vm2339_vm7, %v2629_v25, %v7776_v3  ;;  %v3043_v51 = vsel %vm3042_vm5, %v6423_v24, %v3039_v32  ;;  %v7777_v25 = vrot.slane %v5424_v42, 3  ;;  %v2966_v7 = vmul.f32 %v6565_v41, %v2965_v15  ;;  %v7004_v4 = vpop.eup %3912 }
 0x573   : > { %v2661_v38 = vadd.f32 %v2659_v55, %v2613_v19  ;;  %v2732_v9 = vmul.f32 %v5862_v23, %v2405_v12  ;;  %v3045_v57 = vmul.f32 %v6709_v13, %v6618_v0  ;;  %3916 = vrsqrt.f32 %v6969_v16  ;;  %3141 = vperm.xlu0 %3708, %v3043_v51  }
 0x574   : > { %v2707_v40 = vsel %vm2388_vm8, %v2677_v52, %v7777_v25  ;;  %v2976_v24 = vmul.f32 %v6896_v36, %v2975_v33  ;;  %v2794_v42 = vsub.f32 %v6972_v2, %v6975_v63  ;;  %v2967_v20 = vmul.f32 0.5, %v2966_v7 }
 0x575   : > { %v2709_v14 = vadd.f32 %v2707_v40, %v2661_v38  ;;  %v2764_v43 = vmul.f32 %v2732_v9, %v2732_v9  ;;  %v3046_v5 = vmul.f32 %v6709_v13, %v3045_v57  ;;  %v3055_v52 = vmul.f32 %v6910_v49, %v6814_v28  ;;  %2798 = vperm.xlu1 %3709, %v2732_v9   ;;  %v7057_v32 = vpop.permute.xlu2 %2853 }
 0x576   : > { %vm2970_vm7 = vweird.f32 %v6483_v35  ;;  %vm2971_vm8 = vweird.f32 %v6565_v41  ;;  %v2977_v47 = vmul.f32 0.5, %v2976_v24  ;;  %v2968_v22 = vsub.f32 1.5, %v2967_v20 }
 0x577   : > { %v2748_v27 = vmul.f32 %v5862_v23, %v2709_v14  ;;  %v3047_v45 = vmul.f32 0.5, %v3046_v5  ;;  %v3056_v59 = vmul.f32 %v6910_v49, %v3055_v52  ;;  %v3005_v10 = vmul.f32 %v7004_v4, %v6924_v37  ;;  %v7019_v18 = vpop.eup %3914  ;;  %vm2972_vm15 = vmor %vm2970_vm7, %vm2971_vm8  ;;  %v2804_v14 = vpop.permute.xlu0 %2803 }
 0x578   : > { %v2978_v50 = vsub.f32 1.5, %v2977_v47  ;;  %vm2980_vm14 = vweird.f32 %v6812_v34  ;;  %vm2981_vm13 = vweird.f32 %v6896_v36  ;;  %v2969_v23 = vmul.f32 %v6565_v41, %v2968_v22 }
 0x579   : > { %v2780_v29 = vsub.f32 %v2748_v27, %v2764_v43  ;;  %v3048_v62 = vsub.f32 1.5, %v3047_v45  ;;  %v3057_v39 = vmul.f32 0.5, %v3056_v59  ;;  %v3006_v11 = vmul.f32 %v7004_v4, %v3005_v10  ;;  %v7027_v30 = vpop.eup %3916  ;;  %vm2982_vm1 = vmor %vm2980_vm14, %vm2981_vm13  ;;  %v7778_v10 = vld [vmem:[#allocation50_spill] sm:$0xff] }
 0x57a   : > { %v2979_v34 = vmul.f32 %v6896_v36, %v2978_v50  ;;  %vm3051_vm0 = vweird.f32 %v6709_v13  ;;  %v2985_v58 = vmul.f32 %v6992_v46, %v6890_v8  ;;  %v2973_v26 = vsel %vm2972_vm15, %v6565_v41, %v2969_v23  ;;  %v1756_v23 = vld [vmem:[%s7311_s9 + $0x70] sm:$0xff] }
 0x57b   : > { %v7029_v48 = vadd.f32 1e-05, %v2780_v29  ;;  %v3049_v6 = vmul.f32 %v6709_v13, %v3048_v62  ;;  %v3058_v21 = vsub.f32 1.5, %v3057_v39  ;;  %v3007_v60 = vmul.f32 0.5, %v3006_v11  ;;  %3106 = vperm.xlu2 %3707, %v2973_v26   ;;  %v3923_v11 = vld [vmem:[%s4044_s18 + $0x18] sm:$0xff] }
 0x57c   : > { %v2983_v35 = vsel %vm2982_vm1, %v6896_v36, %v2979_v34  ;;  %vm3050_vm2 = vweird.f32 %v6618_v0  ;;  %v2986_v44 = vmul.f32 %v6992_v46, %v2985_v58  ;;  %v2995_v41 = vmul.f32 %v7019_v18, %v6941_v56 }
 0x57d   : > { %3918 = vrsqrt.f32 %v7029_v48  ;;  %3111 = vperm.xlu0 %3708, %v2983_v35   ;;  %vm3052_vm3 = vmor %vm3050_vm2, %vm3051_vm0  ;;  %v3008_v17 = vsub.f32 1.5, %v3007_v60  ;;  %v7048_v12 = vadd.f32 1e-05, %v2794_v42  ;;  %v3059_v19 = vmul.f32 %v6910_v49, %v3058_v21  ;;  %v3092_v52 = vpop.permute.xlu2 %3091  ;;  %v1755_v21 = vld [vmem:[%s7311_s9 + $0x68] sm:$0xff]  ;;  %v2849_v60 = vpop.permute.xlu1 %2848 }
 0x57e   : > { %v3053_v1 = vsel %vm3052_vm3, %v6709_v13, %v3049_v6  ;;  %v2987_v2 = vmul.f32 0.5, %v2986_v44  ;;  %vm3061_vm4 = vweird.f32 %v6910_v49  ;;  %v2996_v0 = vmul.f32 %v7019_v18, %v2995_v41  ;;  %v1757_v6 = vld [vmem:[%s7311_s9 + $0x78] sm:$0xff]  ;;  %v7779_v44 = vld [vmem:[#allocation11_spill] sm:$0xff]  ;;  %v7780_v41 = vld [vmem:[#allocation12_spill] sm:$0xff] }
 0x57f   : > { %3146 = vperm.xlu1 %3709, %v3053_v1   ;;  %v3009_v36 = vmul.f32 %v7004_v4, %v3008_v17  ;;  %vm3011_vm6 = vweird.f32 %v7004_v4  ;;  %3920 = vrsqrt.f32 %v7048_v12  ;;  %vm3060_vm9 = vweird.f32 %v6814_v28  ;;  %v2844_v35 = vpop.permute.xlu0 %2843 }
 0x580   : > { %v2988_v63 = vsub.f32 1.5, %v2987_v2  ;;  %v2997_v13 = vmul.f32 0.5, %v2996_v0  ;;  %vm3062_vm10 = vmor %vm3060_vm9, %vm3061_vm4  ;;  %vm3010_vm11 = vweird.f32 %v6924_v37  ;;  %vm2991_vm12 = vweird.f32 %v6992_v46 }
 0x581   : > { %v3075_v15 = vmul.f32 %v7027_v30, %v6969_v16  ;;  %v3063_v38 = vsel %vm3062_vm10, %v6910_v49, %v3059_v19  ;;  %vm3012_vm5 = vmor %vm3010_vm11, %vm3011_vm6  ;;  %vm2990_vm7 = vweird.f32 %v6890_v8  ;;  %vm3001_vm14 = vweird.f32 %v7019_v18 }
 0x582   : > { %v2989_v55 = vmul.f32 %v6992_v46, %v2988_v63  ;;  %v2998_v9 = vsub.f32 1.5, %v2997_v13  ;;  %v3013_v33 = vsel %vm3012_vm5, %v7004_v4, %v3009_v36  ;;  %vm2992_vm8 = vmor %vm2990_vm7, %vm2991_vm12  ;;  %vm3000_vm13 = vweird.f32 %v6941_v56  ;;  %v7781_v36 = vld [vmem:[#allocation27_spill] sm:$0xff] }
 0x583   : > { %v3919_v3 = vpop.eup %3918  ;;  %3151 = vperm.xlu2 %3707, %v3063_v38   ;;  %v3076_v40 = vmul.f32 %v7027_v30, %v3075_v15  ;;  %vm3002_vm15 = vmor %vm3000_vm13, %vm3001_vm14  ;;  %v2879_v24 = vsub.f32 %v5059_v54, %v2804_v14  ;;  %vm2930_vm1 = vweird.f32 %v7029_v48  ;;  %vm3070_vm4 = vweird.f32 %v7048_v12  ;;  %v7783_v38 = vld [vmem:[#allocation6_spill] sm:$0xff] }
 0x584   : > { %v2925_v28 = vmul.f32 %v3919_v3, %v7029_v48  ;;  %v2993_v25 = vsel %vm2992_vm8, %v6992_v46, %v2989_v55  ;;  %v2999_v49 = vmul.f32 %v7019_v18, %v2998_v9  ;;  %vm2931_vm0 = vweird.f32 %v3919_v3 }
 0x585   : > { %3126 = vperm.xlu0 %3708, %v3013_v33   ;;  %v3921_v51 = vpop.eup %3920  ;;  %v3077_v43 = vmul.f32 0.5, %v3076_v40  ;;  %v2878_v46 = vsub.f32 %v5057_v61, %v2804_v14  ;;  %v3167_v47 = vmul.f32 %v3092_v52, %v2879_v24  ;;  %vm2932_vm3 = vmor %vm2930_vm1, %vm2931_vm0  ;;  %vm3081_vm9 = vweird.f32 %v7027_v30 }
 0x586   : > { %v2926_v37 = vmul.f32 %v3919_v3, %v2925_v28  ;;  %v3065_v7 = vmul.f32 %v3921_v51, %v7048_v12  ;;  %v3003_v42 = vsel %vm3002_vm15, %v7019_v18, %v2999_v49  ;;  %vm3071_vm2 = vweird.f32 %v3921_v51  ;;  %v7784_v28 = vld [vmem:[#allocation7_spill] sm:$0xff] }
 0x587   : > { %3116 = vperm.xlu1 %3709, %v2993_v25   ;;  %v3166_v27 = vmul.f32 %v3092_v52, %v2878_v46  ;;  %v3078_v45 = vsub.f32 1.5, %v3077_v43  ;;  %v3279_v54 = vmul.f32 %v5081_v53, %v3167_v47  ;;  %vm3072_vm6 = vmor %vm3070_vm4, %vm3071_vm2  ;;  %vm3080_vm10 = vweird.f32 %v6969_v16  ;;  %v7113_v12 = vpop.permute.xlu0 %2813  ;;  %v3925_v25 = vld [vmem:[%s4044_s18 + $0xa8] sm:$0xff]  ;;  %v7785_v43 = vld [vmem:[#allocation30_spill] sm:$0xff] }
 0x588   : > { %v2927_v57 = vmul.f32 0.5, %v2926_v37  ;;  %v3066_v8 = vmul.f32 %v3921_v51, %v3065_v7  ;;  %vm3082_vm11 = vmor %vm3080_vm10, %vm3081_vm9  ;;  %v2896_v17 = vsub.f32 %v7779_v44, %v2849_v60  ;;  %v2897_v1 = vsub.f32 %v7780_v41, %v2849_v60  ;;  %v3924_v37 = vld [vmem:[%s4044_s18 + $0xa0] sm:$0xff]  ;;  %v3926_v52 = vld [vmem:[%s4044_s18 + $0x90] sm:$0xff] }
 0x589   : > { %v3278_v61 = vmul.f32 %v5081_v53, %v3166_v27  ;;  %v3391_v29 = vadd.f32 %v7778_v10, %v3279_v54  ;;  %v3079_v62 = vmul.f32 %v7027_v30, %v3078_v45  ;;  %v3922_v53 = vld [vmem:[%s4044_s18 + $0x10] sm:$0xff]  ;;  %v2894_v9 = vsub.f32 %v7783_v38, %v2844_v35  ;;  %v3927_v47 = vld [vmem:[%s4044_s18 + $0x98] sm:$0xff] }
 0x58a   : > { %v2928_v4 = vsub.f32 1.5, %v2927_v57  ;;  %v3067_v20 = vmul.f32 0.5, %v3066_v8  ;;  %v2895_v33 = vsub.f32 %v7784_v28, %v2844_v35  ;;  %v7787_v54 = vld [vmem:[#allocation8_spill] sm:$0xff]  ;;  %v7791_v41 = vld [vmem:[#allocation21_spill] sm:$0xff] }
 0x58b   : > { %3121 = vperm.xlu2 %3707, %v3003_v42   ;;  %v3390_v18 = vadd.f32 %v7778_v10, %v3278_v61  ;;  %v3423_v48 = vadd.f32 %v3923_v11, %v3391_v29  ;;  %v3083_v26 = vsel %vm3082_vm11, %v7027_v30, %v3079_v62  ;;  %v7786_v42 = vld [vmem:[#allocation54_spill] sm:$0xff]  ;;  %v7788_v10 = vld [vmem:[#allocation9_spill] sm:$0xff]  ;;  %v7789_v62 = vld [vmem:[#allocation19_spill] sm:$0xff] }
 0x58c   : > { %v2929_v5 = vmul.f32 %v3919_v3, %v2928_v4  ;;  %v3068_v56 = vsub.f32 1.5, %v3067_v20  ;;  %v7790_v11 = vld [vmem:[#allocation49_spill] sm:$0xff] }
 0x58d   : > { %v3422_v39 = vadd.f32 %v3922_v53, %v3390_v18  ;;  %v3455_v58 = vmax.f32 %v3423_v48, 0.0  ;;  %v2881_v18 = vsub.f32 %v7788_v10, %v7025_v31  ;;  %v7794_v38 = vld [vmem:[#allocation53_spill] sm:$0xff]  ;;  %v7802_v10 = vld [vmem:[#allocation48_spill] sm:$0xff] }
 0x58e   : > { %v2933_v22 = vsel %vm2932_vm3, %v3919_v3, %v2929_v5  ;;  %v3069_v59 = vmul.f32 %v3921_v51, %v3068_v56  ;;  %v7782_v3 = vld [vmem:[#allocation59_spill] sm:$0xff] }
 0x58f   : > { %3086 = vperm.xlu1 %3709, %v2933_v22   ;;  %v3454_v34 = vmax.f32 %v3422_v39, 0.0  ;;  %3487 = vst [vmem:[%s7095_s21 + $0x18] sm:$0xff] %v3455_v58  ;;  %v7109_v30 = vpop.permute.xlu1 %2818 }
 0x590   : > { %v3073_v50 = vsel %vm3072_vm6, %v3921_v51, %v3069_v59  ;;  %v2880_v59 = vsub.f32 %v7787_v54, %v7025_v31  ;;  %v3929_v31 = vld [vmem:[%s4044_s18 + $0x28] sm:$0xff] }
 0x591   : > { %3156 = vperm.xlu0 %3708, %v3073_v50   ;;  %3486 = vst [vmem:[%s7095_s21 + $0x10] sm:$0xff] %v3454_v34 }
 0x593   : > { %3380 = vperm.xlu2 %3707, %v1756_v23  }
 0x597   : > { %3161 = vperm.xlu1 %3709, %v3083_v26   ;;  %v3928_v26 = vld [vmem:[%s4044_s18 + $0x20] sm:$0xff] }
 0x599   : > { %3385 = vperm.xlu0 %3708, %v1757_v6  }
 0x59c   : > { %v7107_v16 = vpop.permute.xlu2 %2823 }
 0x59f   : > { %3375 = vperm.xlu1 %3709, %v1755_v21  }
 0x5a4   : > { %v7123_v14 = vpop.permute.xlu0 %2858 }
 0x5ab   : > { %v3137_v2 = vpop.permute.xlu2 %3136 }
 0x5ac   : > { %v3184_v19 = vmul.f32 %v3137_v2, %v2896_v17  ;;  %v3185_v0 = vmul.f32 %v3137_v2, %v2897_v1  ;;  %v2884_v1 = vsub.f32 %v7791_v41, %v7109_v30  ;;  %v7792_v2 = vld [vmem:[#allocation22_spill] sm:$0xff] }
 0x5ae   : > { %v3296_v63 = vmul.f32 %v7781_v36, %v3184_v19  ;;  %v3297_v13 = vmul.f32 %v7781_v36, %v3185_v0  ;;  %v2885_v19 = vsub.f32 %v7792_v2, %v7109_v30 }
 0x5b0   : > { %v3408_v55 = vadd.f32 %v7782_v3, %v3296_v63  ;;  %v3409_v15 = vadd.f32 %v7782_v3, %v3297_v13  ;;  %v3132_v49 = vpop.permute.xlu1 %3131  ;;  %v7793_v3 = vld [vmem:[#allocation15_spill] sm:$0xff] }
 0x5b1   : > { %v3182_v8 = vmul.f32 %v3132_v49, %v2894_v9  ;;  %v3183_v4 = vmul.f32 %v3132_v49, %v2895_v33 }
 0x5b2   : > { %v3440_v51 = vadd.f32 %v3924_v37, %v3408_v55  ;;  %v3441_v40 = vadd.f32 %v3925_v25, %v3409_v15  ;;  %v3930_v37 = vld [vmem:[%s4044_s18 + $0x40] sm:$0xff]  ;;  %v3931_v25 = vld [vmem:[%s4044_s18 + $0x48] sm:$0xff] }
 0x5b3   : > { %v3294_v46 = vmul.f32 %v7785_v43, %v3182_v8  ;;  %v3295_v24 = vmul.f32 %v7785_v43, %v3183_v4  ;;  %v7796_v4 = vld [vmem:[#allocation14_spill] sm:$0xff] }
 0x5b4   : > { %v3472_v7 = vmax.f32 %v3440_v51, 0.0  ;;  %v3473_v57 = vmax.f32 %v3441_v40, 0.0  ;;  %v2883_v43 = vsub.f32 %v7796_v4, %v7113_v12  ;;  %v7809_v4 = vld [vmem:[#allocation24_spill] sm:$0xff] }
 0x5b5   : > { %v3406_v20 = vadd.f32 %v7786_v42, %v3294_v46  ;;  %v3407_v5 = vadd.f32 %v7786_v42, %v3295_v24 }
 0x5b6   : > { %3504 = vst [vmem:[%s7095_s21 + $0xa0] sm:$0xff] %v3472_v7 }
 0x5b7   : > { %3505 = vst [vmem:[%s7095_s21 + $0xa8] sm:$0xff] %v3473_v57  ;;  %v3438_v27 = vadd.f32 %v3926_v52, %v3406_v20  ;;  %v3439_v56 = vadd.f32 %v3927_v47, %v3407_v5  ;;  %v7795_v57 = vld [vmem:[#allocation13_spill] sm:$0xff]  ;;  %v7797_v20 = vld [vmem:[#allocation16_spill] sm:$0xff] }
 0x5b8   : > { %v2882_v8 = vsub.f32 %v7795_v57, %v7113_v12  ;;  %v7801_v12 = vld [vmem:[#allocation44_spill] sm:$0xff]  ;;  %v7808_v57 = vld [vmem:[#allocation29_spill] sm:$0xff] }
 0x5b9   : > { %v3470_v45 = vmax.f32 %v3438_v27, 0.0  ;;  %v3471_v61 = vmax.f32 %v3439_v56, 0.0  ;;  %v7798_v27 = vld [vmem:[#allocation17_spill] sm:$0xff]  ;;  %v7799_v56 = vld [vmem:[#allocation18_spill] sm:$0xff] }
 0x5ba   : > { %v2898_v47 = vsub.f32 %v7798_v27, %v7057_v32 }
 0x5bb   : > { %v7133_v22 = vpop.permute.xlu2 %2838  ;;  %3502 = vst [vmem:[%s7095_s21 + $0x90] sm:$0xff] %v3470_v45  ;;  %v2899_v45 = vsub.f32 %v7799_v56, %v7057_v32  ;;  %v3933_v32 = vld [vmem:[%s4044_s18 + $0x38] sm:$0xff] }
 0x5bc   : > { %3503 = vst [vmem:[%s7095_s21 + $0x98] sm:$0xff] %v3471_v61  ;;  %v7800_v61 = vld [vmem:[#allocation43_spill] sm:$0xff] }
 0x5bd   : > { %v3097_v29 = vpop.permute.xlu0 %3096 }
 0x5be   : > { %v3168_v50 = vmul.f32 %v3097_v29, %v2880_v59  ;;  %v3169_v23 = vmul.f32 %v3097_v29, %v2881_v18  ;;  %v7149_v60 = vpop.permute.xlu1 %2863 }
 0x5c0   : > { %v3280_v53 = vmul.f32 %v7789_v62, %v3168_v50  ;;  %v3281_v39 = vmul.f32 %v7789_v62, %v3169_v23 }
 0x5c2   : > { %v3392_v48 = vadd.f32 %v7790_v11, %v3280_v53  ;;  %v3393_v34 = vadd.f32 %v7790_v11, %v3281_v39 }
 0x5c4   : > { %v3424_v6 = vadd.f32 %v3928_v26, %v3392_v48  ;;  %v3425_v21 = vadd.f32 %v3929_v31, %v3393_v34  ;;  %v3932_v48 = vld [vmem:[%s4044_s18 + $0x30] sm:$0xff] }
 0x5c5   : > { %v7153_v17 = vpop.permute.xlu0 %2828 }
 0x5c6   : > { %v3456_v35 = vmax.f32 %v3424_v6, 0.0  ;;  %v3457_v44 = vmax.f32 %v3425_v21, 0.0  ;;  %v7803_v6 = vld [vmem:[#allocation20_spill] sm:$0xff] }
 0x5c7   : > { %v7145_v58 = vpop.permute.xlu2 %2868 }
 0x5c8   : > { %3488 = vst [vmem:[%s7095_s21 + $0x20] sm:$0xff] %v3456_v35  ;;  %v7804_v35 = vld [vmem:[#allocation38_spill] sm:$0xff] }
 0x5c9   : > { %3489 = vst [vmem:[%s7095_s21 + $0x28] sm:$0xff] %v3457_v44 }
 0x5ce   : > { %v2834_v13 = vpop.permute.xlu1 %2833 }
 0x5cf   : > { %v2890_v54 = vsub.f32 %v7800_v61, %v2834_v13  ;;  %v2891_v59 = vsub.f32 %v7801_v12, %v2834_v13  ;;  %v7806_v13 = vld [vmem:[#allocation58_spill] sm:$0xff] }
 0x5d5   : > { %v3107_v0 = vpop.permute.xlu2 %3106 }
 0x5d6   : > { %v3172_v36 = vmul.f32 %v3107_v0, %v2884_v1  ;;  %v3173_v63 = vmul.f32 %v3107_v0, %v2885_v19  ;;  %v7805_v0 = vld [vmem:[#allocation56_spill] sm:$0xff] }
 0x5d8   : > { %v3284_v55 = vmul.f32 %v7793_v3, %v3172_v36  ;;  %v3285_v15 = vmul.f32 %v7793_v3, %v3173_v63  ;;  %v7163_v33 = vpop.permute.xlu0 %2873 }
 0x5da   : > { %v3396_v9 = vadd.f32 %v7794_v38, %v3284_v55  ;;  %v3397_v28 = vadd.f32 %v7794_v38, %v3285_v15  ;;  %v3934_v15 = vld [vmem:[%s4044_s18 + $0x70] sm:$0xff] }
 0x5dc   : > { %v3428_v51 = vadd.f32 %v3930_v37, %v3396_v9  ;;  %v3429_v30 = vadd.f32 %v3931_v25, %v3397_v28  ;;  %v3935_v9 = vld [vmem:[%s4044_s18 + $0x78] sm:$0xff]  ;;  %v3936_v37 = vld [vmem:[%s4044_s18 + $0xb0] sm:$0xff] }
 0x5dd   : > { %v7167_v40 = vpop.permute.xlu2 %3151  ;;  %v3937_v25 = vld [vmem:[%s4044_s18 + $0xb8] sm:$0xff] }
 0x5de   : > { %v3460_v49 = vmax.f32 %v3428_v51, 0.0  ;;  %v3461_v7 = vmax.f32 %v3429_v30, 0.0 }
 0x5df   : > { %v3102_v46 = vpop.permute.xlu1 %3101 }
 0x5e0   : > { %3492 = vst [vmem:[%s7095_s21 + $0x40] sm:$0xff] %v3460_v49  ;;  %v3170_v24 = vmul.f32 %v3102_v46, %v2882_v8  ;;  %v3171_v42 = vmul.f32 %v3102_v46, %v2883_v43  ;;  %v7807_v49 = vld [vmem:[#allocation28_spill] sm:$0xff]  ;;  %v2887_v8 = vsub.f32 %v7808_v57, %v7107_v16  ;;  %v2900_v43 = vsub.f32 %v7809_v4, %v7123_v14 }
 0x5e1   : > { %3493 = vst [vmem:[%s7095_s21 + $0x48] sm:$0xff] %v3461_v7  ;;  %v2886_v7 = vsub.f32 %v7807_v49, %v7107_v16  ;;  %v7811_v16 = vld [vmem:[#allocation26_spill] sm:$0xff]  ;;  %v7820_v49 = vld [vmem:[#allocation23_spill] sm:$0xff] }
 0x5e2   : > { %v3282_v5 = vmul.f32 %v7797_v20, %v3170_v24  ;;  %v3283_v52 = vmul.f32 %v7797_v20, %v3171_v42 }
 0x5e4   : > { %v3394_v18 = vadd.f32 %v7802_v10, %v3282_v5  ;;  %v3395_v29 = vadd.f32 %v7802_v10, %v3283_v52  ;;  %v7810_v5 = vld [vmem:[#allocation25_spill] sm:$0xff]  ;;  %v7812_v10 = vld [vmem:[#allocation52_spill] sm:$0xff] }
 0x5e5   : > { %v3122_v50 = vpop.permute.xlu2 %3121  ;;  %v3142_v23 = vpop.permute.xlu0 %3141  ;;  %v2901_v52 = vsub.f32 %v7810_v5, %v7123_v14 }
 0x5e6   : > { %v3178_v62 = vmul.f32 %v3122_v50, %v2890_v54  ;;  %v3179_v53 = vmul.f32 %v3122_v50, %v2891_v59  ;;  %v3186_v39 = vmul.f32 %v3142_v23, %v2898_v47  ;;  %v3187_v11 = vmul.f32 %v3142_v23, %v2899_v45 }
 0x5e7   : > { %v3426_v34 = vadd.f32 %v3932_v48, %v3394_v18  ;;  %v3427_v26 = vadd.f32 %v3933_v32, %v3395_v29  ;;  %v7191_v1 = vpop.permute.xlu1 %2798  ;;  %v7813_v29 = vld [vmem:[#allocation37_spill] sm:$0xff] }
 0x5e8   : > { %v3290_v31 = vmul.f32 %v7803_v6, %v3178_v62  ;;  %v3291_v21 = vmul.f32 %v7803_v6, %v3179_v53  ;;  %v3298_v44 = vmul.f32 %v7804_v35, %v3186_v39  ;;  %v3299_v41 = vmul.f32 %v7804_v35, %v3187_v11  ;;  %v3938_v62 = vld [vmem:[%s4044_s18 + $0x50] sm:$0xff]  ;;  %v3939_v39 = vld [vmem:[%s4044_s18 + $0x58] sm:$0xff]  ;;  %v7817_v35 = vld [vmem:[#allocation35_spill] sm:$0xff] }
 0x5e9   : > { %v3458_v2 = vmax.f32 %v3426_v34, 0.0  ;;  %v3459_v19 = vmax.f32 %v3427_v26, 0.0  ;;  %v7814_v48 = vld [vmem:[#allocation57_spill] sm:$0xff]  ;;  %v7815_v26 = vld [vmem:[#allocation4_spill] sm:$0xff] }
 0x5ea   : > { %v3402_v36 = vadd.f32 %v7805_v0, %v3290_v31  ;;  %v3403_v63 = vadd.f32 %v7805_v0, %v3291_v21  ;;  %v3410_v3 = vadd.f32 %v7806_v13, %v3298_v44  ;;  %v3411_v55 = vadd.f32 %v7806_v13, %v3299_v41  ;;  %v7816_v31 = vld [vmem:[#allocation5_spill] sm:$0xff]  ;;  %v7818_v41 = vld [vmem:[#allocation36_spill] sm:$0xff] }
 0x5eb   : > { %3490 = vst [vmem:[%s7095_s21 + $0x30] sm:$0xff] %v3458_v2  ;;  %v2892_v6 = vsub.f32 %v7815_v26, %v7133_v22  ;;  %v2893_v21 = vsub.f32 %v7816_v31, %v7133_v22  ;;  %v2888_v44 = vsub.f32 %v7817_v35, %v7153_v17  ;;  %v2889_v2 = vsub.f32 %v7818_v41, %v7153_v17  ;;  %v7829_v41 = vld [vmem:[#allocation45_spill] sm:$0xff] }
 0x5ec   : > { %3491 = vst [vmem:[%s7095_s21 + $0x38] sm:$0xff] %v3459_v19  ;;  %v3434_v38 = vadd.f32 %v3934_v15, %v3402_v36  ;;  %v3435_v28 = vadd.f32 %v3935_v9, %v3403_v63  ;;  %v3442_v51 = vadd.f32 %v3936_v37, %v3410_v3  ;;  %v3443_v30 = vadd.f32 %v3937_v25, %v3411_v55  ;;  %v3940_v63 = vld [vmem:[%s4044_s18 + $0xc0] sm:$0xff]  ;;  %v3941_v3 = vld [vmem:[%s4044_s18 + $0xc8] sm:$0xff] }
 0x5ee   : > { %v3466_v46 = vmax.f32 %v3434_v38, 0.0  ;;  %v3467_v24 = vmax.f32 %v3435_v28, 0.0  ;;  %v3474_v42 = vmax.f32 %v3442_v51, 0.0  ;;  %v3475_v27 = vmax.f32 %v3443_v30, 0.0  ;;  %v7819_v51 = vld [vmem:[#allocation31_spill] sm:$0xff] }
 0x5ef   : > { %v3112_v20 = vpop.permute.xlu0 %3111 }
 0x5f0   : > { %v3174_v47 = vmul.f32 %v3112_v20, %v2886_v7  ;;  %v3175_v56 = vmul.f32 %v3112_v20, %v2887_v8  ;;  %3498 = vst [vmem:[%s7095_s21 + $0x70] sm:$0xff] %v3466_v46  ;;  %v7821_v8 = vld [vmem:[#allocation55_spill] sm:$0xff]  ;;  %v3942_v20 = vld [vmem:[%s4044_s18 + $0x80] sm:$0xff] }
 0x5f1   : > { %v3147_v45 = vpop.permute.xlu1 %3146  ;;  %3499 = vst [vmem:[%s7095_s21 + $0x78] sm:$0xff] %v3467_v24  ;;  %v7822_v46 = vld [vmem:[#allocation51_spill] sm:$0xff] }
 0x5f2   : > { %v3286_v61 = vmul.f32 %v7811_v16, %v3174_v47  ;;  %v3287_v54 = vmul.f32 %v7811_v16, %v3175_v56  ;;  %v3188_v12 = vmul.f32 %v3147_v45, %v2900_v43  ;;  %v3189_v59 = vmul.f32 %v3147_v45, %v2901_v52  ;;  %3506 = vst [vmem:[%s7095_s21 + $0xb0] sm:$0xff] %v3474_v42  ;;  %v3943_v52 = vld [vmem:[%s4044_s18 + $0x88] sm:$0xff]  ;;  %v7823_v47 = vld [vmem:[#allocation2_spill] sm:$0xff] }
 0x5f3   : > { %3507 = vst [vmem:[%s7095_s21 + $0xb8] sm:$0xff] %v3475_v27  ;;  %v2876_v56 = vsub.f32 %v7823_v47, %v7191_v1  ;;  %v7824_v45 = vld [vmem:[#allocation3_spill] sm:$0xff] }
 0x5f4   : > { %v3398_v18 = vadd.f32 %v7812_v10, %v3286_v61  ;;  %v3399_v14 = vadd.f32 %v7812_v10, %v3287_v54  ;;  %v3300_v50 = vmul.f32 %v7813_v29, %v3188_v12  ;;  %v3301_v23 = vmul.f32 %v7813_v29, %v3189_v59  ;;  %v3944_v61 = vld [vmem:[%s4044_s18 + $0x60] sm:$0xff]  ;;  %v3945_v12 = vld [vmem:[%s4044_s18 + $0x68] sm:$0xff] }
 0x5f5   : > { %v2877_v16 = vsub.f32 %v7824_v45, %v7191_v1  ;;  %v3950_v45 = vld [vmem:[%s4044_s18 + $0xf0] sm:$0xff] }
 0x5f6   : > { %v3430_v53 = vadd.f32 %v3938_v62, %v3398_v18  ;;  %v3431_v11 = vadd.f32 %v3939_v39, %v3399_v14  ;;  %v3412_v34 = vadd.f32 %v7814_v48, %v3300_v50  ;;  %v3413_v32 = vadd.f32 %v7814_v48, %v3301_v23 }
 0x5f7   : > { %v3127_v19 = vpop.permute.xlu0 %3126 }
 0x5f8   : > { %v3462_v0 = vmax.f32 %v3430_v53, 0.0  ;;  %v3463_v36 = vmax.f32 %v3431_v11, 0.0  ;;  %v3444_v13 = vadd.f32 %v3940_v63, %v3412_v34  ;;  %v3445_v55 = vadd.f32 %v3941_v3, %v3413_v32  ;;  %v7825_v53 = vld [vmem:[#allocation39_spill] sm:$0xff]  ;;  %v7826_v11 = vld [vmem:[#allocation40_spill] sm:$0xff]  ;;  %v7827_v34 = vld [vmem:[#allocation10_spill] sm:$0xff] }
 0x5f9   : > { %v3180_v15 = vmul.f32 %v3127_v19, %v2892_v6  ;;  %v3181_v38 = vmul.f32 %v3127_v19, %v2893_v21  ;;  %v3117_v9 = vpop.permute.xlu1 %3116  ;;  %v2904_v39 = vsub.f32 %v7825_v53, %v7145_v58  ;;  %v2905_v48 = vsub.f32 %v7826_v11, %v7145_v58  ;;  %v7828_v21 = vld [vmem:[#allocation41_spill] sm:$0xff]  ;;  %v7830_v19 = vld [vmem:[#allocation46_spill] sm:$0xff] }
 0x5fa   : > { %3494 = vst [vmem:[%s7095_s21 + $0x50] sm:$0xff] %v3462_v0  ;;  %v3476_v22 = vmax.f32 %v3444_v13, 0.0  ;;  %v3477_v28 = vmax.f32 %v3445_v55, 0.0  ;;  %v3176_v37 = vmul.f32 %v3117_v9, %v2888_v44  ;;  %v3177_v17 = vmul.f32 %v3117_v9, %v2889_v2  ;;  %v3381_v13 = vpop.permute.xlu2 %3380  ;;  %v3946_v3 = vld [vmem:[%s4044_s18] sm:$0xff]  ;;  %v7832_v9 = vld [vmem:[#allocation32_spill] sm:$0xff]  ;;  %v3953_v53 = vld [vmem:[%s4044_s18 + $0xd8] sm:$0xff] }
 0x5fb   : > { %3495 = vst [vmem:[%s7095_s21 + $0x58] sm:$0xff] %v3463_v36  ;;  %v3292_v25 = vmul.f32 %v7819_v51, %v3180_v15  ;;  %v3293_v30 = vmul.f32 %v7819_v51, %v3181_v38  ;;  %v2906_v0 = vsub.f32 %v7830_v19, %v7163_v33  ;;  %v7831_v36 = vld [vmem:[#allocation47_spill] sm:$0xff] }
 0x5fc   : > { %3508 = vst [vmem:[%s7095_s21 + $0xc0] sm:$0xff] %v3476_v22  ;;  %v3288_v7 = vmul.f32 %v7820_v49, %v3176_v37  ;;  %v3289_v57 = vmul.f32 %v7820_v49, %v3177_v17  ;;  %v2907_v63 = vsub.f32 %v7831_v36, %v7163_v33  ;;  %v3947_v15 = vld [vmem:[%s4044_s18 + $0x8] sm:$0xff]  ;;  %v2902_v22 = vsub.f32 %v7832_v9, %v7149_v60 }
 0x5fd   : > { %3509 = vst [vmem:[%s7095_s21 + $0xc8] sm:$0xff] %v3477_v28  ;;  %v3404_v4 = vadd.f32 %v7821_v8, %v3292_v25  ;;  %v3405_v43 = vadd.f32 %v7821_v8, %v3293_v30  ;;  %v7833_v28 = vld [vmem:[#allocation33_spill] sm:$0xff] }
 0x5fe   : > { %v3400_v24 = vadd.f32 %v7822_v46, %v3288_v7  ;;  %v3401_v42 = vadd.f32 %v7822_v46, %v3289_v57  ;;  %v2903_v37 = vsub.f32 %v7833_v28, %v7149_v60  ;;  %v3948_v57 = vld [vmem:[%s4044_s18 + $0xe0] sm:$0xff]  ;;  %v3190_v46 = vmul.f32 %v7167_v40, %v2902_v22 }
 0x5ff   : > { %v3436_v5 = vadd.f32 %v3942_v20, %v3404_v4  ;;  %v3437_v27 = vadd.f32 %v3943_v52, %v3405_v43  ;;  %v3949_v4 = vld [vmem:[%s4044_s18 + $0xe8] sm:$0xff] }
 0x600   : > { %v3432_v54 = vadd.f32 %v3944_v61, %v3400_v24  ;;  %v3433_v59 = vadd.f32 %v3945_v12, %v3401_v42  ;;  %v3191_v60 = vmul.f32 %v7167_v40, %v2903_v37  ;;  %v7834_v24 = vld [vmem:[#allocation42_spill] sm:$0xff]  ;;  %v3951_v40 = vld [vmem:[%s4044_s18 + $0xf8] sm:$0xff] }
 0x601   : > { %v3468_v10 = vmax.f32 %v3436_v5, 0.0  ;;  %v3469_v18 = vmax.f32 %v3437_v27, 0.0  ;;  %v3087_v14 = vpop.permute.xlu1 %3086 }
 0x602   : > { %v3464_v29 = vmax.f32 %v3432_v54, 0.0  ;;  %v3465_v50 = vmax.f32 %v3433_v59, 0.0  ;;  %v3164_v23 = vmul.f32 %v3087_v14, %v2876_v56  ;;  %v3165_v62 = vmul.f32 %v3087_v14, %v2877_v16  ;;  %v7835_v54 = vld [vmem:[#allocation34_spill] sm:$0xff] }
 0x603   : > { %3500 = vst [vmem:[%s7095_s21 + $0x80] sm:$0xff] %v3468_v10  ;;  %v3157_v1 = vpop.permute.xlu0 %3156  ;;  %v3302_v12 = vmul.f32 %v7835_v54, %v3190_v46  ;;  %v3303_v59 = vmul.f32 %v7835_v54, %v3191_v60 }
 0x604   : > { %3501 = vst [vmem:[%s7095_s21 + $0x88] sm:$0xff] %v3469_v18  ;;  %v3276_v32 = vmul.f32 %v7827_v34, %v3164_v23  ;;  %v3277_v26 = vmul.f32 %v7827_v34, %v3165_v62  ;;  %v3192_v6 = vmul.f32 %v3157_v1, %v2904_v39  ;;  %v3193_v31 = vmul.f32 %v3157_v1, %v2905_v48  ;;  %v3952_v23 = vld [vmem:[%s4044_s18 + $0xd0] sm:$0xff] }
 0x605   : > { %3496 = vst [vmem:[%s7095_s21 + $0x60] sm:$0xff] %v3464_v29 }
 0x606   : > { %3497 = vst [vmem:[%s7095_s21 + $0x68] sm:$0xff] %v3465_v50  ;;  %v3388_v35 = vadd.f32 %v7828_v21, %v3276_v32  ;;  %v3389_v44 = vadd.f32 %v7828_v21, %v3277_v26  ;;  %v3304_v2 = vmul.f32 %v7829_v41, %v3192_v6  ;;  %v3305_v58 = vmul.f32 %v7829_v41, %v3193_v31 }
 0x608   : > { %v3420_v55 = vadd.f32 %v3946_v3, %v3388_v35  ;;  %v3421_v38 = vadd.f32 %v3947_v15, %v3389_v44  ;;  %v3416_v17 = vadd.f32 %v3381_v13, %v3304_v2  ;;  %v3417_v51 = vadd.f32 %v3381_v13, %v3305_v58 }
 0x609   : > { %v3162_v25 = vpop.permute.xlu1 %3161 }
 0x60a   : > { %v3452_v30 = vmax.f32 %v3420_v55, 0.0  ;;  %v3453_v49 = vmax.f32 %v3421_v38, 0.0  ;;  %v3194_v33 = vmul.f32 %v3162_v25, %v2906_v0  ;;  %v3195_v7 = vmul.f32 %v3162_v25, %v2907_v63 }
 0x60b   : > { %v3448_v8 = vadd.f32 %v3948_v57, %v3416_v17  ;;  %v3449_v43 = vadd.f32 %v3949_v4, %v3417_v51  ;;  %v3386_v27 = vpop.permute.xlu0 %3385 }
 0x60c   : > { %3484 = vst [vmem:[%s7095_s21] sm:$0xff] %v3452_v30  ;;  %v3306_v42 = vmul.f32 %v7834_v24, %v3194_v33  ;;  %v3307_v20 = vmul.f32 %v7834_v24, %v3195_v7 }
 0x60d   : > { %v3480_v5 = vmax.f32 %v3448_v8, 0.0  ;;  %v3481_v52 = vmax.f32 %v3449_v43, 0.0  ;;  %3485 = vst [vmem:[%s7095_s21 + $0x8] sm:$0xff] %v3453_v49 }
 0x60e   : > { %v3418_v47 = vadd.f32 %v3386_v27, %v3306_v42  ;;  %v3419_v56 = vadd.f32 %v3386_v27, %v3307_v20 }
 0x60f   : > { %3512 = vst [vmem:[%s7095_s21 + $0xe0] sm:$0xff] %v3480_v5 }
 0x610   : > { %3513 = vst [vmem:[%s7095_s21 + $0xe8] sm:$0xff] %v3481_v52  ;;  %v3450_v16 = vadd.f32 %v3950_v45, %v3418_v47  ;;  %v3451_v61 = vadd.f32 %v3951_v40, %v3419_v56 }
 0x611   : > { %v3376_v10 = vpop.permute.xlu1 %3375 }
 0x612   : > { %v3482_v18 = vmax.f32 %v3450_v16, 0.0  ;;  %v3483_v14 = vmax.f32 %v3451_v61, 0.0  ;;  %v3414_v29 = vadd.f32 %v3376_v10, %v3302_v12  ;;  %v3415_v50 = vadd.f32 %v3376_v10, %v3303_v59 }
 0x614   : > { %3514 = vst [vmem:[%s7095_s21 + $0xf0] sm:$0xff] %v3482_v18  ;;  %v3446_v62 = vadd.f32 %v3952_v23, %v3414_v29  ;;  %v3447_v39 = vadd.f32 %v3953_v53, %v3415_v50 }
 0x615   : > { %3515 = vst [vmem:[%s7095_s21 + $0xf8] sm:$0xff] %v3483_v14 }
 0x616   : > { %v3478_v11 = vmax.f32 %v3446_v62, 0.0  ;;  %v3479_v48 = vmax.f32 %v3447_v39, 0.0 }
 0x618   : > { %3510 = vst [vmem:[%s7095_s21 + $0xd0] sm:$0xff] %v3478_v11 }
 0x619   : > { %3511 = vst [vmem:[%s7095_s21 + $0xd8] sm:$0xff] %v3479_v48 }
 0x61a PF: > { %s20_s13 = sadd.s32 1, %s3960_s13  }
 0x61b   : > { %p17_p4 = scmp.ge.s32.totalorder %s20_s13, 4  }
 0x61d   :  { %19 = sbr.rel (!%p17_p4) target bundleno = 1 (0x1), region = 90 }

</bundles_post_ra>
